<compile_context>
chip_gen: v7x
topology: tpu7x:2x2x1
jax: 0.10.0
libtpu: 0.0.40
codegen_flags: <defaults>
</compile_context>

<pallas_src>
import jax
import jax.numpy as jnp
from jax.experimental import pallas as pl
from jax.experimental.pallas import tpu as pltpu

EPS = 1e-5
NUM_FEATURES = 2 * 2 * 128  # 512


# ----------------------------------------------------------------------------
# Chip-aware tile targets
# ----------------------------------------------------------------------------
def _vmem_capacity_bytes():
    try:
        return int(pltpu.get_tpu_info().vmem_capacity_bytes)
    except Exception:
        return 64 << 20  # v7x-safe assumption if the query is unavailable


_BIG_VMEM = _vmem_capacity_bytes() >= (100 << 20)  # v5e/v6e: 128 MiB per core
# Pooled-row tile targets: large enough to amortize per-step overhead, small
# enough that the double-buffered blocks fit v7x's 64 MiB VMEM.
CONV1_TM = 4096 if _BIG_VMEM else 2048   # conv1 K=75:   cols block <= 2.4 MiB
CONV2_TM = 1024 if _BIG_VMEM else 512    # conv2 K=1600: cols block <= 13 MiB
HEAD_TN = 1024 if _BIG_VMEM else 512     # head  K=576:  cols block <= 4.7 MiB


def _pick_tile(m, target, mult=16):
    """Largest multiple-of-`mult` divisor of m that is <= target, else m."""
    if m <= target:
        return m
    t = target - (target % mult)
    while t > mult and m % t:
        t -= mult
    return t if (t >= mult and m % t == 0) else m


def _vmem_limit_bytes(*nbytes):
    needed = 2 * sum(int(b) for b in nbytes)  # double-buffered blocks
    return int(max(needed + (8 << 20), 32 << 20))


# ----------------------------------------------------------------------------
# Pallas kernels
# ----------------------------------------------------------------------------
def _conv_pool_relu_kernel(cols_ref, w_ref, b_ref, o_ref):
    """Fused conv (im2col matmul) + folded-BN bias + 2x2 maxpool + ReLU.

    cols_ref: (4, TM, K) bf16 -- patches; leading axis = 2x2 pool position
    w_ref:    (K, 128)   bf16 -- conv weight, BN scale folded, out-padded to 128
    b_ref:    (1, 128)   f32  -- folded conv+BN bias (zero in padded channels)
    o_ref:    (TM, 128)  bf16 -- pooled, ReLU'd rows ordered (n, hp, wp)
    """
    nq, tm, k = cols_ref.shape
    # One MXU push for all 4 pool positions (TM is a multiple of 16, so the
    # leading-dim collapse is layout-preserving).
    y = jnp.dot(cols_ref[...].reshape(nq * tm, k), w_ref[...],
                preferred_element_type=jnp.float32)
    y = jnp.max(y.reshape(nq, tm, y.shape[-1]), axis=0)   # 2x2 max pool
    # bias is constant per channel across the pool window, so add after the max
    o_ref[...] = jnp.maximum(y + b_ref[...], 0.0).astype(o_ref.dtype)


def _log_softmax(y):
    y = y - jnp.max(y, axis=-1, keepdims=True)
    return y - jnp.log(jnp.sum(jnp.exp(y), axis=-1, keepdims=True))


def _head_kernel(cols3_ref, w3_ref, w1_ref, b1_ref, wc2_ref, bc2_ref,
                 wc3_ref, bc3_ref, wd2_ref, bd2_ref, cls_ref, dom_ref):
    """Fused conv3 + class classifier + domain classifier (all in VMEM).

    cols3_ref: (4, TN, 576)  bf16 -- conv3 im2col patches, spatial-pos major
    w3_ref:    (576, 128)    bf16 -- conv3 weight (bias folded into b1_ref)
    w1_ref:    (4, 128, 256) bf16 -- [wc1 | wd1], BN folded, rows permuted so
                                      the NHWC conv3 output is consumed directly
    wc2/wc3/wd2: padded-to-128 classifier weights; biases f32.
    """
    # conv3 + first Linear of both classifiers, consumed position-by-position
    # (each dot has M=TN rows, so the MXU is well filled; no transpose needed).
    h1 = None
    for s in range(4):
        y3 = jnp.dot(cols3_ref[s], w3_ref[...],
                     preferred_element_type=jnp.float32).astype(jnp.bfloat16)
        c = jnp.dot(y3, w1_ref[s], preferred_element_type=jnp.float32)
        h1 = c if h1 is None else h1 + c
    h1 = jnp.maximum(h1 + b1_ref[...], 0.0)          # (TN, 256) f32
    hc = h1[:, :128].astype(jnp.bfloat16)            # class hidden-1
    hd = h1[:, 128:].astype(jnp.bfloat16)            # domain hidden-1

    # class classifier: Linear+BN+ReLU -> Linear -> LogSoftmax
    h2 = jnp.dot(hc, wc2_ref[...], preferred_element_type=jnp.float32)
    h2 = jnp.maximum(h2 + bc2_ref[...], 0.0).astype(jnp.bfloat16)
    logit_c = jnp.dot(h2, wc3_ref[...],
                      preferred_element_type=jnp.float32) + bc3_ref[...]
    # domain classifier: Linear -> LogSoftmax
    logit_d = jnp.dot(hd, wd2_ref[...],
                      preferred_element_type=jnp.float32) + bd2_ref[...]
    cls_ref[...] = _log_softmax(logit_c)
    dom_ref[...] = _log_softmax(logit_d)


# ----------------------------------------------------------------------------
# pallas_call wrappers
# ----------------------------------------------------------------------------
def conv_pool_relu(cols, w, b, *, tm_target):
    _, m, k = cols.shape
    kw_, cout = w.shape
    assert kw_ == k
    tm = _pick_tile(m, tm_target, mult=16)   # m is always a multiple of 16
    grid = (m // tm,)
    cols_blk = 4 * tm * k * cols.dtype.itemsize
    out_blk = tm * cout * 2
    w_bytes = w.size * w.dtype.itemsize + b.size * b.dtype.itemsize
    return pl.pallas_call(
        _conv_pool_relu_kernel,
        out_shape=jax.ShapeDtypeStruct((m, cout), jnp.bfloat16),
        grid=grid,
        in_specs=[
            pl.BlockSpec((4, tm, k), lambda i: (0, i, 0)),
            pl.BlockSpec((k, cout), lambda i: (0, 0)),     # resident weight
            pl.BlockSpec((1, cout), lambda i: (0, 0)),     # resident bias
        ],
        out_specs=pl.BlockSpec((tm, cout), lambda i: (i, 0)),
        compiler_params=pltpu.CompilerParams(
            dimension_semantics=("parallel",),
            vmem_limit_bytes=_vmem_limit_bytes(cols_blk, out_blk, w_bytes)),
    )(cols, w, b)


def conv3_and_heads(cols3, q, *, tn_target):
    _, n, k3 = cols3.shape
    tn = _pick_tile(n, tn_target, mult=8)
    grid = (n // tn,)
    cols_blk = 4 * tn * k3 * cols3.dtype.itemsize
    out_blk = tn * 12 * 4
    w_bytes = sum(int(q[name].size * q[name].dtype.itemsize)
                  for name in ('w3', 'w1cd', 'b1cd', 'wc2', 'bc2', 'wc3',
                               'bc3', 'wd2', 'bd2'))
    c2 = lambda i: (0, 0)
    c3 = lambda i: (0, 0, 0)
    in_specs = [
        pl.BlockSpec((4, tn, k3), lambda i: (0, i, 0)),
        pl.BlockSpec(q['w3'].shape, c2),       # weights: constant index maps
        pl.BlockSpec(q['w1cd'].shape, c3),     # -> stay resident in VMEM
        pl.BlockSpec(q['b1cd'].shape, c2),
        pl.BlockSpec(q['wc2'].shape, c2),
        pl.BlockSpec(q['bc2'].shape, c2),
        pl.BlockSpec(q['wc3'].shape, c2),
        pl.BlockSpec(q['bc3'].shape, c2),
        pl.BlockSpec(q['wd2'].shape, c2),
        pl.BlockSpec(q['bd2'].shape, c2),
    ]
    return pl.pallas_call(
        _head_kernel,
        out_shape=(jax.ShapeDtypeStruct((n, 10), jnp.float32),
                   jax.ShapeDtypeStruct((n, 2), jnp.float32)),
        grid=grid,
        in_specs=in_specs,
        out_specs=(pl.BlockSpec((tn, 10), lambda i: (i, 0)),
                   pl.BlockSpec((tn, 2), lambda i: (i, 0))),
        compiler_params=pltpu.CompilerParams(
            dimension_semantics=("parallel",),
            vmem_limit_bytes=_vmem_limit_bytes(cols_blk, out_blk, w_bytes)),
    )(cols3, q['w3'], q['w1cd'], q['b1cd'], q['wc2'], q['bc2'],
      q['wc3'], q['bc3'], q['wd2'], q['bd2'])


# ----------------------------------------------------------------------------
# Layout glue (wrapper-side XLA reshapes/slices)
# ----------------------------------------------------------------------------
def _pad_axis(a, axis, mult):
    pad = (-a.shape[axis]) % mult
    if pad == 0:
        return a
    widths = [(0, 0)] * a.ndim
    widths[axis] = (0, pad)
    return jnp.pad(a, widths)


def _im2col_pool_cols(x, k):
    """(N,H,W,C) -> (4, N*Hp*Wp, k*k*C), patches grouped by 2x2 pool window."""
    n, h, w, c = x.shape
    ho, wo = h - k + 1, w - k + 1
    hp, wp = ho // 2, wo // 2
    taps = [x[:, i:i + ho, j:j + wo, :] for i in range(k) for j in range(k)]
    p = jnp.stack(taps, axis=3)                          # (N, Ho, Wo, k*k, C)
    p = p.reshape(n, hp, 2, wp, 2, k * k * c)
    p = p.transpose(2, 4, 0, 1, 3, 5)                    # (2, 2, N, Hp, Wp, K)
    return p.reshape(4, n * hp * wp, k * k * c)


def _im2col_pos_major(x, k):
    """(N,H,W,C) -> (Ho*Wo, N, k*k*C), spatial-position-major rows."""
    n, h, w, c = x.shape
    ho, wo = h - k + 1, w - k + 1
    taps = [x[:, i:i + ho, j:j + wo, :] for i in range(k) for j in range(k)]
    p = jnp.stack(taps, axis=3).reshape(n, ho * wo, k * k * c)
    return p.transpose(1, 0, 2)


# ----------------------------------------------------------------------------
# Parameters
# ----------------------------------------------------------------------------
def fold_bn(bn, bias):
    gamma, beta, mean, var = bn
    scale = gamma / jnp.sqrt(var + EPS)
    return scale, beta + scale * (bias - mean)


def default_bn(c):
    # PyTorch BatchNorm defaults: gamma=1, beta=0, running_mean=0, running_var=1
    return (jnp.ones((c,), jnp.float32), jnp.zeros((c,), jnp.float32),
            jnp.zeros((c,), jnp.float32), jnp.ones((c,), jnp.float32))


def init_params(key):
    ks = jax.random.split(key, 8)

    def w(k, shape):
        return jax.random.normal(k, shape, jnp.float32) / jnp.sqrt(shape[0])

    def b(k, n):
        return 0.01 * jax.random.normal(k, (n,), jnp.float32)

    p = {}
    k0, k1 = jax.random.split(ks[0]); p['w1'], p['cb1'] = w(k0, (75, 64)), b(k1, 64)
    p['bn1'] = default_bn(64)
    k0, k1 = jax.random.split(ks[1]); p['w2'], p['cb2'] = w(k0, (1600, 64)), b(k1, 64)
    p['bn2'] = default_bn(64)
    k0, k1 = jax.random.split(ks[2]); p['w3'], p['cb3'] = w(k0, (576, 128)), b(k1, 128)
    k0, k1 = jax.random.split(ks[3]); p['wc1'], p['bc1'] = w(k0, (512, 100)), b(k1, 100)
    p['bnc1'] = default_bn(100)
    k0, k1 = jax.random.split(ks[4]); p['wc2'], p['bc2'] = w(k0, (100, 100)), b(k1, 100)
    p['bnc2'] = default_bn(100)
    k0, k1 = jax.random.split(ks[5]); p['wc3'], p['bc3'] = w(k0, (100, 10)), b(k1, 10)
    k0, k1 = jax.random.split(ks[6]); p['wd1'], p['bd1'] = w(k0, (512, 100)), b(k1, 100)
    p['bnd1'] = default_bn(100)
    k0, k1 = jax.random.split(ks[7]); p['wd2'], p['bd2'] = w(k0, (100, 2)), b(k1, 2)
    return p


def prepare_params(p):
    """Fold BN scales into weights, permute/concatenate/pad, cast to bf16."""
    q = {}
    # conv1 / conv2: fold BN, pad OUTPUT channels 64->128 (lane-dense stores)
    s, bb = fold_bn(p['bn1'], p['cb1'])
    q['w1'] = _pad_axis(p['w1'] * s[None, :], 1, 128).astype(jnp.bfloat16)  # (75,128)
    q['b1'] = _pad_axis(bb.reshape(1, -1), 1, 128).astype(jnp.float32)
    s, bb = fold_bn(p['bn2'], p['cb2'])
    q['w2'] = _pad_axis(p['w2'] * s[None, :], 1, 128).astype(jnp.bfloat16)  # (1600,128)
    q['b2'] = _pad_axis(bb.reshape(1, -1), 1, 128).astype(jnp.float32)
    # conv3: already 128 output channels; its bias is folded into b1cd below
    q['w3'] = p['w3'].astype(jnp.bfloat16)                                  # (576,128)

    def head_first(w, bias, bn):
        # rows of w are indexed by PyTorch's NCHW flat feature j = c*4 + s;
        # reorder to (s, c, out) so the NHWC conv3 output is consumed directly.
        s_, bb_ = fold_bn(bn, bias)
        ws = (w * s_[None, :]).reshape(128, 4, 100).transpose(1, 0, 2)
        return _pad_axis(ws, 2, 128), _pad_axis(bb_.reshape(1, -1), 1, 128)

    wc1p, bc1p = head_first(p['wc1'], p['bc1'], p['bnc1'])
    wd1p, bd1p = head_first(p['wd1'], p['bd1'], p['bnd1'])
    w1cd = jnp.concatenate([wc1p, wd1p], axis=-1)                # (4,128,256)
    b1cd = jnp.concatenate([bc1p, bd1p], axis=-1)                # (1,256)
    # fold conv3 bias: sum_s (y3_s + b3) @ W_s == sum_s y3_s @ W_s + b3 @ sum_s W_s
    b1cd = b1cd + p['cb3'].reshape(1, 128) @ w1cd.sum(axis=0)
    q['w1cd'] = w1cd.astype(jnp.bfloat16)
    q['b1cd'] = b1cd.astype(jnp.float32)

    s, bb = fold_bn(p['bnc2'], p['bc2'])
    q['wc2'] = _pad_axis(_pad_axis(p['wc2'] * s[None, :], 0, 128),
                         1, 128).astype(jnp.bfloat16)            # (128,128)
    q['bc2'] = _pad_axis(bb.reshape(1, -1), 1, 128).astype(jnp.float32)
    q['wc3'] = _pad_axis(p['wc3'], 0, 128).astype(jnp.bfloat16)  # (128,10)
    q['bc3'] = p['bc3'].reshape(1, -1).astype(jnp.float32)
    q['wd2'] = _pad_axis(p['wd2'], 0, 128).astype(jnp.bfloat16)  # (128,2)
    q['bd2'] = p['bd2'].reshape(1, -1).astype(jnp.float32)
    return q


# ----------------------------------------------------------------------------
# Forward pass
# ----------------------------------------------------------------------------
def dann_cnn_forward(x_nchw, q, alpha):
    del alpha  # gradient-reversal scale: identity in the forward pass
    x = jnp.transpose(x_nchw, (0, 2, 3, 1)).astype(jnp.bfloat16)  # NCHW -> NHWC
    n = x.shape[0]

    # Conv2d(3,64,5) + BN2d + MaxPool2d(2) + ReLU              28x28 -> 12x12
    cols = _im2col_pool_cols(x, 5)                               # (4, n*144, 75)
    y = conv_pool_relu(cols, q['w1'], q['b1'], tm_target=CONV1_TM)
    y = y.reshape(n, 12, 12, 128)[..., :64]                      # drop pad channels

    # Conv2d(64,64,5) + BN2d + Dropout2d(id) + MaxPool2d(2) + ReLU  12x12 -> 4x4
    cols = _im2col_pool_cols(y, 5)                               # (4, n*16, 1600)
    y = conv_pool_relu(cols, q['w2'], q['b2'], tm_target=CONV2_TM)
    y = y.reshape(n, 4, 4, 128)[..., :64]

    # Conv2d(64,128,3) + flatten + class/domain classifiers: one gridded kernel
    cols3 = _im2col_pos_major(y, 3)                              # (4, n, 576)
    class_output, domain_output = conv3_and_heads(cols3, q, tn_target=HEAD_TN)
    return class_output, domain_output


if __name__ == "__main__":
    key = jax.random.PRNGKey(0)
    pkey, xkey = jax.random.split(key)
    params = init_params(pkey)
    prep = prepare_params(params)
    # 28x28 input is what num_features = 2*2*128 implies (MNIST-M style).
    x = jax.random.normal(xkey, (2, 3, 28, 28), jnp.float32)  # NCHW, like PyTorch
    alpha = 0.5

    fwd = jax.jit(dann_cnn_forward)
    class_out, domain_out = fwd(x, prep, alpha)
    jax.block_until_ready((class_out, domain_out))

    assert class_out.shape == (2, 10), class_out.shape
    assert domain_out.shape == (2, 2), domain_out.shape
    # log-softmax rows must exponentiate-sum to 1
    assert jnp.allclose(jnp.exp(class_out).sum(axis=1), 1.0, atol=1e-4)
    assert jnp.allclose(jnp.exp(domain_out).sum(axis=1), 1.0, atol=1e-4)
    print("KERNEL_OK")
</pallas_src>

<mosaic_0001>
module attributes {stable_mosaic.version = 11 : i64} {
  func.func @_conv_pool_relu_kernel(%arg0: i32, %arg1: memref<4x288x75xbf16, #tpu.memory_space<vmem>>, %arg2: memref<75x128xbf16, #tpu.memory_space<vmem>>, %arg3: memref<1x128xf32, #tpu.memory_space<vmem>>, %arg4: memref<288x128xbf16, #tpu.memory_space<vmem>>) attributes {dimension_semantics = [#tpu.dimension_semantics<parallel>], iteration_bounds = array<i64: 1>, scalar_prefetch = 0 : i64, scratch_operands = 0 : i64, tpu.core_type = #tpu.core_type<tc>, window_params = [{transform_indices = @transform_0, window_bounds = array<i64: 4, 288, 75>}, {pipeline_mode = #tpu.pipeline_mode<synchronous>, transform_indices = @transform_1, window_bounds = array<i64: 75, 128>}, {pipeline_mode = #tpu.pipeline_mode<synchronous>, transform_indices = @transform_2, window_bounds = array<i64: 1, 128>}, {transform_indices = @transform_3, window_bounds = array<i64: 288, 128>}]} {
    %c0 = arith.constant 0 : index
    %c0_0 = arith.constant 0 : index
    %c0_1 = arith.constant 0 : index
    %0 = vector.load %arg1[%c0, %c0_0, %c0_1] : memref<4x288x75xbf16, #tpu.memory_space<vmem>>, vector<4x288x75xbf16>
    %1 = vector.shape_cast %0 : vector<4x288x75xbf16> to vector<1152x75xbf16>
    %c0_2 = arith.constant 0 : index
    %c0_3 = arith.constant 0 : index
    %2 = vector.load %arg2[%c0_2, %c0_3] : memref<75x128xbf16, #tpu.memory_space<vmem>>, vector<75x128xbf16>
    %cst = arith.constant dense<0.000000e+00> : vector<1152x128xf32>
    %3 = tpu.matmul %1, %2, %cst {dimension_numbers = #tpu.dot_dimension_numbers<[1], [0], [0], [1], [0, 0, 1, 1], [], []>} : vector<1152x75xbf16>, vector<75x128xbf16>, vector<1152x128xf32> -> vector<1152x128xf32>
    %4 = vector.shape_cast %3 : vector<1152x128xf32> to vector<4x288x128xf32>
    %cst_4 = arith.constant dense<0xFF800000> : vector<288x128xf32>
    %5 = vector.multi_reduction <maximumf>, %4, %cst_4 [0] : vector<4x288x128xf32> to vector<288x128xf32>
    %c0_5 = arith.constant 0 : index
    %c0_6 = arith.constant 0 : index
    %6 = vector.load %arg3[%c0_5, %c0_6] : memref<1x128xf32, #tpu.memory_space<vmem>>, vector<1x128xf32>
    %7 = vector.broadcast %6 : vector<1x128xf32> to vector<288x128xf32>
    %8 = arith.addf %5, %7 : vector<288x128xf32>
    %cst_7 = arith.constant 0.000000e+00 : f32
    %9 = vector.broadcast %cst_7 : f32 to vector<288x128xf32>
    %10 = arith.maximumf %8, %9 : vector<288x128xf32>
    %11 = arith.truncf %10 : vector<288x128xf32> to vector<288x128xbf16>
    %c0_8 = arith.constant 0 : index
    %c0_9 = arith.constant 0 : index
    %12 = vector.load %arg4[%c0_8, %c0_9] : memref<288x128xbf16, #tpu.memory_space<vmem>>, vector<288x128xbf16>
    tpu.vector_store %arg4[%c0_8, %c0_9], %11 {strides = array<i32>} : memref<288x128xbf16, #tpu.memory_space<vmem>>, vector<288x128xbf16>,
    return
  }
  func.func @transform_0(%arg0: i32) -> (i32, i32, i32) {
    %c0_i32 = arith.constant 0 : i32
    %c0_i32_0 = arith.constant 0 : i32
    %c0_i32_1 = arith.constant 0 : i32
    return %c0_i32, %arg0, %c0_i32_0 : i32, i32, i32
  }
  func.func @transform_1(%arg0: i32) -> (i32, i32) {
    %c0_i32 = arith.constant 0 : i32
    %c0_i32_0 = arith.constant 0 : i32
    %c0_i32_1 = arith.constant 0 : i32
    return %c0_i32, %c0_i32_0 : i32, i32
  }
  func.func @transform_2(%arg0: i32) -> (i32, i32) {
    %c0_i32 = arith.constant 0 : i32
    %c0_i32_0 = arith.constant 0 : i32
    %c0_i32_1 = arith.constant 0 : i32
    return %c0_i32, %c0_i32_0 : i32, i32
  }
  func.func @transform_3(%arg0: i32) -> (i32, i32) {
    %c0_i32 = arith.constant 0 : i32
    %c0_i32_0 = arith.constant 0 : i32
    return %arg0, %c0_i32 : i32, i32
  }
}

module attributes {stable_mosaic.version = 11 : i64} {
  func.func @_conv_pool_relu_kernel(%arg0: i32, %arg1: memref<4x32x1600xbf16, #tpu.memory_space<vmem>>, %arg2: memref<1600x128xbf16, #tpu.memory_space<vmem>>, %arg3: memref<1x128xf32, #tpu.memory_space<vmem>>, %arg4: memref<32x128xbf16, #tpu.memory_space<vmem>>) attributes {dimension_semantics = [#tpu.dimension_semantics<parallel>], iteration_bounds = array<i64: 1>, scalar_prefetch = 0 : i64, scratch_operands = 0 : i64, tpu.core_type = #tpu.core_type<tc>, window_params = [{transform_indices = @transform_0, window_bounds = array<i64: 4, 32, 1600>}, {pipeline_mode = #tpu.pipeline_mode<synchronous>, transform_indices = @transform_1, window_bounds = array<i64: 1600, 128>}, {pipeline_mode = #tpu.pipeline_mode<synchronous>, transform_indices = @transform_2, window_bounds = array<i64: 1, 128>}, {transform_indices = @transform_3, window_bounds = array<i64: 32, 128>}]} {
    %c0 = arith.constant 0 : index
    %c0_0 = arith.constant 0 : index
    %c0_1 = arith.constant 0 : index
    %0 = vector.load %arg1[%c0, %c0_0, %c0_1] : memref<4x32x1600xbf16, #tpu.memory_space<vmem>>, vector<4x32x1600xbf16>
    %1 = vector.shape_cast %0 : vector<4x32x1600xbf16> to vector<128x1600xbf16>
    %c0_2 = arith.constant 0 : index
    %c0_3 = arith.constant 0 : index
    %2 = vector.load %arg2[%c0_2, %c0_3] : memref<1600x128xbf16, #tpu.memory_space<vmem>>, vector<1600x128xbf16>
    %cst = arith.constant dense<0.000000e+00> : vector<128x128xf32>
    %3 = tpu.matmul %1, %2, %cst {dimension_numbers = #tpu.dot_dimension_numbers<[1], [0], [0], [1], [0, 0, 1, 1], [], []>} : vector<128x1600xbf16>, vector<1600x128xbf16>, vector<128x128xf32> -> vector<128x128xf32>
    %4 = vector.shape_cast %3 : vector<128x128xf32> to vector<4x32x128xf32>
    %cst_4 = arith.constant dense<0xFF800000> : vector<32x128xf32>
    %5 = vector.multi_reduction <maximumf>, %4, %cst_4 [0] : vector<4x32x128xf32> to vector<32x128xf32>
    %c0_5 = arith.constant 0 : index
    %c0_6 = arith.constant 0 : index
    %6 = vector.load %arg3[%c0_5, %c0_6] : memref<1x128xf32, #tpu.memory_space<vmem>>, vector<1x128xf32>
    %7 = vector.broadcast %6 : vector<1x128xf32> to vector<32x128xf32>
    %8 = arith.addf %5, %7 : vector<32x128xf32>
    %cst_7 = arith.constant 0.000000e+00 : f32
    %9 = vector.broadcast %cst_7 : f32 to vector<32x128xf32>
    %10 = arith.maximumf %8, %9 : vector<32x128xf32>
    %11 = arith.truncf %10 : vector<32x128xf32> to vector<32x128xbf16>
    %c0_8 = arith.constant 0 : index
    %c0_9 = arith.constant 0 : index
    %12 = vector.load %arg4[%c0_8, %c0_9] : memref<32x128xbf16, #tpu.memory_space<vmem>>, vector<32x128xbf16>
    tpu.vector_store %arg4[%c0_8, %c0_9], %11 {strides = array<i32>} : memref<32x128xbf16, #tpu.memory_space<vmem>>, vector<32x128xbf16>,
    return
  }
  func.func @transform_0(%arg0: i32) -> (i32, i32, i32) {
    %c0_i32 = arith.constant 0 : i32
    %c0_i32_0 = arith.constant 0 : i32
    %c0_i32_1 = arith.constant 0 : i32
    return %c0_i32, %arg0, %c0_i32_0 : i32, i32, i32
  }
  func.func @transform_1(%arg0: i32) -> (i32, i32) {
    %c0_i32 = arith.constant 0 : i32
    %c0_i32_0 = arith.constant 0 : i32
    %c0_i32_1 = arith.constant 0 : i32
    return %c0_i32, %c0_i32_0 : i32, i32
  }
  func.func @transform_2(%arg0: i32) -> (i32, i32) {
    %c0_i32 = arith.constant 0 : i32
    %c0_i32_0 = arith.constant 0 : i32
    %c0_i32_1 = arith.constant 0 : i32
    return %c0_i32, %c0_i32_0 : i32, i32
  }
  func.func @transform_3(%arg0: i32) -> (i32, i32) {
    %c0_i32 = arith.constant 0 : i32
    %c0_i32_0 = arith.constant 0 : i32
    return %arg0, %c0_i32 : i32, i32
  }
}

module attributes {stable_mosaic.version = 11 : i64} {
  func.func @_head_kernel(%arg0: i32, %arg1: memref<4x2x576xbf16, #tpu.memory_space<vmem>>, %arg2: memref<576x128xbf16, #tpu.memory_space<vmem>>, %arg3: memref<4x128x256xbf16, #tpu.memory_space<vmem>>, %arg4: memref<1x256xf32, #tpu.memory_space<vmem>>, %arg5: memref<128x128xbf16, #tpu.memory_space<vmem>>, %arg6: memref<1x128xf32, #tpu.memory_space<vmem>>, %arg7: memref<128x10xbf16, #tpu.memory_space<vmem>>, %arg8: memref<1x10xf32, #tpu.memory_space<vmem>>, %arg9: memref<128x2xbf16, #tpu.memory_space<vmem>>, %arg10: memref<1x2xf32, #tpu.memory_space<vmem>>, %arg11: memref<2x10xf32, #tpu.memory_space<vmem>>, %arg12: memref<2x2xf32, #tpu.memory_space<vmem>>) attributes {dimension_semantics = [#tpu.dimension_semantics<parallel>], iteration_bounds = array<i64: 1>, scalar_prefetch = 0 : i64, scratch_operands = 0 : i64, tpu.core_type = #tpu.core_type<tc>, window_params = [{transform_indices = @transform_0, window_bounds = array<i64: 4, 2, 576>}, {pipeline_mode = #tpu.pipeline_mode<synchronous>, transform_indices = @transform_1, window_bounds = array<i64: 576, 128>}, {pipeline_mode = #tpu.pipeline_mode<synchronous>, transform_indices = @transform_2, window_bounds = array<i64: 4, 128, 256>}, {pipeline_mode = #tpu.pipeline_mode<synchronous>, transform_indices = @transform_3, window_bounds = array<i64: 1, 256>}, {pipeline_mode = #tpu.pipeline_mode<synchronous>, transform_indices = @transform_4, window_bounds = array<i64: 128, 128>}, {pipeline_mode = #tpu.pipeline_mode<synchronous>, transform_indices = @transform_5, window_bounds = array<i64: 1, 128>}, {pipeline_mode = #tpu.pipeline_mode<synchronous>, transform_indices = @transform_6, window_bounds = array<i64: 128, 10>}, {pipeline_mode = #tpu.pipeline_mode<synchronous>, transform_indices = @transform_7, window_bounds = array<i64: 1, 10>}, {pipeline_mode = #tpu.pipeline_mode<synchronous>, transform_indices = @transform_8, window_bounds = array<i64: 128, 2>}, {pipeline_mode = #tpu.pipeline_mode<synchronous>, transform_indices = @transform_9, window_bounds = array<i64: 1, 2>}, {transform_indices = @transform_10, window_bounds = array<i64: 2, 10>}, {transform_indices = @transform_11, window_bounds = array<i64: 2, 2>}]} {
    %c0 = arith.constant 0 : index
    %c0_0 = arith.constant 0 : index
    %c0_1 = arith.constant 0 : index
    %0 = vector.load %arg1[%c0, %c0_0, %c0_1] : memref<4x2x576xbf16, #tpu.memory_space<vmem>>, vector<1x2x576xbf16>
    %1 = vector.shape_cast %0 : vector<1x2x576xbf16> to vector<2x576xbf16>
    %c0_2 = arith.constant 0 : index
    %c0_3 = arith.constant 0 : index
    %2 = vector.load %arg2[%c0_2, %c0_3] : memref<576x128xbf16, #tpu.memory_space<vmem>>, vector<576x128xbf16>
    %cst = arith.constant dense<0.000000e+00> : vector<2x128xf32>
    %3 = tpu.matmul %1, %2, %cst {dimension_numbers = #tpu.dot_dimension_numbers<[1], [0], [0], [1], [0, 0, 1, 1], [], []>} : vector<2x576xbf16>, vector<576x128xbf16>, vector<2x128xf32> -> vector<2x128xf32>
    %4 = arith.truncf %3 : vector<2x128xf32> to vector<2x128xbf16>
    %c0_4 = arith.constant 0 : index
    %c0_5 = arith.constant 0 : index
    %c0_6 = arith.constant 0 : index
    %5 = vector.load %arg3[%c0_4, %c0_5, %c0_6] : memref<4x128x256xbf16, #tpu.memory_space<vmem>>, vector<1x128x256xbf16>
    %6 = vector.shape_cast %5 : vector<1x128x256xbf16> to vector<128x256xbf16>
    %cst_7 = arith.constant dense<0.000000e+00> : vector<2x256xf32>
    %7 = tpu.matmul %4, %6, %cst_7 {dimension_numbers = #tpu.dot_dimension_numbers<[1], [0], [0], [1], [0, 0, 1, 1], [], []>} : vector<2x128xbf16>, vector<128x256xbf16>, vector<2x256xf32> -> vector<2x256xf32>
    %c1 = arith.constant 1 : index
    %c0_8 = arith.constant 0 : index
    %c0_9 = arith.constant 0 : index
    %8 = vector.load %arg1[%c1, %c0_8, %c0_9] : memref<4x2x576xbf16, #tpu.memory_space<vmem>>, vector<1x2x576xbf16>
    %9 = vector.shape_cast %8 : vector<1x2x576xbf16> to vector<2x576xbf16>
    %c0_10 = arith.constant 0 : index
    %c0_11 = arith.constant 0 : index
    %10 = vector.load %arg2[%c0_10, %c0_11] : memref<576x128xbf16, #tpu.memory_space<vmem>>, vector<576x128xbf16>
    %cst_12 = arith.constant dense<0.000000e+00> : vector<2x128xf32>
    %11 = tpu.matmul %9, %10, %cst_12 {dimension_numbers = #tpu.dot_dimension_numbers<[1], [0], [0], [1], [0, 0, 1, 1], [], []>} : vector<2x576xbf16>, vector<576x128xbf16>, vector<2x128xf32> -> vector<2x128xf32>
    %12 = arith.truncf %11 : vector<2x128xf32> to vector<2x128xbf16>
    %c1_13 = arith.constant 1 : index
    %c0_14 = arith.constant 0 : index
    %c0_15 = arith.constant 0 : index
    %13 = vector.load %arg3[%c1_13, %c0_14, %c0_15] : memref<4x128x256xbf16, #tpu.memory_space<vmem>>, vector<1x128x256xbf16>
    %14 = vector.shape_cast %13 : vector<1x128x256xbf16> to vector<128x256xbf16>
    %cst_16 = arith.constant dense<0.000000e+00> : vector<2x256xf32>
    %15 = tpu.matmul %12, %14, %cst_16 {dimension_numbers = #tpu.dot_dimension_numbers<[1], [0], [0], [1], [0, 0, 1, 1], [], []>} : vector<2x128xbf16>, vector<128x256xbf16>, vector<2x256xf32> -> vector<2x256xf32>
    %16 = arith.addf %7, %15 : vector<2x256xf32>
    %c2 = arith.constant 2 : index
    %c0_17 = arith.constant 0 : index
    %c0_18 = arith.constant 0 : index
    %17 = vector.load %arg1[%c2, %c0_17, %c0_18] : memref<4x2x576xbf16, #tpu.memory_space<vmem>>, vector<1x2x576xbf16>
    %18 = vector.shape_cast %17 : vector<1x2x576xbf16> to vector<2x576xbf16>
    %c0_19 = arith.constant 0 : index
    %c0_20 = arith.constant 0 : index
    %19 = vector.load %arg2[%c0_19, %c0_20] : memref<576x128xbf16, #tpu.memory_space<vmem>>, vector<576x128xbf16>
    %cst_21 = arith.constant dense<0.000000e+00> : vector<2x128xf32>
    %20 = tpu.matmul %18, %19, %cst_21 {dimension_numbers = #tpu.dot_dimension_numbers<[1], [0], [0], [1], [0, 0, 1, 1], [], []>} : vector<2x576xbf16>, vector<576x128xbf16>, vector<2x128xf32> -> vector<2x128xf32>
    %21 = arith.truncf %20 : vector<2x128xf32> to vector<2x128xbf16>
    %c2_22 = arith.constant 2 : index
    %c0_23 = arith.constant 0 : index
    %c0_24 = arith.constant 0 : index
    %22 = vector.load %arg3[%c2_22, %c0_23, %c0_24] : memref<4x128x256xbf16, #tpu.memory_space<vmem>>, vector<1x128x256xbf16>
    %23 = vector.shape_cast %22 : vector<1x128x256xbf16> to vector<128x256xbf16>
    %cst_25 = arith.constant dense<0.000000e+00> : vector<2x256xf32>
    %24 = tpu.matmul %21, %23, %cst_25 {dimension_numbers = #tpu.dot_dimension_numbers<[1], [0], [0], [1], [0, 0, 1, 1], [], []>} : vector<2x128xbf16>, vector<128x256xbf16>, vector<2x256xf32> -> vector<2x256xf32>
    %25 = arith.addf %16, %24 : vector<2x256xf32>
    %c3 = arith.constant 3 : index
    %c0_26 = arith.constant 0 : index
    %c0_27 = arith.constant 0 : index
    %26 = vector.load %arg1[%c3, %c0_26, %c0_27] : memref<4x2x576xbf16, #tpu.memory_space<vmem>>, vector<1x2x576xbf16>
    %27 = vector.shape_cast %26 : vector<1x2x576xbf16> to vector<2x576xbf16>
    %c0_28 = arith.constant 0 : index
    %c0_29 = arith.constant 0 : index
    %28 = vector.load %arg2[%c0_28, %c0_29] : memref<576x128xbf16, #tpu.memory_space<vmem>>, vector<576x128xbf16>
    %cst_30 = arith.constant dense<0.000000e+00> : vector<2x128xf32>
    %29 = tpu.matmul %27, %28, %cst_30 {dimension_numbers = #tpu.dot_dimension_numbers<[1], [0], [0], [1], [0, 0, 1, 1], [], []>} : vector<2x576xbf16>, vector<576x128xbf16>, vector<2x128xf32> -> vector<2x128xf32>
    %30 = arith.truncf %29 : vector<2x128xf32> to vector<2x128xbf16>
    %c3_31 = arith.constant 3 : index
    %c0_32 = arith.constant 0 : index
    %c0_33 = arith.constant 0 : index
    %31 = vector.load %arg3[%c3_31, %c0_32, %c0_33] : memref<4x128x256xbf16, #tpu.memory_space<vmem>>, vector<1x128x256xbf16>
    %32 = vector.shape_cast %31 : vector<1x128x256xbf16> to vector<128x256xbf16>
    %cst_34 = arith.constant dense<0.000000e+00> : vector<2x256xf32>
    %33 = tpu.matmul %30, %32, %cst_34 {dimension_numbers = #tpu.dot_dimension_numbers<[1], [0], [0], [1], [0, 0, 1, 1], [], []>} : vector<2x128xbf16>, vector<128x256xbf16>, vector<2x256xf32> -> vector<2x256xf32>
    %34 = arith.addf %25, %33 : vector<2x256xf32>
    %c0_35 = arith.constant 0 : index
    %c0_36 = arith.constant 0 : index
    %35 = vector.load %arg4[%c0_35, %c0_36] : memref<1x256xf32, #tpu.memory_space<vmem>>, vector<1x256xf32>
    %36 = vector.broadcast %35 : vector<1x256xf32> to vector<2x256xf32>
    %37 = arith.addf %34, %36 : vector<2x256xf32>
    %cst_37 = arith.constant 0.000000e+00 : f32
    %38 = vector.broadcast %cst_37 : f32 to vector<2x256xf32>
    %39 = arith.maximumf %37, %38 : vector<2x256xf32>
    %40 = vector.extract_strided_slice %39 {offsets = [0, 0], sizes = [2, 128], strides = [1, 1]} : vector<2x256xf32> to vector<2x128xf32>
    %41 = arith.truncf %40 : vector<2x128xf32> to vector<2x128xbf16>
    %42 = vector.extract_strided_slice %39 {offsets = [0, 128], sizes = [2, 128], strides = [1, 1]} : vector<2x256xf32> to vector<2x128xf32>
    %43 = arith.truncf %42 : vector<2x128xf32> to vector<2x128xbf16>
    %c0_38 = arith.constant 0 : index
    %c0_39 = arith.constant 0 : index
    %44 = vector.load %arg5[%c0_38, %c0_39] : memref<128x128xbf16, #tpu.memory_space<vmem>>, vector<128x128xbf16>
    %cst_40 = arith.constant dense<0.000000e+00> : vector<2x128xf32>
    %45 = tpu.matmul %41, %44, %cst_40 {dimension_numbers = #tpu.dot_dimension_numbers<[1], [0], [0], [1], [0, 0, 1, 1], [], []>} : vector<2x128xbf16>, vector<128x128xbf16>, vector<2x128xf32> -> vector<2x128xf32>
    %c0_41 = arith.constant 0 : index
    %c0_42 = arith.constant 0 : index
    %46 = vector.load %arg6[%c0_41, %c0_42] : memref<1x128xf32, #tpu.memory_space<vmem>>, vector<1x128xf32>
    %47 = vector.broadcast %46 : vector<1x128xf32> to vector<2x128xf32>
    %48 = arith.addf %45, %47 : vector<2x128xf32>
    %cst_43 = arith.constant 0.000000e+00 : f32
    %49 = vector.broadcast %cst_43 : f32 to vector<2x128xf32>
    %50 = arith.maximumf %48, %49 : vector<2x128xf32>
    %51 = arith.truncf %50 : vector<2x128xf32> to vector<2x128xbf16>
    %c0_44 = arith.constant 0 : index
    %c0_45 = arith.constant 0 : index
    %52 = vector.load %arg7[%c0_44, %c0_45] : memref<128x10xbf16, #tpu.memory_space<vmem>>, vector<128x10xbf16>
    %cst_46 = arith.constant dense<0.000000e+00> : vector<2x10xf32>
    %53 = tpu.matmul %51, %52, %cst_46 {dimension_numbers = #tpu.dot_dimension_numbers<[1], [0], [0], [1], [0, 0, 1, 1], [], []>} : vector<2x128xbf16>, vector<128x10xbf16>, vector<2x10xf32> -> vector<2x10xf32>
    %c0_47 = arith.constant 0 : index
    %c0_48 = arith.constant 0 : index
    %54 = vector.load %arg8[%c0_47, %c0_48] : memref<1x10xf32, #tpu.memory_space<vmem>>, vector<1x10xf32>
    %55 = vector.broadcast %54 : vector<1x10xf32> to vector<2x10xf32>
    %56 = arith.addf %53, %55 : vector<2x10xf32>
    %c0_49 = arith.constant 0 : index
    %c0_50 = arith.constant 0 : index
    %57 = vector.load %arg9[%c0_49, %c0_50] : memref<128x2xbf16, #tpu.memory_space<vmem>>, vector<128x2xbf16>
    %cst_51 = arith.constant dense<0.000000e+00> : vector<2x2xf32>
    %58 = tpu.matmul %43, %57, %cst_51 {dimension_numbers = #tpu.dot_dimension_numbers<[1], [0], [0], [1], [0, 0, 1, 1], [], []>} : vector<2x128xbf16>, vector<128x2xbf16>, vector<2x2xf32> -> vector<2x2xf32>
    %c0_52 = arith.constant 0 : index
    %c0_53 = arith.constant 0 : index
    %59 = vector.load %arg10[%c0_52, %c0_53] : memref<1x2xf32, #tpu.memory_space<vmem>>, vector<1x2xf32>
    %60 = vector.broadcast %59 : vector<1x2xf32> to vector<2x2xf32>
    %61 = arith.addf %58, %60 : vector<2x2xf32>
    %cst_54 = arith.constant dense<0xFF800000> : vector<2xf32>
    %62 = vector.multi_reduction <maximumf>, %56, %cst_54 [1] : vector<2x10xf32> to vector<2xf32>
    %63 = vector.shape_cast %62 : vector<2xf32> to vector<2x1xf32>
    %64 = vector.broadcast %63 : vector<2x1xf32> to vector<2x10xf32>
    %65 = arith.subf %56, %64 : vector<2x10xf32>
    %66 = math.exp %65 : vector<2x10xf32>
    %cst_55 = arith.constant dense<0.000000e+00> : vector<2xf32>
    %67 = vector.multi_reduction <add>, %66, %cst_55 [1] : vector<2x10xf32> to vector<2xf32>
    %68 = vector.shape_cast %67 : vector<2xf32> to vector<2x1xf32>
    %69 = math.log %68 : vector<2x1xf32>
    %70 = vector.broadcast %69 : vector<2x1xf32> to vector<2x10xf32>
    %71 = arith.subf %65, %70 : vector<2x10xf32>
    %c0_56 = arith.constant 0 : index
    %c0_57 = arith.constant 0 : index
    %72 = vector.load %arg11[%c0_56, %c0_57] : memref<2x10xf32, #tpu.memory_space<vmem>>, vector<2x10xf32>
    tpu.vector_store %arg11[%c0_56, %c0_57], %71 {strides = array<i32>} : memref<2x10xf32, #tpu.memory_space<vmem>>, vector<2x10xf32>,
    %cst_58 = arith.constant dense<0xFF800000> : vector<2xf32>
    %73 = vector.multi_reduction <maximumf>, %61, %cst_58 [1] : vector<2x2xf32> to vector<2xf32>
    %74 = vector.shape_cast %73 : vector<2xf32> to vector<2x1xf32>
    %75 = vector.broadcast %74 : vector<2x1xf32> to vector<2x2xf32>
    %76 = arith.subf %61, %75 : vector<2x2xf32>
    %77 = math.exp %76 : vector<2x2xf32>
    %cst_59 = arith.constant dense<0.000000e+00> : vector<2xf32>
    %78 = vector.multi_reduction <add>, %77, %cst_59 [1] : vector<2x2xf32> to vector<2xf32>
    %79 = vector.shape_cast %78 : vector<2xf32> to vector<2x1xf32>
    %80 = math.log %79 : vector<2x1xf32>
    %81 = vector.broadcast %80 : vector<2x1xf32> to vector<2x2xf32>
    %82 = arith.subf %76, %81 : vector<2x2xf32>
    %c0_60 = arith.constant 0 : index
    %c0_61 = arith.constant 0 : index
    %83 = vector.load %arg12[%c0_60, %c0_61] : memref<2x2xf32, #tpu.memory_space<vmem>>, vector<2x2xf32>
    tpu.vector_store %arg12[%c0_60, %c0_61], %82 {strides = array<i32>} : memref<2x2xf32, #tpu.memory_space<vmem>>, vector<2x2xf32>,
    return
  }
  func.func @transform_0(%arg0: i32) -> (i32, i32, i32) {
    %c0_i32 = arith.constant 0 : i32
    %c0_i32_0 = arith.constant 0 : i32
    %c0_i32_1 = arith.constant 0 : i32
    return %c0_i32, %arg0, %c0_i32_0 : i32, i32, i32
  }
  func.func @transform_1(%arg0: i32) -> (i32, i32) {
    %c0_i32 = arith.constant 0 : i32
    %c0_i32_0 = arith.constant 0 : i32
    %c0_i32_1 = arith.constant 0 : i32
    return %c0_i32, %c0_i32_0 : i32, i32
  }
  func.func @transform_2(%arg0: i32) -> (i32, i32, i32) {
    %c0_i32 = arith.constant 0 : i32
    %c0_i32_0 = arith.constant 0 : i32
    %c0_i32_1 = arith.constant 0 : i32
    %c0_i32_2 = arith.constant 0 : i32
    return %c0_i32, %c0_i32_0, %c0_i32_1 : i32, i32, i32
  }
  func.func @transform_3(%arg0: i32) -> (i32, i32) {
    %c0_i32 = arith.constant 0 : i32
    %c0_i32_0 = arith.constant 0 : i32
    %c0_i32_1 = arith.constant 0 : i32
    return %c0_i32, %c0_i32_0 : i32, i32
  }
  func.func @transform_4(%arg0: i32) -> (i32, i32) {
    %c0_i32 = arith.constant 0 : i32
    %c0_i32_0 = arith.constant 0 : i32
    %c0_i32_1 = arith.constant 0 : i32
    return %c0_i32, %c0_i32_0 : i32, i32
  }
  func.func @transform_5(%arg0: i32) -> (i32, i32) {
    %c0_i32 = arith.constant 0 : i32
    %c0_i32_0 = arith.constant 0 : i32
    %c0_i32_1 = arith.constant 0 : i32
    return %c0_i32, %c0_i32_0 : i32, i32
  }
  func.func @transform_6(%arg0: i32) -> (i32, i32) {
    %c0_i32 = arith.constant 0 : i32
    %c0_i32_0 = arith.constant 0 : i32
    %c0_i32_1 = arith.constant 0 : i32
    return %c0_i32, %c0_i32_0 : i32, i32
  }
  func.func @transform_7(%arg0: i32) -> (i32, i32) {
    %c0_i32 = arith.constant 0 : i32
    %c0_i32_0 = arith.constant 0 : i32
    %c0_i32_1 = arith.constant 0 : i32
    return %c0_i32, %c0_i32_0 : i32, i32
  }
  func.func @transform_8(%arg0: i32) -> (i32, i32) {
    %c0_i32 = arith.constant 0 : i32
    %c0_i32_0 = arith.constant 0 : i32
    %c0_i32_1 = arith.constant 0 : i32
    return %c0_i32, %c0_i32_0 : i32, i32
  }
  func.func @transform_9(%arg0: i32) -> (i32, i32) {
    %c0_i32 = arith.constant 0 : i32
    %c0_i32_0 = arith.constant 0 : i32
    %c0_i32_1 = arith.constant 0 : i32
    return %c0_i32, %c0_i32_0 : i32, i32
  }
  func.func @transform_10(%arg0: i32) -> (i32, i32) {
    %c0_i32 = arith.constant 0 : i32
    %c0_i32_0 = arith.constant 0 : i32
    return %arg0, %c0_i32 : i32, i32
  }
  func.func @transform_11(%arg0: i32) -> (i32, i32) {
    %c0_i32 = arith.constant 0 : i32
    %c0_i32_0 = arith.constant 0 : i32
    return %arg0, %c0_i32 : i32, i32
  }
}

</mosaic_0001>

<bundles_post_ra>
// kernel: dann_cnn_forward.3
= control target key start
LH: loop header
LB: loop body
LE: loop exit
PB: predicated region body
PF: predicated region fallthrough
CT: control target
= control target key end

     0   :  { %vm775_vm0 = vcmask 1044480   ;;  %vm776_vm1 = vcmask 1045504   ;;  %vm558_vm2 = vcmask 613376   ;;  %v2410_v5 = vmov 65535   ;;  %s3045_s1 = inlined_call_operand.vmem [shape: bf16[75,128], index: 1, kind: input, shape index: {}]   ;;  %s3046_s0 = inlined_call_operand.vmem [shape: bf16[4,288,75], index: 0, kind: input, shape index: {}]   ;;  %s3047_s2 = inlined_call_operand.vmem [shape: f32[1,128], index: 2, kind: input, shape index: {}]   ;;  %s3048_s3 = inlined_call_operand.vmem [shape: bf16[288,128], index: 3, kind: output, shape index: {}]  }
   0x1   :  { %v2333_v0 = vld [vmem:[%s3045_s1] sm:$0xff]   ;;  %v2334_v1 = vld [vmem:[%s3045_s1 + $0x8] sm:$0xff]   ;;  %v2335_v2 = vld [vmem:[%s3045_s1 + $0x10] sm:$0xff]   ;;  %v777_v6 = vsel %vm775_vm0, 4294967295, %v2410_v5 }
   0x2   :  { %2168 = vmatprep.subr.bf16.mxu0 %v2333_v0  ;;  %2322 = vmatprep.subr.bf16.mxu1 %v2333_v0  ;;  %v2338_v3 = vld [vmem:[%s3046_s0] sm:$0xff]   ;;  %v2336_v4 = vld [vmem:[%s3045_s1 + $0x18] sm:$0xff]   ;;  %v778_v9 = vsel %vm776_vm1, %v777_v6, 0  ;;  %v2339_v11 = vld [vmem:[%s3046_s0 + $0x8] sm:$0xff]  }
   0x3   :  { %2169 = vmatpush3.bf16.msra.mxu0 %v2333_v0  ;;  %2327 = vmatpush3.bf16.msra.mxu1 %v2333_v0  ;;  %v2340_v7 = vld [vmem:[%s3046_s0 + $0x120] sm:$0xff]   ;;  %v2341_v12 = vld [vmem:[%s3046_s0 + $0x128] sm:$0xff]   ;;  %v2342_v13 = vld [vmem:[%s3046_s0 + $0x10] sm:$0xff]  }
   0x4   :  { %2170 = vmatprep.subr.bf16.mxu0 %v2334_v1  ;;  %2323 = vmatprep.subr.bf16.mxu1 %v2334_v1  ;;  %v2337_v8 = vld [vmem:[%s3045_s1 + $0x20] sm:$0x3f]   ;;  %v2344_v14 = vld [vmem:[%s3046_s0 + $0x130] sm:$0xff]   ;;  %v2343_v15 = vld [vmem:[%s3046_s0 + $0x18] sm:$0xff]  }
   0x5   :  { %2178 = vmatprep.mubr.msk.bf16.mxu0 %vm558_vm2, %v2338_v3  ;;  %2250 = vmatprep.mubr.msk.bf16.mxu1 %vm558_vm2, %v2340_v7  ;;  %v780_v10 = vand.u32 %v2337_v8, %v778_v9  ;;  %v2345_v16 = vld [vmem:[%s3046_s0 + $0x138] sm:$0xff]   ;;  %v2346_v17 = vld [vmem:[%s3046_s0 + $0x20] sm:$0xff]   ;;  %v2347_v19 = vld [vmem:[%s3046_s0 + $0x28] sm:$0xff]  }
   0x6   :  { %v2348_v18 = vld [vmem:[%s3046_s0 + $0x140] sm:$0xff]   ;;  %v2349_v20 = vld [vmem:[%s3046_s0 + $0x148] sm:$0xff]   ;;  %v2350_v21 = vld [vmem:[%s3046_s0 + $0x30] sm:$0xff]  }
   0x7   :  { %2171 = vmatpush3.bf16.msra.mxu0 %v2334_v1  ;;  %2328 = vmatpush3.bf16.msra.mxu1 %v2334_v1  ;;  %v2352_v22 = vld [vmem:[%s3046_s0 + $0x150] sm:$0xff]   ;;  %v2351_v23 = vld [vmem:[%s3046_s0 + $0x38] sm:$0xff]   ;;  %v2354_v25 = vld [vmem:[%s3046_s0 + $0x40] sm:$0xff]  }
   0x8   :  { %2172 = vmatprep.subr.bf16.mxu0 %v2335_v2  ;;  %2324 = vmatprep.subr.bf16.mxu1 %v2335_v2  ;;  %v2353_v24 = vld [vmem:[%s3046_s0 + $0x158] sm:$0xff]   ;;  %v2356_v26 = vld [vmem:[%s3046_s0 + $0x160] sm:$0xff]   ;;  %v2355_v27 = vld [vmem:[%s3046_s0 + $0x48] sm:$0xff]  }
   0x9   :  { %v2357_v28 = vld [vmem:[%s3046_s0 + $0x168] sm:$0xff]   ;;  %v2358_v29 = vld [vmem:[%s3046_s0 + $0x50] sm:$0xff]   ;;  %v2359_v31 = vld [vmem:[%s3046_s0 + $0x58] sm:$0xff]  }
   0xa   :  { %v2360_v30 = vld [vmem:[%s3046_s0 + $0x170] sm:$0xff]   ;;  %v2361_v32 = vld [vmem:[%s3046_s0 + $0x178] sm:$0xff]   ;;  %v2362_v33 = vld [vmem:[%s3046_s0 + $0x60] sm:$0xff]  }
   0xb   :  { %2173 = vmatpush3.bf16.msra.mxu0 %v2335_v2  ;;  %2329 = vmatpush3.bf16.msra.mxu1 %v2335_v2  ;;  %v2364_v34 = vld [vmem:[%s3046_s0 + $0x180] sm:$0xff]   ;;  %v2363_v35 = vld [vmem:[%s3046_s0 + $0x68] sm:$0xff]   ;;  %v2366_v37 = vld [vmem:[%s3046_s0 + $0x70] sm:$0xff]  }
   0xc   :  { %2174 = vmatprep.subr.bf16.mxu0 %v2336_v4  ;;  %2325 = vmatprep.subr.bf16.mxu1 %v2336_v4  ;;  %v2365_v36 = vld [vmem:[%s3046_s0 + $0x188] sm:$0xff]   ;;  %v2368_v38 = vld [vmem:[%s3046_s0 + $0x190] sm:$0xff]   ;;  %v2367_v39 = vld [vmem:[%s3046_s0 + $0x78] sm:$0xff]  }
   0xd   :  { %v2369_v40 = vld [vmem:[%s3046_s0 + $0x198] sm:$0xff]   ;;  %v2370_v41 = vld [vmem:[%s3046_s0 + $0x80] sm:$0xff]   ;;  %v2371_v43 = vld [vmem:[%s3046_s0 + $0x88] sm:$0xff]  }
   0xe   :  { %v2372_v42 = vld [vmem:[%s3046_s0 + $0x1a0] sm:$0xff]   ;;  %v2373_v44 = vld [vmem:[%s3046_s0 + $0x1a8] sm:$0xff]   ;;  %v2374_v45 = vld [vmem:[%s3046_s0 + $0x90] sm:$0xff]  }
   0xf   :  { %2175 = vmatpush3.bf16.msra.mxu0 %v2336_v4  ;;  %2330 = vmatpush3.bf16.msra.mxu1 %v2336_v4  ;;  %v2376_v46 = vld [vmem:[%s3046_s0 + $0x1b0] sm:$0xff]   ;;  %v2375_v47 = vld [vmem:[%s3046_s0 + $0x98] sm:$0xff]   ;;  %v2378_v49 = vld [vmem:[%s3046_s0 + $0xa0] sm:$0xff]  }
  0x10   :  { %2176 = vmatprep.subr.bf16.mxu0 %v780_v10  ;;  %2326 = vmatprep.subr.bf16.mxu1 %v780_v10  ;;  %v2377_v48 = vld [vmem:[%s3046_s0 + $0x1b8] sm:$0xff]   ;;  %v2380_v50 = vld [vmem:[%s3046_s0 + $0x1c0] sm:$0xff]   ;;  %v2379_v51 = vld [vmem:[%s3046_s0 + $0xa8] sm:$0xff]  }
  0x11   :  { %v2381_v52 = vld [vmem:[%s3046_s0 + $0x1c8] sm:$0xff]   ;;  %v2382_v53 = vld [vmem:[%s3046_s0 + $0xb0] sm:$0xff]   ;;  %v2383_v55 = vld [vmem:[%s3046_s0 + $0xb8] sm:$0xff]  }
  0x12   :  { %v2384_v54 = vld [vmem:[%s3046_s0 + $0x1d0] sm:$0xff]   ;;  %v2385_v56 = vld [vmem:[%s3046_s0 + $0x1d8] sm:$0xff]   ;;  %v2386_v57 = vld [vmem:[%s3046_s0 + $0xc0] sm:$0xff]  }
  0x13   :  { %2177 = vmatpush3.bf16.msra.mxu0 %v780_v10  ;;  %2331 = vmatpush3.bf16.msra.mxu1 %v780_v10  ;;  %v2388_v58 = vld [vmem:[%s3046_s0 + $0x1e0] sm:$0xff]   ;;  %v2387_v59 = vld [vmem:[%s3046_s0 + $0xc8] sm:$0xff]   ;;  %v2390_v61 = vld [vmem:[%s3046_s0 + $0xd0] sm:$0xff]  }
  0x14   :  { %v2389_v60 = vld [vmem:[%s3046_s0 + $0x1e8] sm:$0xff]   ;;  %v2392_v62 = vld [vmem:[%s3046_s0 + $0x1f0] sm:$0xff]   ;;  %v2391_v63 = vld [vmem:[%s3046_s0 + $0xd8] sm:$0xff]  }
  0x15   :  { %v2393_v0 = vld [vmem:[%s3046_s0 + $0x1f8] sm:$0xff]   ;;  %v2394_v1 = vld [vmem:[%s3046_s0 + $0xe0] sm:$0xff]   ;;  %v2395_v3 = vld [vmem:[%s3046_s0 + $0xe8] sm:$0xff]  }
  0x16   :  { %2179 = vmatmul.mubr.msk.bf16.vlgmr.msra.gmra.mrb[0].mxu0 %vm558_vm2, %v2339_v11  ;;  %2251 = vmatmul.mubr.msk.bf16.vlgmr.msra.gmra.mrb[0].mxu1 %vm558_vm2, %v2341_v12  ;;  %v2396_v2 = vld [vmem:[%s3046_s0 + $0x200] sm:$0xff]   ;;  %v2397_v4 = vld [vmem:[%s3046_s0 + $0x208] sm:$0xff]   ;;  %v2398_v5 = vld [vmem:[%s3046_s0 + $0xf0] sm:$0xff]  }
  0x17   :  { %2182 = vmatprep.mubr.msk.bf16.mxu0 %vm558_vm2, %v2342_v13  ;;  %2254 = vmatprep.mubr.msk.bf16.mxu1 %vm558_vm2, %v2344_v14  ;;  %v2400_v6 = vld [vmem:[%s3046_s0 + $0x210] sm:$0xff]   ;;  %v2399_v7 = vld [vmem:[%s3046_s0 + $0xf8] sm:$0xff]   ;;  %v2402_v9 = vld [vmem:[%s3046_s0 + $0x100] sm:$0xff]  }
  0x18   :  { %v2401_v8 = vld [vmem:[%s3046_s0 + $0x218] sm:$0xff]   ;;  %v2404_v10 = vld [vmem:[%s3046_s0 + $0x220] sm:$0xff]   ;;  %v2403_v11 = vld [vmem:[%s3046_s0 + $0x108] sm:$0xff]  }
  0x19   :  { %v2405_v12 = vld [vmem:[%s3046_s0 + $0x228] sm:$0xff]   ;;  %v2406_v13 = vld [vmem:[%s3046_s0 + $0x110] sm:$0xff]  }
  0x1a   :  { %v2408_v14 = vld [vmem:[%s3046_s0 + $0x230] sm:$0xff]  }
  0x1e   :  { %2183 = vmatmul.mubr.msk.bf16.gmra.mrb[4].mxu0 %vm558_vm2, %v2343_v15  ;;  %2255 = vmatmul.mubr.msk.bf16.gmra.mrb[4].mxu1 %vm558_vm2, %v2345_v16  ;;  %v2407_v15 = vld [vmem:[%s3046_s0 + $0x118] sm:$0xff]  }
  0x1f   :  { %2186 = vmatprep.mubr.msk.bf16.mxu0 %vm558_vm2, %v2346_v17  ;;  %2258 = vmatprep.mubr.msk.bf16.mxu1 %vm558_vm2, %v2348_v18  ;;  %v2409_v16 = vld [vmem:[%s3046_s0 + $0x238] sm:$0xff]  }
  0x26   :  { %2187 = vmatmul.mubr.msk.bf16.gmra.mrb[8].mxu0 %vm558_vm2, %v2347_v19  ;;  %2259 = vmatmul.mubr.msk.bf16.gmra.mrb[8].mxu1 %vm558_vm2, %v2349_v20 }
  0x27   :  { %2190 = vmatprep.mubr.msk.bf16.mxu0 %vm558_vm2, %v2350_v21  ;;  %2262 = vmatprep.mubr.msk.bf16.mxu1 %vm558_vm2, %v2352_v22 }
  0x2e   :  { %2191 = vmatmul.mubr.msk.bf16.gmra.mrb[12].mxu0 %vm558_vm2, %v2351_v23  ;;  %2263 = vmatmul.mubr.msk.bf16.gmra.mrb[12].mxu1 %vm558_vm2, %v2353_v24 }
  0x2f   :  { %2194 = vmatprep.mubr.msk.bf16.mxu0 %vm558_vm2, %v2354_v25  ;;  %2266 = vmatprep.mubr.msk.bf16.mxu1 %vm558_vm2, %v2356_v26 }
  0x36   :  { %2195 = vmatmul.mubr.msk.bf16.gmra.mrb[16].mxu0 %vm558_vm2, %v2355_v27  ;;  %2267 = vmatmul.mubr.msk.bf16.gmra.mrb[16].mxu1 %vm558_vm2, %v2357_v28 }
  0x37   :  { %2198 = vmatprep.mubr.msk.bf16.mxu0 %vm558_vm2, %v2358_v29  ;;  %2270 = vmatprep.mubr.msk.bf16.mxu1 %vm558_vm2, %v2360_v30 }
  0x3e   :  { %2199 = vmatmul.mubr.msk.bf16.gmra.mrb[20].mxu0 %vm558_vm2, %v2359_v31  ;;  %2271 = vmatmul.mubr.msk.bf16.gmra.mrb[20].mxu1 %vm558_vm2, %v2361_v32 }
  0x3f   :  { %2202 = vmatprep.mubr.msk.bf16.mxu0 %vm558_vm2, %v2362_v33  ;;  %2274 = vmatprep.mubr.msk.bf16.mxu1 %vm558_vm2, %v2364_v34 }
  0x46   :  { %2203 = vmatmul.mubr.msk.bf16.gmra.mrb[24].mxu0 %vm558_vm2, %v2363_v35  ;;  %2275 = vmatmul.mubr.msk.bf16.gmra.mrb[24].mxu1 %vm558_vm2, %v2365_v36 }
  0x47   :  { %2206 = vmatprep.mubr.msk.bf16.mxu0 %vm558_vm2, %v2366_v37  ;;  %2278 = vmatprep.mubr.msk.bf16.mxu1 %vm558_vm2, %v2368_v38 }
  0x4e   :  { %2207 = vmatmul.mubr.msk.bf16.gmra.mrb[28].mxu0 %vm558_vm2, %v2367_v39  ;;  %2279 = vmatmul.mubr.msk.bf16.gmra.mrb[28].mxu1 %vm558_vm2, %v2369_v40 }
  0x4f   :  { %2210 = vmatprep.mubr.msk.bf16.mxu0 %vm558_vm2, %v2370_v41  ;;  %2282 = vmatprep.mubr.msk.bf16.mxu1 %vm558_vm2, %v2372_v42 }
  0x56   :  { %2211 = vmatmul.mubr.msk.bf16.gmra.mrb[32].mxu0 %vm558_vm2, %v2371_v43  ;;  %2283 = vmatmul.mubr.msk.bf16.gmra.mrb[32].mxu1 %vm558_vm2, %v2373_v44 }
  0x57   :  { %2214 = vmatprep.mubr.msk.bf16.mxu0 %vm558_vm2, %v2374_v45  ;;  %2286 = vmatprep.mubr.msk.bf16.mxu1 %vm558_vm2, %v2376_v46 }
  0x5e   :  { %2215 = vmatmul.mubr.msk.bf16.gmra.mrb[36].mxu0 %vm558_vm2, %v2375_v47  ;;  %2287 = vmatmul.mubr.msk.bf16.gmra.mrb[36].mxu1 %vm558_vm2, %v2377_v48 }
  0x5f   :  { %2218 = vmatprep.mubr.msk.bf16.mxu0 %vm558_vm2, %v2378_v49  ;;  %2290 = vmatprep.mubr.msk.bf16.mxu1 %vm558_vm2, %v2380_v50 }
  0x66   :  { %2219 = vmatmul.mubr.msk.bf16.gmra.mrb[40].mxu0 %vm558_vm2, %v2379_v51  ;;  %2291 = vmatmul.mubr.msk.bf16.gmra.mrb[40].mxu1 %vm558_vm2, %v2381_v52 }
  0x67   :  { %2222 = vmatprep.mubr.msk.bf16.mxu0 %vm558_vm2, %v2382_v53  ;;  %2294 = vmatprep.mubr.msk.bf16.mxu1 %vm558_vm2, %v2384_v54 }
  0x6e   :  { %2223 = vmatmul.mubr.msk.bf16.gmra.mrb[44].mxu0 %vm558_vm2, %v2383_v55  ;;  %2295 = vmatmul.mubr.msk.bf16.gmra.mrb[44].mxu1 %vm558_vm2, %v2385_v56 }
  0x6f   :  { %2226 = vmatprep.mubr.msk.bf16.mxu0 %vm558_vm2, %v2386_v57  ;;  %2298 = vmatprep.mubr.msk.bf16.mxu1 %vm558_vm2, %v2388_v58 }
  0x76   :  { %2227 = vmatmul.mubr.msk.bf16.gmra.mrb[48].mxu0 %vm558_vm2, %v2387_v59  ;;  %2299 = vmatmul.mubr.msk.bf16.gmra.mrb[48].mxu1 %vm558_vm2, %v2389_v60 }
  0x77   :  { %2230 = vmatprep.mubr.msk.bf16.mxu0 %vm558_vm2, %v2390_v61  ;;  %2302 = vmatprep.mubr.msk.bf16.mxu1 %vm558_vm2, %v2392_v62 }
  0x7e   :  { %2231 = vmatmul.mubr.msk.bf16.gmra.mrb[52].mxu0 %vm558_vm2, %v2391_v63  ;;  %2303 = vmatmul.mubr.msk.bf16.gmra.mrb[52].mxu1 %vm558_vm2, %v2393_v0 }
  0x7f   :  { %2234 = vmatprep.mubr.msk.bf16.mxu0 %vm558_vm2, %v2394_v1  ;;  %2306 = vmatprep.mubr.msk.bf16.mxu1 %vm558_vm2, %v2396_v2 }
  0x86   :  { %2235 = vmatmul.mubr.msk.bf16.gmra.mrb[56].mxu0 %vm558_vm2, %v2395_v3  ;;  %2307 = vmatmul.mubr.msk.bf16.gmra.mrb[56].mxu1 %vm558_vm2, %v2397_v4 }
  0x87   :  { %2238 = vmatprep.mubr.msk.bf16.mxu0 %vm558_vm2, %v2398_v5  ;;  %2310 = vmatprep.mubr.msk.bf16.mxu1 %vm558_vm2, %v2400_v6 }
  0x8e   :  { %2239 = vmatmul.mubr.msk.bf16.gmra.mrb[60].mxu0 %vm558_vm2, %v2399_v7  ;;  %2311 = vmatmul.mubr.msk.bf16.gmra.mrb[60].mxu1 %vm558_vm2, %v2401_v8 }
  0x8f   :  { %2242 = vmatprep.mubr.msk.bf16.mxu0 %vm558_vm2, %v2402_v9  ;;  %2314 = vmatprep.mubr.msk.bf16.mxu1 %vm558_vm2, %v2404_v10 }
  0x96   :  { %2243 = vmatmul.mubr.msk.bf16.gmra.mrb[64].mxu0 %vm558_vm2, %v2403_v11  ;;  %2315 = vmatmul.mubr.msk.bf16.gmra.mrb[64].mxu1 %vm558_vm2, %v2405_v12 }
  0x97   :  { %2246 = vmatprep.mubr.msk.bf16.mxu0 %vm558_vm2, %v2406_v13  ;;  %2318 = vmatprep.mubr.msk.bf16.mxu1 %vm558_vm2, %v2408_v14 }
  0x9e   :  { %2247 = vmatmul.mubr.msk.bf16.gmra.mrb[68].mxu0 %vm558_vm2, %v2407_v15  ;;  %2319 = vmatmul.mubr.msk.bf16.gmra.mrb[68].mxu1 %vm558_vm2, %v2409_v16 }
  0xe9   :  { %v2734_v17 = vpop.f32.mrb[0].mxu0  ;;  %v2736_v18 = vpop.f32.mrb[0].mxu1 }
  0xea   :  { %v2738_v19 = vpop.f32.mrb[1].mxu0  ;;  %v2740_v20 = vpop.f32.mrb[1].mxu1 }
  0xeb   :  { %v2742_v21 = vpop.f32.mrb[2].mxu0  ;;  %v2744_v22 = vpop.f32.mrb[2].mxu1 }
  0xec   :  { %v2746_v23 = vpop.f32.mrb[3].mxu0  ;;  %v2748_v24 = vpop.f32.mrb[3].mxu1 }
  0xf1   :  { %v2750_v25 = vpop.f32.mrb[4].mxu0  ;;  %v2752_v26 = vpop.f32.mrb[4].mxu1 }
  0xf2   :  { %v2754_v27 = vpop.f32.mrb[5].mxu0  ;;  %v2756_v28 = vpop.f32.mrb[5].mxu1 }
  0xf3   :  { %v2758_v29 = vpop.f32.mrb[6].mxu0  ;;  %v2760_v30 = vpop.f32.mrb[6].mxu1 }
  0xf4   :  { %v2762_v31 = vpop.f32.mrb[7].mxu0  ;;  %v2764_v32 = vpop.f32.mrb[7].mxu1 }
  0xf9   :  { %v2766_v33 = vpop.f32.mrb[8].mxu0  ;;  %v2768_v34 = vpop.f32.mrb[8].mxu1 }
  0xfa   :  { %v2770_v35 = vpop.f32.mrb[9].mxu0  ;;  %v2772_v36 = vpop.f32.mrb[9].mxu1 }
  0xfb   :  { %v2774_v37 = vpop.f32.mrb[10].mxu0  ;;  %v2776_v38 = vpop.f32.mrb[10].mxu1 }
  0xfc   :  { %v2778_v39 = vpop.f32.mrb[11].mxu0  ;;  %v2780_v40 = vpop.f32.mrb[11].mxu1 }
 0x101   :  { %v2782_v41 = vpop.f32.mrb[12].mxu0  ;;  %v2784_v42 = vpop.f32.mrb[12].mxu1 }
 0x102   :  { %v2786_v43 = vpop.f32.mrb[13].mxu0  ;;  %v2788_v44 = vpop.f32.mrb[13].mxu1 }
 0x103   :  { %v2790_v45 = vpop.f32.mrb[14].mxu0  ;;  %v2792_v46 = vpop.f32.mrb[14].mxu1 }
 0x104   :  { %v2794_v47 = vpop.f32.mrb[15].mxu0  ;;  %v2796_v48 = vpop.f32.mrb[15].mxu1 }
 0x109   :  { %v2798_v49 = vpop.f32.mrb[16].mxu0  ;;  %v2800_v50 = vpop.f32.mrb[16].mxu1 }
 0x10a   :  { %v2802_v51 = vpop.f32.mrb[17].mxu0  ;;  %v2804_v52 = vpop.f32.mrb[17].mxu1 }
 0x10b   :  { %v2806_v53 = vpop.f32.mrb[18].mxu0  ;;  %v2808_v54 = vpop.f32.mrb[18].mxu1 }
 0x10c   :  { %v2810_v55 = vpop.f32.mrb[19].mxu0  ;;  %v2812_v56 = vpop.f32.mrb[19].mxu1 }
 0x111   :  { %v2814_v57 = vpop.f32.mrb[20].mxu0  ;;  %v2816_v58 = vpop.f32.mrb[20].mxu1 }
 0x112   :  { %v2818_v59 = vpop.f32.mrb[21].mxu0  ;;  %v2820_v60 = vpop.f32.mrb[21].mxu1 }
 0x113   :  { %v2822_v61 = vpop.f32.mrb[22].mxu0  ;;  %v2824_v62 = vpop.f32.mrb[22].mxu1 }
 0x114   :  { %3049 = vst [vmem:[#allocation2_spill] sm:$0xff] %v2824_v62  ;;  %v2826_v63 = vpop.f32.mrb[23].mxu0  ;;  %v2828_v0 = vpop.f32.mrb[23].mxu1 }
 0x115   :  { %3050 = vst [vmem:[#allocation3_spill] sm:$0xff] %v2828_v0 }
 0x119   :  { %v2830_v1 = vpop.f32.mrb[24].mxu0  ;;  %v2832_v2 = vpop.f32.mrb[24].mxu1 }
 0x11a   :  { %3051 = vst [vmem:[#allocation4_spill] sm:$0xff] %v2830_v1  ;;  %3052 = vst [vmem:[#allocation5_spill] sm:$0xff] %v2832_v2  ;;  %v2834_v3 = vpop.f32.mrb[25].mxu0  ;;  %v2836_v4 = vpop.f32.mrb[25].mxu1 }
 0x11b   :  { %3053 = vst [vmem:[#allocation6_spill] sm:$0xff] %v2834_v3  ;;  %3054 = vst [vmem:[#allocation7_spill] sm:$0xff] %v2836_v4  ;;  %v2838_v5 = vpop.f32.mrb[26].mxu0  ;;  %v2840_v6 = vpop.f32.mrb[26].mxu1 }
 0x11c   :  { %3055 = vst [vmem:[#allocation8_spill] sm:$0xff] %v2838_v5  ;;  %3056 = vst [vmem:[#allocation9_spill] sm:$0xff] %v2840_v6  ;;  %v2842_v7 = vpop.f32.mrb[27].mxu0  ;;  %v2844_v8 = vpop.f32.mrb[27].mxu1 }
 0x11d   :  { %3057 = vst [vmem:[#allocation10_spill] sm:$0xff] %v2842_v7  ;;  %3058 = vst [vmem:[#allocation11_spill] sm:$0xff] %v2844_v8 }
 0x121   :  { %v2846_v9 = vpop.f32.mrb[28].mxu0  ;;  %v2848_v10 = vpop.f32.mrb[28].mxu1 }
 0x122   :  { %3059 = vst [vmem:[#allocation12_spill] sm:$0xff] %v2846_v9  ;;  %3060 = vst [vmem:[#allocation13_spill] sm:$0xff] %v2848_v10  ;;  %v2850_v11 = vpop.f32.mrb[29].mxu0  ;;  %v2852_v12 = vpop.f32.mrb[29].mxu1 }
 0x123   :  { %3061 = vst [vmem:[#allocation14_spill] sm:$0xff] %v2850_v11  ;;  %3062 = vst [vmem:[#allocation15_spill] sm:$0xff] %v2852_v12  ;;  %v2854_v13 = vpop.f32.mrb[30].mxu0  ;;  %v2856_v14 = vpop.f32.mrb[30].mxu1 }
 0x124   :  { %3063 = vst [vmem:[#allocation16_spill] sm:$0xff] %v2854_v13  ;;  %3064 = vst [vmem:[#allocation17_spill] sm:$0xff] %v2856_v14  ;;  %v2858_v15 = vpop.f32.mrb[31].mxu0  ;;  %v2860_v16 = vpop.f32.mrb[31].mxu1 }
 0x125   :  { %3065 = vst [vmem:[#allocation18_spill] sm:$0xff] %v2858_v15  ;;  %3066 = vst [vmem:[#allocation19_spill] sm:$0xff] %v2860_v16 }
 0x129   :  { %v2862_v6 = vpop.f32.mrb[32].mxu0  ;;  %v2864_v7 = vpop.f32.mrb[32].mxu1 }
 0x12a   :  { %3067 = vst [vmem:[#allocation20_spill] sm:$0xff] %v2862_v6  ;;  %3068 = vst [vmem:[#allocation21_spill] sm:$0xff] %v2864_v7  ;;  %v2866_v8 = vpop.f32.mrb[33].mxu0  ;;  %v2868_v9 = vpop.f32.mrb[33].mxu1 }
 0x12b   :  { %3069 = vst [vmem:[#allocation22_spill] sm:$0xff] %v2866_v8  ;;  %3070 = vst [vmem:[#allocation23_spill] sm:$0xff] %v2868_v9  ;;  %v2870_v10 = vpop.f32.mrb[34].mxu0  ;;  %v2872_v11 = vpop.f32.mrb[34].mxu1 }
 0x12c   :  { %3071 = vst [vmem:[#allocation24_spill] sm:$0xff] %v2870_v10  ;;  %3072 = vst [vmem:[#allocation25_spill] sm:$0xff] %v2872_v11  ;;  %v2874_v12 = vpop.f32.mrb[35].mxu0  ;;  %v2876_v13 = vpop.f32.mrb[35].mxu1 }
 0x12d   :  { %3073 = vst [vmem:[#allocation26_spill] sm:$0xff] %v2874_v12  ;;  %3074 = vst [vmem:[#allocation27_spill] sm:$0xff] %v2876_v13  ;;  %v2885_v13 = vld [vmem:[%s3047_s2] ss:$0 sm:$0xff] }
 0x131   :  { %v2216_v14 = vpop.f32.mrb[36].mxu0  ;;  %v2288_v15 = vpop.f32.mrb[36].mxu1 }
 0x132   :  { %v1397_v16 = vmax.f32 %v2734_v17, %v2216_v14  ;;  %v960_v4 = vpop.f32.mrb[37].mxu0  ;;  %v1248_v6 = vpop.f32.mrb[37].mxu1 }
 0x133   :  { %v1391_v7 = vmax.f32 %v2738_v19, %v960_v4  ;;  %v2217_v5 = vpop.f32.mrb[38].mxu0  ;;  %v2289_v8 = vpop.f32.mrb[38].mxu1 }
 0x134   :  { %v1398_v9 = vmax.f32 %v1397_v16, %v2736_v18  ;;  %v1400_v10 = vmax.f32 %v2742_v21, %v2217_v5  ;;  %v963_v2 = vpop.f32.mrb[39].mxu0  ;;  %v1251_v11 = vpop.f32.mrb[39].mxu1 }
 0x135   :  { %v1392_v12 = vmax.f32 %v1391_v7, %v2740_v20  ;;  %v1394_v17 = vmax.f32 %v2746_v23, %v963_v2 }
 0x136   :  { %v1399_v14 = vmax.f32 %v1398_v9, %v2288_v15  ;;  %v1401_v19 = vmax.f32 %v1400_v10, %v2744_v22 }
 0x137   :  { %v1393_v4 = vmax.f32 %v1392_v12, %v1248_v6  ;;  %v1395_v3 = vmax.f32 %v1394_v17, %v2748_v24 }
 0x138   :  { %v1508_v18 = vadd.f32 %v2885_v13, %v1399_v14  ;;  %v1402_v21 = vmax.f32 %v1401_v19, %v2289_v8 }
 0x139   :  { %v1506_v5 = vadd.f32 %v2885_v13, %v1393_v4  ;;  %v1396_v16 = vmax.f32 %v1395_v3, %v1251_v11  ;;  %v2220_v1 = vpop.f32.mrb[40].mxu0  ;;  %v2292_v0 = vpop.f32.mrb[40].mxu1 }
 0x13a   :  { %v1509_v62 = vadd.f32 %v2885_v13, %v1402_v21  ;;  %v1409_v20 = vmax.f32 %v2750_v25, %v2220_v1  ;;  %v976_v7 = vpop.f32.mrb[41].mxu0  ;;  %v1264_v23 = vpop.f32.mrb[41].mxu1  ;;  %v1544_v9 = vmax.f32 %v1508_v18, 0.0 }
 0x13b   :  { %v1507_v2 = vadd.f32 %v2885_v13, %v1396_v16  ;;  %v1403_v22 = vmax.f32 %v2754_v27, %v976_v7  ;;  %v2221_v6 = vpop.f32.mrb[42].mxu0  ;;  %v2293_v24 = vpop.f32.mrb[42].mxu1  ;;  %v1542_v15 = vmax.f32 %v1506_v5, 0.0 }
 0x13c   :  { %v1545_v10 = vmax.f32 %v1509_v62, 0.0  ;;  %v1410_v8 = vmax.f32 %v1409_v20, %v2752_v26  ;;  %v1412_v3 = vmax.f32 %v2758_v29, %v2221_v6  ;;  %v979_v11 = vpop.f32.mrb[43].mxu0  ;;  %v1267_v12 = vpop.f32.mrb[43].mxu1 }
 0x13d   :  { %v1543_v17 = vmax.f32 %v1507_v2, 0.0  ;;  %v1404_v25 = vmax.f32 %v1403_v22, %v2756_v28  ;;  %v1406_v1 = vmax.f32 %v2762_v31, %v979_v11 }
 0x13e   :  { %v1992_v14 = vpack.c.bf16 %v1545_v10, %v1544_v9  ;;  %v1411_v19 = vmax.f32 %v1410_v8, %v2292_v0  ;;  %v1413_v27 = vmax.f32 %v1412_v3, %v2760_v30 }
 0x13f   :  { %v1987_v4 = vpack.c.bf16 %v1543_v17, %v1542_v15  ;;  %v1405_v21 = vmax.f32 %v1404_v25, %v1264_v23  ;;  %v1407_v62 = vmax.f32 %v1406_v1, %v2764_v32 }
 0x140   :  { %2074 = vst [vmem:[%s3048_s3 + $0x8] sm:$0xff] %v1992_v14   ;;  %v1512_v26 = vadd.f32 %v2885_v13, %v1411_v19  ;;  %v1414_v29 = vmax.f32 %v1413_v27, %v2293_v24 }
 0x141   :  { %1988 = vst [vmem:[%s3048_s3] sm:$0xff] %v1987_v4   ;;  %v1510_v28 = vadd.f32 %v2885_v13, %v1405_v21  ;;  %v1408_v31 = vmax.f32 %v1407_v62, %v1267_v12  ;;  %v2224_v0 = vpop.f32.mrb[44].mxu0  ;;  %v2296_v30 = vpop.f32.mrb[44].mxu1 }
 0x142   :  { %v1513_v18 = vadd.f32 %v2885_v13, %v1414_v29  ;;  %v1421_v32 = vmax.f32 %v2766_v33, %v2224_v0  ;;  %v992_v5 = vpop.f32.mrb[45].mxu0  ;;  %v1280_v16 = vpop.f32.mrb[45].mxu1  ;;  %v1548_v22 = vmax.f32 %v1512_v26, 0.0 }
 0x143   :  { %v1511_v20 = vadd.f32 %v2885_v13, %v1408_v31  ;;  %v1415_v7 = vmax.f32 %v2770_v35, %v992_v5  ;;  %v2225_v23 = vpop.f32.mrb[46].mxu0  ;;  %v2297_v2 = vpop.f32.mrb[46].mxu1  ;;  %v1546_v3 = vmax.f32 %v1510_v28, 0.0 }
 0x144   :  { %v1549_v6 = vmax.f32 %v1513_v18, 0.0  ;;  %v1422_v24 = vmax.f32 %v1421_v32, %v2768_v34  ;;  %v1424_v9 = vmax.f32 %v2774_v37, %v2225_v23  ;;  %v995_v10 = vpop.f32.mrb[47].mxu0  ;;  %v1283_v8 = vpop.f32.mrb[47].mxu1 }
 0x145   :  { %v1547_v11 = vmax.f32 %v1511_v20, 0.0  ;;  %v1416_v33 = vmax.f32 %v1415_v7, %v2772_v36  ;;  %v1418_v12 = vmax.f32 %v2778_v39, %v995_v10 }
 0x146   :  { %v2002_v15 = vpack.c.bf16 %v1549_v6, %v1548_v22  ;;  %v1423_v17 = vmax.f32 %v1422_v24, %v2296_v30  ;;  %v1425_v35 = vmax.f32 %v1424_v9, %v2776_v38 }
 0x147   :  { %v1997_v25 = vpack.c.bf16 %v1547_v11, %v1546_v3  ;;  %v1417_v1 = vmax.f32 %v1416_v33, %v1280_v16  ;;  %v1419_v14 = vmax.f32 %v1418_v12, %v2780_v40 }
 0x148   :  { %2076 = vst [vmem:[%s3048_s3 + $0x18] sm:$0xff] %v2002_v15   ;;  %v1516_v34 = vadd.f32 %v2885_v13, %v1423_v17  ;;  %v1426_v37 = vmax.f32 %v1425_v35, %v2297_v2 }
 0x149   :  { %2075 = vst [vmem:[%s3048_s3 + $0x10] sm:$0xff] %v1997_v25   ;;  %v1514_v36 = vadd.f32 %v2885_v13, %v1417_v1  ;;  %v1420_v39 = vmax.f32 %v1419_v14, %v1283_v8  ;;  %v2228_v19 = vpop.f32.mrb[48].mxu0  ;;  %v2300_v38 = vpop.f32.mrb[48].mxu1 }
 0x14a   :  { %v1517_v27 = vadd.f32 %v2885_v13, %v1426_v37  ;;  %v1433_v40 = vmax.f32 %v2782_v41, %v2228_v19  ;;  %v1008_v4 = vpop.f32.mrb[49].mxu0  ;;  %v1296_v21 = vpop.f32.mrb[49].mxu1  ;;  %v1552_v31 = vmax.f32 %v1516_v34, 0.0 }
 0x14b   :  { %v1515_v62 = vadd.f32 %v2885_v13, %v1420_v39  ;;  %v1427_v26 = vmax.f32 %v2786_v43, %v1008_v4  ;;  %v2229_v29 = vpop.f32.mrb[50].mxu0  ;;  %v2301_v28 = vpop.f32.mrb[50].mxu1  ;;  %v1550_v16 = vmax.f32 %v1514_v36, 0.0 }
 0x14c   :  { %v1553_v0 = vmax.f32 %v1517_v27, 0.0  ;;  %v1434_v30 = vmax.f32 %v1433_v40, %v2784_v42  ;;  %v1436_v18 = vmax.f32 %v2790_v45, %v2229_v29  ;;  %v1011_v32 = vpop.f32.mrb[51].mxu0  ;;  %v1299_v5 = vpop.f32.mrb[51].mxu1 }
 0x14d   :  { %v1551_v20 = vmax.f32 %v1515_v62, 0.0  ;;  %v1428_v41 = vmax.f32 %v1427_v26, %v2788_v44  ;;  %v1430_v7 = vmax.f32 %v2794_v47, %v1011_v32 }
 0x14e   :  { %v2012_v23 = vpack.c.bf16 %v1553_v0, %v1552_v31  ;;  %v1435_v2 = vmax.f32 %v1434_v30, %v2300_v38  ;;  %v1437_v43 = vmax.f32 %v1436_v18, %v2792_v46 }
 0x14f   :  { %v2007_v22 = vpack.c.bf16 %v1551_v20, %v1550_v16  ;;  %v1429_v6 = vmax.f32 %v1428_v41, %v1296_v21  ;;  %v1431_v24 = vmax.f32 %v1430_v7, %v2796_v48 }
 0x150   :  { %2078 = vst [vmem:[%s3048_s3 + $0x28] sm:$0xff] %v2012_v23   ;;  %v1520_v42 = vadd.f32 %v2885_v13, %v1435_v2  ;;  %v1438_v45 = vmax.f32 %v1437_v43, %v2301_v28 }
 0x151   :  { %2077 = vst [vmem:[%s3048_s3 + $0x20] sm:$0xff] %v2007_v22   ;;  %v1518_v44 = vadd.f32 %v2885_v13, %v1429_v6  ;;  %v1432_v47 = vmax.f32 %v1431_v24, %v1299_v5  ;;  %v2232_v9 = vpop.f32.mrb[52].mxu0  ;;  %v2304_v46 = vpop.f32.mrb[52].mxu1  ;;  %v3075_v6 = vld [vmem:[#allocation2_spill] sm:$0xff] }
 0x152   :  { %v1521_v10 = vadd.f32 %v2885_v13, %v1438_v45  ;;  %v1445_v48 = vmax.f32 %v2798_v49, %v2232_v9  ;;  %v1024_v8 = vpop.f32.mrb[53].mxu0  ;;  %v1312_v3 = vpop.f32.mrb[53].mxu1  ;;  %v1556_v17 = vmax.f32 %v1520_v42, 0.0  ;;  %v3076_v45 = vld [vmem:[#allocation3_spill] sm:$0xff] }
 0x153   :  { %v1519_v11 = vadd.f32 %v2885_v13, %v1432_v47  ;;  %v1439_v33 = vmax.f32 %v2802_v51, %v1024_v8  ;;  %v2233_v12 = vpop.f32.mrb[54].mxu0  ;;  %v2305_v15 = vpop.f32.mrb[54].mxu1  ;;  %v1554_v37 = vmax.f32 %v1518_v44, 0.0 }
 0x154   :  { %v1557_v35 = vmax.f32 %v1521_v10, 0.0  ;;  %v1446_v25 = vmax.f32 %v1445_v48, %v2800_v50  ;;  %v1448_v1 = vmax.f32 %v2806_v53, %v2233_v12  ;;  %v1027_v14 = vpop.f32.mrb[55].mxu0  ;;  %v1315_v34 = vpop.f32.mrb[55].mxu1  ;;  %v3077_v10 = vld [vmem:[#allocation4_spill] sm:$0xff] }
 0x155   :  { %v1555_v36 = vmax.f32 %v1519_v11, 0.0  ;;  %v1440_v49 = vmax.f32 %v1439_v33, %v2804_v52  ;;  %v1442_v39 = vmax.f32 %v2810_v55, %v1027_v14  ;;  %v3078_v33 = vld [vmem:[#allocation6_spill] sm:$0xff] }
 0x156   :  { %v2022_v19 = vpack.c.bf16 %v1557_v35, %v1556_v17  ;;  %v1447_v38 = vmax.f32 %v1446_v25, %v2304_v46  ;;  %v1449_v51 = vmax.f32 %v1448_v1, %v2808_v54  ;;  %v3079_v1 = vld [vmem:[#allocation5_spill] sm:$0xff] }
 0x157   :  { %v2017_v27 = vpack.c.bf16 %v1555_v36, %v1554_v37  ;;  %v1441_v40 = vmax.f32 %v1440_v49, %v1312_v3  ;;  %v1443_v4 = vmax.f32 %v1442_v39, %v2812_v56 }
 0x158   :  { %2080 = vst [vmem:[%s3048_s3 + $0x38] sm:$0xff] %v2022_v19   ;;  %v1524_v50 = vadd.f32 %v2885_v13, %v1447_v38  ;;  %v1450_v53 = vmax.f32 %v1449_v51, %v2305_v15  ;;  %v3081_v38 = vld [vmem:[#allocation7_spill] sm:$0xff] }
 0x159   :  { %2079 = vst [vmem:[%s3048_s3 + $0x30] sm:$0xff] %v2017_v27   ;;  %v1522_v52 = vadd.f32 %v2885_v13, %v1441_v40  ;;  %v1444_v55 = vmax.f32 %v1443_v4, %v1315_v34  ;;  %v2236_v21 = vpop.f32.mrb[56].mxu0  ;;  %v2308_v54 = vpop.f32.mrb[56].mxu1  ;;  %v3080_v34 = vld [vmem:[#allocation8_spill] sm:$0xff]  ;;  %v3082_v27 = vld [vmem:[#allocation10_spill] sm:$0xff] }
 0x15a   :  { %v1525_v62 = vadd.f32 %v2885_v13, %v1450_v53  ;;  %v1457_v56 = vmax.f32 %v2814_v57, %v2236_v21  ;;  %v1040_v26 = vpop.f32.mrb[57].mxu0  ;;  %v1328_v29 = vpop.f32.mrb[57].mxu1  ;;  %v1560_v18 = vmax.f32 %v1524_v50, 0.0  ;;  %v3083_v53 = vld [vmem:[#allocation9_spill] sm:$0xff] }
 0x15b   :  { %v1523_v28 = vadd.f32 %v2885_v13, %v1444_v55  ;;  %v1451_v31 = vmax.f32 %v2818_v59, %v1040_v26  ;;  %v2237_v0 = vpop.f32.mrb[58].mxu0  ;;  %v2309_v30 = vpop.f32.mrb[58].mxu1  ;;  %v1558_v7 = vmax.f32 %v1522_v52, 0.0 }
 0x15c   :  { %v1561_v32 = vmax.f32 %v1525_v62, 0.0  ;;  %v1458_v5 = vmax.f32 %v1457_v56, %v2816_v58  ;;  %v1460_v16 = vmax.f32 %v2822_v61, %v2237_v0  ;;  %v1043_v20 = vpop.f32.mrb[59].mxu0  ;;  %v1331_v41 = vpop.f32.mrb[59].mxu1 }
 0x15d   :  { %v1559_v23 = vmax.f32 %v1523_v28, 0.0  ;;  %v1452_v57 = vmax.f32 %v1451_v31, %v2820_v60  ;;  %v1454_v2 = vmax.f32 %v2826_v63, %v1043_v20 }
 0x15e   :  { %v2032_v43 = vpack.c.bf16 %v1561_v32, %v1560_v18  ;;  %v1459_v22 = vmax.f32 %v1458_v5, %v2308_v54  ;;  %v1461_v59 = vmax.f32 %v1460_v16, %v3075_v6  ;;  %v3084_v54 = vld [vmem:[#allocation11_spill] sm:$0xff]  ;;  %v3085_v18 = vld [vmem:[#allocation12_spill] sm:$0xff] }
 0x15f   :  { %v2027_v24 = vpack.c.bf16 %v1559_v23, %v1558_v7  ;;  %v1453_v42 = vmax.f32 %v1452_v57, %v1328_v29  ;;  %v1455_v44 = vmax.f32 %v1454_v2, %v3076_v45 }
 0x160   :  { %2082 = vst [vmem:[%s3048_s3 + $0x48] sm:$0xff] %v2032_v43   ;;  %v1528_v58 = vadd.f32 %v2885_v13, %v1459_v22  ;;  %v1462_v61 = vmax.f32 %v1461_v59, %v2309_v30  ;;  %v3087_v22 = vld [vmem:[#allocation13_spill] sm:$0xff]  ;;  %v3088_v59 = vld [vmem:[#allocation16_spill] sm:$0xff] }
 0x161   :  { %2081 = vst [vmem:[%s3048_s3 + $0x40] sm:$0xff] %v2027_v24   ;;  %v1526_v60 = vadd.f32 %v2885_v13, %v1453_v42  ;;  %v1456_v63 = vmax.f32 %v1455_v44, %v1331_v41  ;;  %v2240_v47 = vpop.f32.mrb[60].mxu0  ;;  %v2312_v9 = vpop.f32.mrb[60].mxu1  ;;  %v3086_v41 = vld [vmem:[#allocation14_spill] sm:$0xff] }
 0x162   :  { %v1529_v46 = vadd.f32 %v2885_v13, %v1462_v61  ;;  %v1469_v48 = vmax.f32 %v3077_v10, %v2240_v47  ;;  %v1056_v8 = vpop.f32.mrb[61].mxu0  ;;  %v1344_v3 = vpop.f32.mrb[61].mxu1  ;;  %v1564_v35 = vmax.f32 %v1528_v58, 0.0  ;;  %v3089_v61 = vld [vmem:[#allocation15_spill] sm:$0xff]  ;;  %v3091_v10 = vld [vmem:[#allocation17_spill] sm:$0xff] }
 0x163   :  { %v1527_v11 = vadd.f32 %v2885_v13, %v1456_v63  ;;  %v1463_v12 = vmax.f32 %v3078_v33, %v1056_v8  ;;  %v2241_v15 = vpop.f32.mrb[62].mxu0  ;;  %v2313_v17 = vpop.f32.mrb[62].mxu1  ;;  %v1562_v39 = vmax.f32 %v1526_v60, 0.0  ;;  %v3090_v63 = vld [vmem:[#allocation18_spill] sm:$0xff] }
 0x164   :  { %v1565_v25 = vmax.f32 %v1529_v46, 0.0  ;;  %v1470_v14 = vmax.f32 %v1469_v48, %v3079_v1  ;;  %v1472_v37 = vmax.f32 %v3080_v34, %v2241_v15  ;;  %v1059_v36 = vpop.f32.mrb[63].mxu0  ;;  %v1347_v49 = vpop.f32.mrb[63].mxu1  ;;  %v3093_v34 = vld [vmem:[#allocation20_spill] sm:$0xff] }
 0x165   :  { %v1563_v19 = vmax.f32 %v1527_v11, 0.0  ;;  %v1464_v51 = vmax.f32 %v1463_v12, %v3081_v38  ;;  %v1466_v40 = vmax.f32 %v3082_v27, %v1059_v36  ;;  %v3092_v11 = vld [vmem:[#allocation19_spill] sm:$0xff] }
 0x166   :  { %v2042_v4 = vpack.c.bf16 %v1565_v25, %v1564_v35  ;;  %v1471_v50 = vmax.f32 %v1470_v14, %v2312_v9  ;;  %v1473_v52 = vmax.f32 %v1472_v37, %v3083_v53 }
 0x167   :  { %v2037_v55 = vpack.c.bf16 %v1563_v19, %v1562_v39  ;;  %v1465_v21 = vmax.f32 %v1464_v51, %v1344_v3  ;;  %v1467_v62 = vmax.f32 %v1466_v40, %v3084_v54  ;;  %v3094_v19 = vld [vmem:[#allocation22_spill] sm:$0xff] }
 0x168   :  { %2084 = vst [vmem:[%s3048_s3 + $0x58] sm:$0xff] %v2042_v4   ;;  %v1532_v56 = vadd.f32 %v2885_v13, %v1471_v50  ;;  %v1474_v26 = vmax.f32 %v1473_v52, %v2313_v17  ;;  %v3095_v50 = vld [vmem:[#allocation21_spill] sm:$0xff]  ;;  %v3096_v52 = vld [vmem:[#allocation24_spill] sm:$0xff] }
 0x169   :  { %2083 = vst [vmem:[%s3048_s3 + $0x50] sm:$0xff] %v2037_v55   ;;  %v1530_v29 = vadd.f32 %v2885_v13, %v1465_v21  ;;  %v1468_v28 = vmax.f32 %v1467_v62, %v1347_v49  ;;  %v2244_v31 = vpop.f32.mrb[64].mxu0  ;;  %v2316_v0 = vpop.f32.mrb[64].mxu1 }
 0x16a   :  { %v1533_v30 = vadd.f32 %v2885_v13, %v1474_v26  ;;  %v1481_v32 = vmax.f32 %v3085_v18, %v2244_v31  ;;  %v1072_v5 = vpop.f32.mrb[65].mxu0  ;;  %v1360_v16 = vpop.f32.mrb[65].mxu1  ;;  %v1568_v2 = vmax.f32 %v1532_v56, 0.0  ;;  %v3097_v26 = vld [vmem:[#allocation23_spill] sm:$0xff]  ;;  %v3099_v18 = vld [vmem:[#allocation25_spill] sm:$0xff] }
 0x16b   :  { %v1531_v20 = vadd.f32 %v2885_v13, %v1468_v28  ;;  %v1475_v7 = vmax.f32 %v3086_v41, %v1072_v5  ;;  %v2245_v23 = vpop.f32.mrb[66].mxu0  ;;  %v2317_v57 = vpop.f32.mrb[66].mxu1  ;;  %v1566_v44 = vmax.f32 %v1530_v29, 0.0  ;;  %v3098_v28 = vld [vmem:[#allocation26_spill] sm:$0xff] }
 0x16c   :  { %v1569_v43 = vmax.f32 %v1533_v30, 0.0  ;;  %v1482_v6 = vmax.f32 %v1481_v32, %v3087_v22  ;;  %v1484_v24 = vmax.f32 %v3088_v59, %v2245_v23  ;;  %v1075_v42 = vpop.f32.mrb[67].mxu0  ;;  %v1363_v45 = vpop.f32.mrb[67].mxu1 }
 0x16d   :  { %v1567_v58 = vmax.f32 %v1531_v20, 0.0  ;;  %v1476_v60 = vmax.f32 %v1475_v7, %v3089_v61  ;;  %v1478_v47 = vmax.f32 %v3090_v63, %v1075_v42  ;;  %v3100_v20 = vld [vmem:[#allocation27_spill] sm:$0xff] }
 0x16e   :  { %v2052_v9 = vpack.c.bf16 %v1569_v43, %v1568_v2  ;;  %v1483_v46 = vmax.f32 %v1482_v6, %v2316_v0  ;;  %v1485_v48 = vmax.f32 %v1484_v24, %v3091_v10 }
 0x16f   :  { %v2047_v8 = vpack.c.bf16 %v1567_v58, %v1566_v44  ;;  %v1477_v3 = vmax.f32 %v1476_v60, %v1360_v16  ;;  %v1479_v33 = vmax.f32 %v1478_v47, %v3092_v11 }
 0x170   :  { %2086 = vst [vmem:[%s3048_s3 + $0x68] sm:$0xff] %v2052_v9   ;;  %v1536_v12 = vadd.f32 %v2885_v13, %v1483_v46  ;;  %v1486_v15 = vmax.f32 %v1485_v48, %v2317_v57 }
 0x171   :  { %2085 = vst [vmem:[%s3048_s3 + $0x60] sm:$0xff] %v2047_v8   ;;  %v1534_v17 = vadd.f32 %v2885_v13, %v1477_v3  ;;  %v1480_v35 = vmax.f32 %v1479_v33, %v1363_v45  ;;  %v2248_v25 = vpop.f32.mrb[68].mxu0  ;;  %v2320_v1 = vpop.f32.mrb[68].mxu1 }
 0x172   :  { %v1537_v14 = vadd.f32 %v2885_v13, %v1486_v15  ;;  %v1493_v37 = vmax.f32 %v3093_v34, %v2248_v25  ;;  %v1088_v36 = vpop.f32.mrb[69].mxu0  ;;  %v1376_v49 = vpop.f32.mrb[69].mxu1  ;;  %v1572_v40 = vmax.f32 %v1536_v12, 0.0 }
 0x173   :  { %v1535_v39 = vadd.f32 %v2885_v13, %v1480_v35  ;;  %v1487_v38 = vmax.f32 %v3094_v19, %v1088_v36  ;;  %v2249_v51 = vpop.f32.mrb[70].mxu0  ;;  %v2321_v27 = vpop.f32.mrb[70].mxu1  ;;  %v1570_v62 = vmax.f32 %v1534_v17, 0.0 }
 0x174   :  { %v1573_v4 = vmax.f32 %v1537_v14, 0.0  ;;  %v1494_v53 = vmax.f32 %v1493_v37, %v3095_v50  ;;  %v1496_v55 = vmax.f32 %v3096_v52, %v2249_v51  ;;  %v1091_v21 = vpop.f32.mrb[71].mxu0  ;;  %v1379_v54 = vpop.f32.mrb[71].mxu1 }
 0x175   :  { %v1571_v56 = vmax.f32 %v1535_v39, 0.0  ;;  %v1488_v29 = vmax.f32 %v1487_v38, %v3097_v26  ;;  %v1490_v31 = vmax.f32 %v3098_v28, %v1091_v21 }
 0x176   :  { %v2062_v0 = vpack.c.bf16 %v1573_v4, %v1572_v40  ;;  %v1495_v30 = vmax.f32 %v1494_v53, %v2320_v1  ;;  %v1497_v32 = vmax.f32 %v1496_v55, %v3099_v18 }
 0x177   :  { %v2057_v5 = vpack.c.bf16 %v1571_v56, %v1570_v62  ;;  %v1489_v16 = vmax.f32 %v1488_v29, %v1376_v49  ;;  %v1491_v41 = vmax.f32 %v1490_v31, %v3100_v20 }
 0x178   :  { %2088 = vst [vmem:[%s3048_s3 + $0x78] sm:$0xff] %v2062_v0   ;;  %v1540_v7 = vadd.f32 %v2885_v13, %v1495_v30  ;;  %v1498_v23 = vmax.f32 %v1497_v32, %v2321_v27 }
 0x179   :  { %2087 = vst [vmem:[%s3048_s3 + $0x70] sm:$0xff] %v2057_v5   ;;  %v1538_v57 = vadd.f32 %v2885_v13, %v1489_v16  ;;  %v1492_v2 = vmax.f32 %v1491_v41, %v1379_v54 }
 0x17a   :  { %v1541_v43 = vadd.f32 %v2885_v13, %v1498_v23  ;;  %v1576_v6 = vmax.f32 %v1540_v7, 0.0 }
 0x17b   :  { %v1539_v22 = vadd.f32 %v2885_v13, %v1492_v2  ;;  %v1574_v24 = vmax.f32 %v1538_v57, 0.0 }
 0x17c   :  { %v1577_v59 = vmax.f32 %v1541_v43, 0.0 }
 0x17d   :  { %v1575_v42 = vmax.f32 %v1539_v22, 0.0 }
 0x17e   :  { %v2072_v45 = vpack.c.bf16 %v1577_v59, %v1576_v6 }
 0x17f   :  { %v2067_v44 = vpack.c.bf16 %v1575_v42, %v1574_v24 }
 0x180   :  { %2090 = vst [vmem:[%s3048_s3 + $0x88] sm:$0xff] %v2072_v45  }
 0x181   :  { %2089 = vst [vmem:[%s3048_s3 + $0x80] sm:$0xff] %v2067_v44  }

// kernel: dann_cnn_forward.4
= control target key start
LH: loop header
LB: loop body
LE: loop exit
PB: predicated region body
PF: predicated region fallthrough
CT: control target
= control target key end

     0   :  { %vm1447_vm0 = vcmask 523264   ;;  %s3886_s1 = inlined_call_operand.vmem [shape: bf16[1600,128], index: 1, kind: input, shape index: {}]   ;;  %s3887_s0 = inlined_call_operand.vmem [shape: bf16[4,32,1600], index: 0, kind: input, shape index: {}]   ;;  %s3888_s2 = inlined_call_operand.vmem [shape: f32[1,128], index: 2, kind: input, shape index: {}]   ;;  %s3889_s3 = inlined_call_operand.vmem [shape: bf16[32,128], index: 3, kind: output, shape index: {}]  }
   0x1   :  { %v2862_v0 = vld [vmem:[%s3886_s1 + $0x40] sm:$0xff]   ;;  %v2866_v4 = vld [vmem:[%s3886_s1 + $0x48] sm:$0xff]   ;;  %v2870_v8 = vld [vmem:[%s3886_s1 + $0x50] sm:$0xff]  }
   0x2   :  { %v2863_v1 = vld [vmem:[%s3886_s1 + $0xc0] sm:$0xff]   ;;  %2434 = vmatprep.subr.bf16.mxu0 %v2862_v0  ;;  %v2867_v5 = vld [vmem:[%s3886_s1 + $0xc8] sm:$0xff]   ;;  %v2871_v9 = vld [vmem:[%s3886_s1 + $0xd0] sm:$0xff]  }
   0x3   :  { %v2864_v2 = vld [vmem:[%s3886_s1] sm:$0xff]   ;;  %2498 = vmatprep.subr.bf16.mxu1 %v2863_v1  ;;  %v2868_v6 = vld [vmem:[%s3886_s1 + $0x8] sm:$0xff]   ;;  %v2872_v10 = vld [vmem:[%s3886_s1 + $0x10] sm:$0xff]  }
   0x4   :  { %v2865_v3 = vld [vmem:[%s3886_s1 + $0x80] sm:$0xff]   ;;  %2435 = vmatpush3.bf16.msra.mxu0 %v2864_v2  ;;  %v2869_v7 = vld [vmem:[%s3886_s1 + $0x88] sm:$0xff]   ;;  %v2873_v11 = vld [vmem:[%s3886_s1 + $0x90] sm:$0xff]  }
   0x5   :  { %2499 = vmatpush3.bf16.msra.mxu1 %v2865_v3  ;;  %2436 = vmatprep.subr.bf16.mxu0 %v2866_v4  ;;  %v2874_v12 = vld [vmem:[%s3886_s1 + $0x58] sm:$0xff]   ;;  %v2878_v16 = vld [vmem:[%s3886_s1 + $0x60] sm:$0xff]   ;;  %v2882_v20 = vld [vmem:[%s3886_s1 + $0x68] sm:$0xff]  }
   0x6   :  { %2500 = vmatprep.subr.bf16.mxu1 %v2867_v5  ;;  %v2875_v13 = vld [vmem:[%s3886_s1 + $0xd8] sm:$0xff]   ;;  %v2879_v17 = vld [vmem:[%s3886_s1 + $0xe0] sm:$0xff]   ;;  %v2883_v21 = vld [vmem:[%s3886_s1 + $0xe8] sm:$0xff]  }
   0x7   :  { %v2876_v14 = vld [vmem:[%s3886_s1 + $0x18] sm:$0xff]   ;;  %v2880_v18 = vld [vmem:[%s3886_s1 + $0x20] sm:$0xff]   ;;  %v2884_v22 = vld [vmem:[%s3886_s1 + $0x28] sm:$0xff]  }
   0x8   :  { %2437 = vmatpush3.bf16.msra.mxu0 %v2868_v6  ;;  %v2877_v15 = vld [vmem:[%s3886_s1 + $0x98] sm:$0xff]   ;;  %v2881_v19 = vld [vmem:[%s3886_s1 + $0xa0] sm:$0xff]   ;;  %v2885_v23 = vld [vmem:[%s3886_s1 + $0xa8] sm:$0xff]  }
   0x9   :  { %2501 = vmatpush3.bf16.msra.mxu1 %v2869_v7  ;;  %2438 = vmatprep.subr.bf16.mxu0 %v2870_v8  ;;  %v2886_v24 = vld [vmem:[%s3886_s1 + $0x70] sm:$0xff]   ;;  %v2890_v28 = vld [vmem:[%s3886_s1 + $0x78] sm:$0xff]   ;;  %v2899_v35 = vld [vmem:[%s3887_s0 + $0xc] ss:$52 sps:$4 sm:$0xff]  }
   0xa   :  { %2502 = vmatprep.subr.bf16.mxu1 %v2871_v9  ;;  %v2887_v25 = vld [vmem:[%s3886_s1 + $0xf0] sm:$0xff]   ;;  %v2891_v29 = vld [vmem:[%s3886_s1 + $0xf8] sm:$0xff]   ;;  %v2900_v36 = vld [vmem:[%s3886_s1 + $0x140] sm:$0xff]   ;;  %1601 = vmatprep.mubr.bf16.mxu1 %v2899_v35 }
   0xb   :  { %v2888_v26 = vld [vmem:[%s3886_s1 + $0x30] sm:$0xff]   ;;  %v2892_v30 = vld [vmem:[%s3886_s1 + $0x38] sm:$0xff]   ;;  %v2901_v37 = vld [vmem:[%s3886_s1 + $0x100] sm:$0xff]  }
   0xc   :  { %2439 = vmatpush3.bf16.msra.mxu0 %v2872_v10  ;;  %v2889_v27 = vld [vmem:[%s3886_s1 + $0xb0] sm:$0xff]   ;;  %v2893_v31 = vld [vmem:[%s3886_s1 + $0xb8] sm:$0xff]   ;;  %v2902_v38 = vld [vmem:[%s3886_s1 + $0x1c0] sm:$0xff]  }
   0xd   :  { %2503 = vmatpush3.bf16.msra.mxu1 %v2873_v11  ;;  %2440 = vmatprep.subr.bf16.mxu0 %v2874_v12  ;;  %v2894_v32 = vld [vmem:[%s3887_s0] ss:$52 sps:$4 sm:$0xff]   ;;  %v2896_v33 = vld [vmem:[%s3887_s0 + $0x4] ss:$52 sps:$4 sm:$0xff]   ;;  %v2897_v34 = vld [vmem:[%s3887_s0 + $0x8] ss:$52 sps:$4 sm:$0xff]  }
   0xe   :  { %2504 = vmatprep.subr.bf16.mxu1 %v2875_v13  ;;  %1504 = vmatprep.mubr.bf16.mxu0 %v2896_v33  ;;  %v2903_v39 = vld [vmem:[%s3886_s1 + $0x180] sm:$0xff]   ;;  %v2906_v41 = vld [vmem:[%s3887_s0 + $0x74] ss:$52 sps:$4 sm:$0xff]   ;;  %v2916_v49 = vld [vmem:[%s3887_s0 + $0xdc] ss:$52 sps:$4 sm:$0xff]  }
   0xf   :  { %v2904_v40 = vld [vmem:[%s3887_s0 + $0x6c] ss:$52 sps:$4 sm:$0xff]   ;;  %v2908_v42 = vld [vmem:[%s3887_s0 + $0x68] ss:$52 sps:$4 sm:$0xff]   ;;  %v2909_v43 = vld [vmem:[%s3887_s0 + $0x70] ss:$52 sps:$4 sm:$0xff]  }
  0x10   :  { %2441 = vmatpush3.bf16.msra.mxu0 %v2876_v14  ;;  %v2910_v44 = vld [vmem:[%s3886_s1 + $0x148] sm:$0xff]   ;;  %v2918_v50 = vld [vmem:[%s3887_s0 + $0xd0] ss:$52 sps:$4 sm:$0xff]   ;;  %v2929_v59 = vld [vmem:[%s3887_s0 + $0x140] ss:$52 sps:$4 sm:$0xff]  }
  0x11   :  { %2505 = vmatpush3.bf16.msra.mxu1 %v2877_v15  ;;  %2442 = vmatprep.subr.bf16.mxu0 %v2878_v16  ;;  %v2911_v45 = vld [vmem:[%s3886_s1 + $0x108] sm:$0xff]   ;;  %v2920_v52 = vld [vmem:[%s3886_s1 + $0x150] sm:$0xff]   ;;  %v2926_v57 = vld [vmem:[%s3887_s0 + $0x144] ss:$52 sps:$4 sm:$0xff]  }
  0x12   :  { %2506 = vmatprep.subr.bf16.mxu1 %v2879_v17  ;;  %v2912_v46 = vld [vmem:[%s3886_s1 + $0x1c8] sm:$0xff]   ;;  %v2921_v53 = vld [vmem:[%s3886_s1 + $0x110] sm:$0xff]   ;;  %v2930_v60 = vld [vmem:[%s3886_s1 + $0x158] sm:$0xff]  }
  0x13   :  { %v2913_v47 = vld [vmem:[%s3886_s1 + $0x188] sm:$0xff]   ;;  %v2922_v54 = vld [vmem:[%s3886_s1 + $0x1d0] sm:$0xff]   ;;  %v2931_v61 = vld [vmem:[%s3886_s1 + $0x118] sm:$0xff]  }
  0x14   :  { %2443 = vmatpush3.bf16.msra.mxu0 %v2880_v18  ;;  %v2914_v48 = vld [vmem:[%s3887_s0 + $0xd4] ss:$52 sps:$4 sm:$0xff]   ;;  %v2919_v51 = vld [vmem:[%s3887_s0 + $0xd8] ss:$52 sps:$4 sm:$0xff]   ;;  %v2924_v56 = vld [vmem:[%s3887_s0 + $0x13c] ss:$52 sps:$4 sm:$0xff]  }
  0x15   :  { %2507 = vmatpush3.bf16.msra.mxu1 %v2881_v19  ;;  %2444 = vmatprep.subr.bf16.mxu0 %v2882_v20  ;;  %v2923_v55 = vld [vmem:[%s3886_s1 + $0x190] sm:$0xff]   ;;  %v2928_v58 = vld [vmem:[%s3887_s0 + $0x138] ss:$52 sps:$4 sm:$0xff]   ;;  %v2940_v3 = vld [vmem:[%s3886_s1 + $0x160] sm:$0xff]  }
  0x16   :  { %2508 = vmatprep.subr.bf16.mxu1 %v2883_v21  ;;  %v2932_v62 = vld [vmem:[%s3886_s1 + $0x1d8] sm:$0xff]   ;;  %v2936_v1 = vld [vmem:[%s3887_s0 + $0x1ac] ss:$52 sps:$4 sm:$0xff]   ;;  %v2946_v9 = vld [vmem:[%s3887_s0 + $0x214] ss:$52 sps:$4 sm:$0xff]  }
  0x17   :  { %v2933_v63 = vld [vmem:[%s3886_s1 + $0x198] sm:$0xff]   ;;  %v2938_v2 = vld [vmem:[%s3887_s0 + $0x1a0] ss:$52 sps:$4 sm:$0xff]   ;;  %v2950_v10 = vld [vmem:[%s3886_s1 + $0x168] sm:$0xff]  }
  0x18   :  { %2445 = vmatpush3.bf16.msra.mxu0 %v2884_v22  ;;  %v2934_v0 = vld [vmem:[%s3887_s0 + $0x1a4] ss:$52 sps:$4 sm:$0xff]   ;;  %v2939_v4 = vld [vmem:[%s3887_s0 + $0x1a8] ss:$52 sps:$4 sm:$0xff]   ;;  %v2944_v8 = vld [vmem:[%s3887_s0 + $0x20c] ss:$52 sps:$4 sm:$0xff]  }
  0x19   :  { %2509 = vmatpush3.bf16.msra.mxu1 %v2885_v23  ;;  %2446 = vmatprep.subr.bf16.mxu0 %v2886_v24  ;;  %v2941_v5 = vld [vmem:[%s3886_s1 + $0x120] sm:$0xff]   ;;  %v2951_v11 = vld [vmem:[%s3886_s1 + $0x128] sm:$0xff]   ;;  %v2956_v17 = vld [vmem:[%s3887_s0 + $0x27c] ss:$52 sps:$4 sm:$0xff]  }
  0x1a   :  { %2510 = vmatprep.subr.bf16.mxu1 %v2887_v25  ;;  %v2942_v6 = vld [vmem:[%s3886_s1 + $0x1e0] sm:$0xff]   ;;  %v2948_v12 = vld [vmem:[%s3887_s0 + $0x208] ss:$52 sps:$4 sm:$0xff]   ;;  %v2960_v18 = vld [vmem:[%s3886_s1 + $0x170] sm:$0xff]  }
  0x1b   :  { %v2943_v7 = vld [vmem:[%s3886_s1 + $0x1a0] sm:$0xff]   ;;  %v2952_v13 = vld [vmem:[%s3886_s1 + $0x1e8] sm:$0xff]   ;;  %v2961_v19 = vld [vmem:[%s3886_s1 + $0x130] sm:$0xff]  }
  0x1c   :  { %2447 = vmatpush3.bf16.msra.mxu0 %v2888_v26  ;;  %v2953_v14 = vld [vmem:[%s3886_s1 + $0x1a8] sm:$0xff]   ;;  %v2949_v15 = vld [vmem:[%s3887_s0 + $0x210] ss:$52 sps:$4 sm:$0xff]   ;;  %v2970_v26 = vld [vmem:[%s3886_s1 + $0x178] sm:$0xff]  }
  0x1d   :  { %2511 = vmatpush3.bf16.msra.mxu1 %v2889_v27  ;;  %2448 = vmatprep.subr.bf16.mxu0 %v2890_v28  ;;  %v2954_v16 = vld [vmem:[%s3887_s0 + $0x274] ss:$52 sps:$4 sm:$0xff]   ;;  %v2958_v22 = vld [vmem:[%s3887_s0 + $0x270] ss:$52 sps:$4 sm:$0xff]   ;;  %v2959_v23 = vld [vmem:[%s3887_s0 + $0x278] ss:$52 sps:$4 sm:$0xff]  }
  0x1e   :  { %2512 = vmatprep.subr.bf16.mxu1 %v2891_v29  ;;  %v2962_v20 = vld [vmem:[%s3886_s1 + $0x1f0] sm:$0xff]   ;;  %v2966_v25 = vld [vmem:[%s3887_s0 + $0x2e4] ss:$52 sps:$4 sm:$0xff]  }
  0x1f   :  { %v2963_v21 = vld [vmem:[%s3886_s1 + $0x1b0] sm:$0xff]   ;;  %v2971_v27 = vld [vmem:[%s3886_s1 + $0x138] sm:$0xff]   ;;  %v2980_v33 = vld [vmem:[%s3886_s1 + $0x240] sm:$0xff]  }
  0x20   :  { %2449 = vmatpush3.bf16.msra.mxu0 %v2892_v30  ;;  %v2964_v24 = vld [vmem:[%s3887_s0 + $0x2dc] ss:$52 sps:$4 sm:$0xff]   ;;  %v2968_v30 = vld [vmem:[%s3887_s0 + $0x2d8] ss:$52 sps:$4 sm:$0xff]   ;;  %v2982_v35 = vld [vmem:[%s3886_s1 + $0x2c0] sm:$0xff]  }
  0x21   :  { %2513 = vmatpush3.bf16.msra.mxu1 %v2893_v31  ;;  %2562 = vmatprep.subr.bf16.mxu0 %v2900_v36  ;;  %v2972_v28 = vld [vmem:[%s3886_s1 + $0x1f8] sm:$0xff]   ;;  %v2969_v31 = vld [vmem:[%s3887_s0 + $0x2e0] ss:$52 sps:$4 sm:$0xff]   ;;  %v2974_v36 = vld [vmem:[%s3887_s0 + $0x10] ss:$52 sps:$4 sm:$0xff]  }
  0x22   :  { %2626 = vmatprep.subr.bf16.mxu1 %v2902_v38  ;;  %v2973_v29 = vld [vmem:[%s3886_s1 + $0x1b8] sm:$0xff]   ;;  %v2981_v38 = vld [vmem:[%s3886_s1 + $0x200] sm:$0xff]  }
  0x23   :  { %1505 = vmatmul.mubr.bf16.vlgmr.msra.gmra.mrb[0].mxu0 %v2894_v32  ;;  %v2976_v32 = vld [vmem:[%s3887_s0 + $0x14] ss:$52 sps:$4 sm:$0xff]  }
  0x24   :  { %1602 = vmatmul.mubr.bf16.vlgmr.msra.gmra.mrb[0].mxu1 %v2897_v34  ;;  %2563 = vmatpush3.bf16.msra.mxu0 %v2901_v37  ;;  %v2979_v34 = vld [vmem:[%s3887_s0 + $0x1c] ss:$52 sps:$4 sm:$0xff]   ;;  %v2977_v37 = vld [vmem:[%s3887_s0 + $0x18] ss:$52 sps:$4 sm:$0xff]  }
  0x25   :  { %2627 = vmatpush3.bf16.msra.mxu1 %v2903_v39  ;;  %1512 = vmatprep.mubr.bf16.mxu0 %v2904_v40  ;;  %v2983_v39 = vld [vmem:[%s3886_s1 + $0x280] sm:$0xff]   ;;  %v2984_v40 = vld [vmem:[%s3887_s0 + $0x7c] ss:$52 sps:$4 sm:$0xff]  }
  0x26   :  { %1609 = vmatprep.mubr.bf16.mxu1 %v2906_v41  ;;  %2564 = vmatprep.subr.bf16.mxu0 %v2910_v44  ;;  %v2986_v41 = vld [vmem:[%s3887_s0 + $0x84] ss:$52 sps:$4 sm:$0xff]   ;;  %v2992_v44 = vld [vmem:[%s3886_s1 + $0x2c8] sm:$0xff]  }
  0x27   :  { %2628 = vmatprep.subr.bf16.mxu1 %v2912_v46  ;;  %v2988_v46 = vld [vmem:[%s3887_s0 + $0x78] ss:$52 sps:$4 sm:$0xff]  }
  0x28   :  { %2565 = vmatpush3.bf16.msra.mxu0 %v2911_v45  ;;  %v2993_v45 = vld [vmem:[%s3886_s1 + $0x288] sm:$0xff]  }
  0x29   :  { %2629 = vmatpush3.bf16.msra.mxu1 %v2913_v47  ;;  %2566 = vmatprep.subr.bf16.mxu0 %v2920_v52  ;;  %v3000_v47 = vld [vmem:[%s3886_s1 + $0x250] sm:$0xff]  }
  0x2a   :  { %2630 = vmatprep.subr.bf16.mxu1 %v2922_v54  ;;  %v3001_v52 = vld [vmem:[%s3886_s1 + $0x210] sm:$0xff]   ;;  %v3010_v54 = vld [vmem:[%s3886_s1 + $0x258] sm:$0xff]  }
  0x2b   :  { %1513 = vmatmul.mubr.bf16.gmra.mrb[4].mxu0 %v2908_v42  ;;  %v2990_v42 = vld [vmem:[%s3886_s1 + $0x248] sm:$0xff]  }
  0x2c   :  { %1610 = vmatmul.mubr.bf16.gmra.mrb[4].mxu1 %v2909_v43  ;;  %1520 = vmatprep.mubr.bf16.mxu0 %v2914_v48  ;;  %v2991_v43 = vld [vmem:[%s3886_s1 + $0x208] sm:$0xff]   ;;  %v2989_v48 = vld [vmem:[%s3887_s0 + $0x80] ss:$52 sps:$4 sm:$0xff]  }
  0x2d   :  { %1617 = vmatprep.mubr.bf16.mxu1 %v2916_v49  ;;  %2567 = vmatpush3.bf16.msra.mxu0 %v2921_v53  ;;  %v2994_v49 = vld [vmem:[%s3887_s0 + $0xe4] ss:$52 sps:$4 sm:$0xff]   ;;  %v3003_v53 = vld [vmem:[%s3886_s1 + $0x290] sm:$0xff]  }
  0x2e   :  { %2631 = vmatpush3.bf16.msra.mxu1 %v2923_v55  ;;  %2568 = vmatprep.subr.bf16.mxu0 %v2930_v60  ;;  %v3011_v55 = vld [vmem:[%s3886_s1 + $0x218] sm:$0xff]   ;;  %v3004_v60 = vld [vmem:[%s3887_s0 + $0x14c] ss:$52 sps:$4 sm:$0xff]  }
  0x2f   :  { %2632 = vmatprep.subr.bf16.mxu1 %v2932_v62  ;;  %v3020_v62 = vld [vmem:[%s3886_s1 + $0x260] sm:$0xff]  }
  0x31   :  { %2569 = vmatpush3.bf16.msra.mxu0 %v2931_v61  ;;  %v3006_v61 = vld [vmem:[%s3887_s0 + $0x154] ss:$52 sps:$4 sm:$0xff]  }
  0x32   :  { %2633 = vmatpush3.bf16.msra.mxu1 %v2933_v63  ;;  %2570 = vmatprep.subr.bf16.mxu0 %v2940_v3  ;;  %v3021_v63 = vld [vmem:[%s3886_s1 + $0x220] sm:$0xff]  }
  0x33   :  { %1521 = vmatmul.mubr.bf16.gmra.mrb[8].mxu0 %v2918_v50  ;;  %2634 = vmatprep.subr.bf16.mxu1 %v2942_v6  ;;  %v3002_v50 = vld [vmem:[%s3886_s1 + $0x2d0] sm:$0xff]   ;;  %v3030_v6 = vld [vmem:[%s3886_s1 + $0x268] sm:$0xff]  }
  0x34   :  { %1618 = vmatmul.mubr.bf16.gmra.mrb[8].mxu1 %v2919_v51  ;;  %1528 = vmatprep.mubr.bf16.mxu0 %v2924_v56  ;;  %v2996_v51 = vld [vmem:[%s3887_s0 + $0xec] ss:$52 sps:$4 sm:$0xff]   ;;  %v3009_v3 = vld [vmem:[%s3887_s0 + $0x150] ss:$52 sps:$4 sm:$0xff]  }
  0x35   :  { %1625 = vmatprep.mubr.bf16.mxu1 %v2926_v57  ;;  %2571 = vmatpush3.bf16.msra.mxu0 %v2941_v5  ;;  %v2998_v56 = vld [vmem:[%s3887_s0 + $0xe0] ss:$52 sps:$4 sm:$0xff]   ;;  %v3012_v57 = vld [vmem:[%s3886_s1 + $0x2d8] sm:$0xff]  }
  0x36   :  { %2635 = vmatpush3.bf16.msra.mxu1 %v2943_v7  ;;  %2572 = vmatprep.subr.bf16.mxu0 %v2950_v10  ;;  %v3016_v5 = vld [vmem:[%s3887_s0 + $0x1bc] ss:$52 sps:$4 sm:$0xff]   ;;  %v3031_v7 = vld [vmem:[%s3886_s1 + $0x228] sm:$0xff]  }
  0x37   :  { %2636 = vmatprep.subr.bf16.mxu1 %v2952_v13  ;;  %v3018_v10 = vld [vmem:[%s3887_s0 + $0x1b0] ss:$52 sps:$4 sm:$0xff]  }
  0x38   :  { %v3026_v13 = vld [vmem:[%s3887_s0 + $0x224] ss:$52 sps:$4 sm:$0xff]  }
  0x39   :  { %2573 = vmatpush3.bf16.msra.mxu0 %v2951_v11  ;;  %v3019_v11 = vld [vmem:[%s3887_s0 + $0x1b8] ss:$52 sps:$4 sm:$0xff]  }
  0x3a   :  { %2637 = vmatpush3.bf16.msra.mxu1 %v2953_v14  ;;  %2574 = vmatprep.subr.bf16.mxu0 %v2960_v18  ;;  %v3040_v14 = vld [vmem:[%s3886_s1 + $0x270] sm:$0xff]   ;;  %v3028_v18 = vld [vmem:[%s3887_s0 + $0x218] ss:$52 sps:$4 sm:$0xff]  }
  0x3b   :  { %1529 = vmatmul.mubr.bf16.gmra.mrb[12].mxu0 %v2928_v58  ;;  %2638 = vmatprep.subr.bf16.mxu1 %v2962_v20  ;;  %v3013_v58 = vld [vmem:[%s3886_s1 + $0x298] sm:$0xff]  }
  0x3c   :  { %1626 = vmatmul.mubr.bf16.gmra.mrb[12].mxu1 %v2929_v59  ;;  %1536 = vmatprep.mubr.bf16.mxu0 %v2934_v0  ;;  %v2999_v59 = vld [vmem:[%s3887_s0 + $0xe8] ss:$52 sps:$4 sm:$0xff]   ;;  %v3022_v0 = vld [vmem:[%s3886_s1 + $0x2e0] sm:$0xff]  }
  0x3d   :  { %1633 = vmatprep.mubr.bf16.mxu1 %v2936_v1  ;;  %2575 = vmatpush3.bf16.msra.mxu0 %v2961_v19  ;;  %v3023_v1 = vld [vmem:[%s3886_s1 + $0x2a0] sm:$0xff]  }
  0x3e   :  { %2639 = vmatpush3.bf16.msra.mxu1 %v2963_v21  ;;  %2576 = vmatprep.subr.bf16.mxu0 %v2970_v26  ;;  %v3029_v19 = vld [vmem:[%s3887_s0 + $0x220] ss:$52 sps:$4 sm:$0xff]   ;;  %v3034_v20 = vld [vmem:[%s3887_s0 + $0x284] ss:$52 sps:$4 sm:$0xff]  }
  0x3f   :  { %2640 = vmatprep.subr.bf16.mxu1 %v2972_v28  ;;  %v3050_v21 = vld [vmem:[%s3886_s1 + $0x278] sm:$0xff]   ;;  %v3060_v26 = vld [vmem:[%s3886_s1 + $0x300] sm:$0xff]  }
  0x40   :  { %v3039_v28 = vld [vmem:[%s3887_s0 + $0x288] ss:$52 sps:$4 sm:$0xff]  }
  0x41   :  { %2577 = vmatpush3.bf16.msra.mxu0 %v2971_v27  ;;  %v3038_v27 = vld [vmem:[%s3887_s0 + $0x280] ss:$52 sps:$4 sm:$0xff]  }
  0x42   :  { %2641 = vmatpush3.bf16.msra.mxu1 %v2973_v29  ;;  %2690 = vmatprep.subr.bf16.mxu0 %v2980_v33  ;;  %v3044_v29 = vld [vmem:[%s3887_s0 + $0x2ec] ss:$52 sps:$4 sm:$0xff]   ;;  %v3056_v33 = vld [vmem:[%s3887_s0 + $0x24] ss:$52 sps:$4 sm:$0xff]  }
  0x43   :  { %1537 = vmatmul.mubr.bf16.gmra.mrb[16].mxu0 %v2938_v2  ;;  %2754 = vmatprep.subr.bf16.mxu1 %v2982_v35  ;;  %v3008_v2 = vld [vmem:[%s3887_s0 + $0x148] ss:$52 sps:$4 sm:$0xff]   ;;  %v3054_v35 = vld [vmem:[%s3887_s0 + $0x20] ss:$52 sps:$4 sm:$0xff]  }
  0x44   :  { %1634 = vmatmul.mubr.bf16.gmra.mrb[16].mxu1 %v2939_v4  ;;  %1544 = vmatprep.mubr.bf16.mxu0 %v2944_v8  ;;  %v3014_v4 = vld [vmem:[%s3887_s0 + $0x1b4] ss:$52 sps:$4 sm:$0xff]  }
  0x45   :  { %1641 = vmatprep.mubr.bf16.mxu1 %v2946_v9  ;;  %v3032_v8 = vld [vmem:[%s3886_s1 + $0x2e8] sm:$0xff]  }
  0x46   :  { %v3033_v9 = vld [vmem:[%s3886_s1 + $0x2a8] sm:$0xff]  }
  0x4b   :  { %1545 = vmatmul.mubr.bf16.gmra.mrb[20].mxu0 %v2948_v12  ;;  %v3024_v12 = vld [vmem:[%s3887_s0 + $0x21c] ss:$52 sps:$4 sm:$0xff]  }
  0x4c   :  { %1642 = vmatmul.mubr.bf16.gmra.mrb[20].mxu1 %v2949_v15  ;;  %1552 = vmatprep.mubr.bf16.mxu0 %v2954_v16  ;;  %v3041_v15 = vld [vmem:[%s3886_s1 + $0x230] sm:$0xff]  }
  0x4d   :  { %1649 = vmatprep.mubr.bf16.mxu1 %v2956_v17  ;;  %v3042_v16 = vld [vmem:[%s3886_s1 + $0x2f0] sm:$0xff]  }
  0x4e   :  { %v3043_v17 = vld [vmem:[%s3886_s1 + $0x2b0] sm:$0xff]  }
  0x53   :  { %1553 = vmatmul.mubr.bf16.gmra.mrb[24].mxu0 %v2958_v22  ;;  %v3036_v22 = vld [vmem:[%s3887_s0 + $0x28c] ss:$52 sps:$4 sm:$0xff]  }
  0x54   :  { %1650 = vmatmul.mubr.bf16.gmra.mrb[24].mxu1 %v2959_v23  ;;  %1560 = vmatprep.mubr.bf16.mxu0 %v2964_v24  ;;  %v3051_v23 = vld [vmem:[%s3886_s1 + $0x238] sm:$0xff]  }
  0x55   :  { %1657 = vmatprep.mubr.bf16.mxu1 %v2966_v25  ;;  %v3052_v24 = vld [vmem:[%s3886_s1 + $0x2f8] sm:$0xff]  }
  0x56   :  { %v3053_v25 = vld [vmem:[%s3886_s1 + $0x2b8] sm:$0xff]  }
  0x5b   :  { %1561 = vmatmul.mubr.bf16.gmra.mrb[28].mxu0 %v2968_v30  ;;  %v3046_v30 = vld [vmem:[%s3887_s0 + $0x2f4] ss:$52 sps:$4 sm:$0xff]  }
  0x5c   :  { %1658 = vmatmul.mubr.bf16.gmra.mrb[28].mxu1 %v2969_v31  ;;  %1698 = vmatprep.mubr.bf16.mxu0 %v2976_v32  ;;  %v3048_v31 = vld [vmem:[%s3887_s0 + $0x2e8] ss:$52 sps:$4 sm:$0xff]   ;;  %v3049_v32 = vld [vmem:[%s3887_s0 + $0x2f0] ss:$52 sps:$4 sm:$0xff]  }
  0x5d   :  { %1795 = vmatprep.mubr.bf16.mxu1 %v2979_v34  ;;  %v3059_v34 = vld [vmem:[%s3887_s0 + $0x2c] ss:$52 sps:$4 sm:$0xff]  }
  0x63   :  { %1699 = vmatmul.mubr.bf16.vlgmr.msra.gmra.mrb[32].mxu0 %v2974_v36  ;;  %v3057_v36 = vld [vmem:[%s3887_s0 + $0x28] ss:$52 sps:$4 sm:$0xff]  }
  0x64   :  { %1796 = vmatmul.mubr.bf16.vlgmr.msra.gmra.mrb[32].mxu1 %v2977_v37  ;;  %2691 = vmatpush3.bf16.msra.mxu0 %v2981_v38  ;;  %v3061_v37 = vld [vmem:[%s3887_s0 + $0x8c] ss:$52 sps:$4 sm:$0xff]   ;;  %v3063_v38 = vld [vmem:[%s3887_s0 + $0x94] ss:$52 sps:$4 sm:$0xff]  }
  0x65   :  { %2755 = vmatpush3.bf16.msra.mxu1 %v2983_v39  ;;  %1706 = vmatprep.mubr.bf16.mxu0 %v2984_v40  ;;  %v3073_v39 = vld [vmem:[%s3886_s1 + $0x308] sm:$0xff]   ;;  %v3086_v40 = vld [vmem:[%s3886_s1 + $0x310] sm:$0xff]  }
  0x66   :  { %1803 = vmatprep.mubr.bf16.mxu1 %v2986_v41  ;;  %2692 = vmatprep.subr.bf16.mxu0 %v2990_v42  ;;  %v3065_v41 = vld [vmem:[%s3887_s0 + $0x88] ss:$52 sps:$4 sm:$0xff]   ;;  %v3066_v42 = vld [vmem:[%s3887_s0 + $0x90] ss:$52 sps:$4 sm:$0xff]  }
  0x67   :  { %2756 = vmatprep.subr.bf16.mxu1 %v2992_v44  ;;  %v3069_v44 = vld [vmem:[%s3887_s0 + $0xfc] ss:$52 sps:$4 sm:$0xff]  }
  0x68   :  { %2693 = vmatpush3.bf16.msra.mxu0 %v2991_v43  ;;  %v3067_v43 = vld [vmem:[%s3887_s0 + $0xf4] ss:$52 sps:$4 sm:$0xff]  }
  0x69   :  { %2757 = vmatpush3.bf16.msra.mxu1 %v2993_v45  ;;  %2694 = vmatprep.subr.bf16.mxu0 %v3000_v47  ;;  %v3099_v45 = vld [vmem:[%s3886_s1 + $0x318] sm:$0xff]  }
  0x6a   :  { %2758 = vmatprep.subr.bf16.mxu1 %v3002_v50  ;;  %v3072_v47 = vld [vmem:[%s3887_s0 + $0xf8] ss:$52 sps:$4 sm:$0xff]  }
  0x6b   :  { %1707 = vmatmul.mubr.bf16.gmra.mrb[36].mxu0 %v2988_v46  ;;  %v3071_v46 = vld [vmem:[%s3887_s0 + $0xf0] ss:$52 sps:$4 sm:$0xff]   ;;  %v3078_v50 = vld [vmem:[%s3887_s0 + $0x158] ss:$52 sps:$4 sm:$0xff]  }
  0x6c   :  { %1804 = vmatmul.mubr.bf16.gmra.mrb[36].mxu1 %v2989_v48  ;;  %1714 = vmatprep.mubr.bf16.mxu0 %v2994_v49  ;;  %v3074_v48 = vld [vmem:[%s3887_s0 + $0x15c] ss:$52 sps:$4 sm:$0xff]   ;;  %v3076_v49 = vld [vmem:[%s3887_s0 + $0x164] ss:$52 sps:$4 sm:$0xff]  }
  0x6d   :  { %1811 = vmatprep.mubr.bf16.mxu1 %v2996_v51  ;;  %2695 = vmatpush3.bf16.msra.mxu0 %v3001_v52  ;;  %v3079_v51 = vld [vmem:[%s3887_s0 + $0x160] ss:$52 sps:$4 sm:$0xff]   ;;  %v3080_v52 = vld [vmem:[%s3887_s0 + $0x1c4] ss:$52 sps:$4 sm:$0xff]  }
  0x6e   :  { %2759 = vmatpush3.bf16.msra.mxu1 %v3003_v53  ;;  %2696 = vmatprep.subr.bf16.mxu0 %v3010_v54  ;;  %v3082_v53 = vld [vmem:[%s3887_s0 + $0x1cc] ss:$52 sps:$4 sm:$0xff]  }
  0x6f   :  { %2760 = vmatprep.subr.bf16.mxu1 %v3012_v57  ;;  %v3084_v54 = vld [vmem:[%s3887_s0 + $0x1c0] ss:$52 sps:$4 sm:$0xff]  }
  0x70   :  { %v3089_v57 = vld [vmem:[%s3887_s0 + $0x234] ss:$52 sps:$4 sm:$0xff]  }
  0x71   :  { %2697 = vmatpush3.bf16.msra.mxu0 %v3011_v55  ;;  %v3085_v55 = vld [vmem:[%s3887_s0 + $0x1c8] ss:$52 sps:$4 sm:$0xff]  }
  0x72   :  { %2761 = vmatpush3.bf16.msra.mxu1 %v3013_v58  ;;  %2698 = vmatprep.subr.bf16.mxu0 %v3020_v62  ;;  %v3091_v58 = vld [vmem:[%s3887_s0 + $0x228] ss:$52 sps:$4 sm:$0xff]   ;;  %v3097_v62 = vld [vmem:[%s3887_s0 + $0x290] ss:$52 sps:$4 sm:$0xff]  }
  0x73   :  { %1715 = vmatmul.mubr.bf16.gmra.mrb[40].mxu0 %v2998_v56  ;;  %2762 = vmatprep.subr.bf16.mxu1 %v3022_v0  ;;  %v3087_v56 = vld [vmem:[%s3887_s0 + $0x22c] ss:$52 sps:$4 sm:$0xff]   ;;  %v3100_v0 = vld [vmem:[%s3887_s0 + $0x2fc] ss:$52 sps:$4 sm:$0xff]  }
  0x74   :  { %1812 = vmatmul.mubr.bf16.gmra.mrb[40].mxu1 %v2999_v59  ;;  %1722 = vmatprep.mubr.bf16.mxu0 %v3004_v60  ;;  %v3092_v59 = vld [vmem:[%s3887_s0 + $0x230] ss:$52 sps:$4 sm:$0xff]   ;;  %v3093_v60 = vld [vmem:[%s3887_s0 + $0x294] ss:$52 sps:$4 sm:$0xff]  }
  0x75   :  { %1819 = vmatprep.mubr.bf16.mxu1 %v3006_v61  ;;  %2699 = vmatpush3.bf16.msra.mxu0 %v3021_v63  ;;  %v3095_v61 = vld [vmem:[%s3887_s0 + $0x29c] ss:$52 sps:$4 sm:$0xff]   ;;  %v3098_v63 = vld [vmem:[%s3887_s0 + $0x298] ss:$52 sps:$4 sm:$0xff]  }
  0x76   :  { %2763 = vmatpush3.bf16.msra.mxu1 %v3023_v1  ;;  %2700 = vmatprep.subr.bf16.mxu0 %v3030_v6  ;;  %v3102_v1 = vld [vmem:[%s3887_s0 + $0x304] ss:$52 sps:$4 sm:$0xff]  }
  0x77   :  { %2764 = vmatprep.subr.bf16.mxu1 %v3032_v8  ;;  %v3108_v6 = vld [vmem:[%s3887_s0 + $0x98] ss:$52 sps:$4 sm:$0xff]   ;;  %v3110_v8 = vld [vmem:[%s3887_s0 + $0x100] ss:$52 sps:$4 sm:$0xff]  }
  0x79   :  { %2701 = vmatpush3.bf16.msra.mxu0 %v3031_v7  ;;  %v3109_v7 = vld [vmem:[%s3887_s0 + $0x238] ss:$52 sps:$4 sm:$0xff]  }
  0x7a   :  { %2765 = vmatpush3.bf16.msra.mxu1 %v3033_v9  ;;  %2702 = vmatprep.subr.bf16.mxu0 %v3040_v14  ;;  %v3111_v9 = vld [vmem:[%s3887_s0 + $0x2a0] ss:$52 sps:$4 sm:$0xff]  }
  0x7b   :  { %1723 = vmatmul.mubr.bf16.gmra.mrb[44].mxu0 %v3008_v2  ;;  %2766 = vmatprep.subr.bf16.mxu1 %v3042_v16  ;;  %v3104_v2 = vld [vmem:[%s3887_s0 + $0x2f8] ss:$52 sps:$4 sm:$0xff]  }
  0x7c   :  { %1820 = vmatmul.mubr.bf16.gmra.mrb[44].mxu1 %v3009_v3  ;;  %1730 = vmatprep.mubr.bf16.mxu0 %v3014_v4  ;;  %v3105_v3 = vld [vmem:[%s3887_s0 + $0x300] ss:$52 sps:$4 sm:$0xff]   ;;  %v3106_v4 = vld [vmem:[%s3887_s0 + $0x30] ss:$52 sps:$4 sm:$0xff]  }
  0x7d   :  { %1827 = vmatprep.mubr.bf16.mxu1 %v3016_v5  ;;  %2703 = vmatpush3.bf16.msra.mxu0 %v3041_v15  ;;  %v3107_v5 = vld [vmem:[%s3887_s0 + $0x1d0] ss:$52 sps:$4 sm:$0xff]  }
  0x7e   :  { %2767 = vmatpush3.bf16.msra.mxu1 %v3043_v17  ;;  %2704 = vmatprep.subr.bf16.mxu0 %v3050_v21 }
  0x7f   :  { %2768 = vmatprep.subr.bf16.mxu1 %v3052_v24 }
  0x81   :  { %2705 = vmatpush3.bf16.msra.mxu0 %v3051_v23 }
  0x82   :  { %2769 = vmatpush3.bf16.msra.mxu1 %v3053_v25  ;;  %2830 = vmatprep.subr.bf16.mxu0 %v3060_v26 }
  0x83   :  { %1731 = vmatmul.mubr.bf16.gmra.mrb[48].mxu0 %v3018_v10  ;;  %2854 = vmatprep.subr.bf16.mxu1 %v3060_v26  ;;  %v3112_v10 = vld [vmem:[%s3887_s0 + $0x168] ss:$52 sps:$4 sm:$0xff]  }
  0x84   :  { %1828 = vmatmul.mubr.bf16.gmra.mrb[48].mxu1 %v3019_v11  ;;  %1738 = vmatprep.mubr.bf16.mxu0 %v3024_v12  ;;  %v3113_v11 = vld [vmem:[%s3887_s0 + $0x308] ss:$52 sps:$4 sm:$0xff]  }
  0x85   :  { %1835 = vmatprep.mubr.bf16.mxu1 %v3026_v13 }
  0x8b   :  { %1739 = vmatmul.mubr.bf16.gmra.mrb[52].mxu0 %v3028_v18 }
  0x8c   :  { %1836 = vmatmul.mubr.bf16.gmra.mrb[52].mxu1 %v3029_v19  ;;  %1746 = vmatprep.mubr.bf16.mxu0 %v3034_v20 }
  0x8d   :  { %1843 = vmatprep.mubr.bf16.mxu1 %v3036_v22 }
  0x93   :  { %1747 = vmatmul.mubr.bf16.gmra.mrb[56].mxu0 %v3038_v27 }
  0x94   :  { %1844 = vmatmul.mubr.bf16.gmra.mrb[56].mxu1 %v3039_v28  ;;  %1754 = vmatprep.mubr.bf16.mxu0 %v3044_v29 }
  0x95   :  { %1851 = vmatprep.mubr.bf16.mxu1 %v3046_v30 }
  0x9b   :  { %1755 = vmatmul.mubr.bf16.gmra.mrb[60].mxu0 %v3048_v31 }
  0x9c   :  { %1852 = vmatmul.mubr.bf16.gmra.mrb[60].mxu1 %v3049_v32  ;;  %1892 = vmatprep.mubr.bf16.mxu0 %v3056_v33 }
  0x9d   :  { %1989 = vmatprep.mubr.bf16.mxu1 %v3059_v34 }
  0xa3   :  { %1893 = vmatmul.mubr.bf16.vlgmr.msra.gmra.mrb[64].mxu0 %v3054_v35 }
  0xa4   :  { %1990 = vmatmul.mubr.bf16.vlgmr.msra.gmra.mrb[64].mxu1 %v3057_v36  ;;  %2831 = vmatpush3.bf16.msra.mxu0 %v3060_v26 }
  0xa5   :  { %2858 = vmatpush3.bf16.msra.mxu1 %v3060_v26  ;;  %1900 = vmatprep.mubr.bf16.mxu0 %v3061_v37 }
  0xa6   :  { %1997 = vmatprep.mubr.bf16.mxu1 %v3063_v38  ;;  %2832 = vmatprep.subr.bf16.mxu0 %v3073_v39 }
  0xa7   :  { %2855 = vmatprep.subr.bf16.mxu1 %v3073_v39 }
  0xa8   :  { %2833 = vmatpush3.bf16.msra.mxu0 %v3073_v39 }
  0xa9   :  { %2859 = vmatpush3.bf16.msra.mxu1 %v3073_v39  ;;  %2834 = vmatprep.subr.bf16.mxu0 %v3086_v40 }
  0xaa   :  { %2856 = vmatprep.subr.bf16.mxu1 %v3086_v40 }
  0xab   :  { %1901 = vmatmul.mubr.bf16.gmra.mrb[68].mxu0 %v3065_v41 }
  0xac   :  { %1998 = vmatmul.mubr.bf16.gmra.mrb[68].mxu1 %v3066_v42  ;;  %1908 = vmatprep.mubr.bf16.mxu0 %v3067_v43 }
  0xad   :  { %2005 = vmatprep.mubr.bf16.mxu1 %v3069_v44  ;;  %2835 = vmatpush3.bf16.msra.mxu0 %v3086_v40 }
  0xae   :  { %2860 = vmatpush3.bf16.msra.mxu1 %v3086_v40  ;;  %2836 = vmatprep.subr.bf16.mxu0 %v3099_v45 }
  0xaf   :  { %2857 = vmatprep.subr.bf16.mxu1 %v3099_v45 }
  0xb1   :  { %2837 = vmatpush3.bf16.msra.mxu0 %v3099_v45 }
  0xb2   :  { %2861 = vmatpush3.bf16.msra.mxu1 %v3099_v45 }
  0xb3   :  { %1909 = vmatmul.mubr.bf16.gmra.mrb[72].mxu0 %v3071_v46 }
  0xb4   :  { %2006 = vmatmul.mubr.bf16.gmra.mrb[72].mxu1 %v3072_v47  ;;  %1916 = vmatprep.mubr.bf16.mxu0 %v3074_v48 }
  0xb5   :  { %2013 = vmatprep.mubr.bf16.mxu1 %v3076_v49 }
  0xbb   :  { %1917 = vmatmul.mubr.bf16.gmra.mrb[76].mxu0 %v3078_v50 }
  0xbc   :  { %2014 = vmatmul.mubr.bf16.gmra.mrb[76].mxu1 %v3079_v51  ;;  %1924 = vmatprep.mubr.bf16.mxu0 %v3080_v52 }
  0xbd   :  { %2021 = vmatprep.mubr.bf16.mxu1 %v3082_v53 }
  0xc3   :  { %1925 = vmatmul.mubr.bf16.gmra.mrb[80].mxu0 %v3084_v54 }
  0xc4   :  { %2022 = vmatmul.mubr.bf16.gmra.mrb[80].mxu1 %v3085_v55  ;;  %1932 = vmatprep.mubr.bf16.mxu0 %v3087_v56 }
  0xc5   :  { %2029 = vmatprep.mubr.bf16.mxu1 %v3089_v57 }
  0xcb   :  { %1933 = vmatmul.mubr.bf16.gmra.mrb[84].mxu0 %v3091_v58 }
  0xcc   :  { %2030 = vmatmul.mubr.bf16.gmra.mrb[84].mxu1 %v3092_v59  ;;  %1940 = vmatprep.mubr.bf16.mxu0 %v3093_v60 }
  0xcd   :  { %2037 = vmatprep.mubr.bf16.mxu1 %v3095_v61 }
  0xd3   :  { %1941 = vmatmul.mubr.bf16.gmra.mrb[88].mxu0 %v3097_v62 }
  0xd4   :  { %2038 = vmatmul.mubr.bf16.gmra.mrb[88].mxu1 %v3098_v63  ;;  %1948 = vmatprep.mubr.bf16.mxu0 %v3100_v0 }
  0xd5   :  { %2045 = vmatprep.mubr.bf16.mxu1 %v3102_v1 }
  0xdb   :  { %1949 = vmatmul.mubr.bf16.gmra.mrb[92].mxu0 %v3104_v2 }
  0xdc   :  { %2046 = vmatmul.mubr.bf16.gmra.mrb[92].mxu1 %v3105_v3  ;;  %2838 = vmatprep.mubr.msk.bf16.mxu0 %vm1447_vm0, %v3106_v4 }
  0xdd   :  { %2846 = vmatprep.mubr.msk.bf16.mxu1 %vm1447_vm0, %v3107_v5 }
  0xe3   :  { %2839 = vmatmul.mubr.msk.bf16.vlgmr.msra.gmra.mrb[96].mxu0 %vm1447_vm0, %v3108_v6 }
  0xe4   :  { %2847 = vmatmul.mubr.msk.bf16.vlgmr.msra.gmra.mrb[96].mxu1 %vm1447_vm0, %v3109_v7  ;;  %2842 = vmatprep.mubr.msk.bf16.mxu0 %vm1447_vm0, %v3110_v8 }
  0xe5   :  { %2850 = vmatprep.mubr.msk.bf16.mxu1 %vm1447_vm0, %v3111_v9 }
  0xeb   :  { %2843 = vmatmul.mubr.msk.bf16.gmra.mrb[100].mxu0 %vm1447_vm0, %v3112_v10 }
  0xec   :  { %2851 = vmatmul.mubr.msk.bf16.gmra.mrb[100].mxu1 %vm1447_vm0, %v3113_v11 }
  0xf6   :  { %v2450_v12 = vpop.f32.mrb[0].mxu0 }
  0xf7   :  { %v2514_v13 = vpop.f32.mrb[0].mxu1  ;;  %v2451_v14 = vpop.f32.mrb[1].mxu0 }
  0xf8   :  { %v2452_v15 = vadd.f32 %v2451_v14, %v2450_v12  ;;  %v2515_v16 = vpop.f32.mrb[1].mxu1  ;;  %v2453_v17 = vpop.f32.mrb[2].mxu0 }
  0xf9   :  { %v2516_v18 = vadd.f32 %v2515_v16, %v2514_v13  ;;  %v2517_v19 = vpop.f32.mrb[2].mxu1  ;;  %v2454_v20 = vpop.f32.mrb[3].mxu0 }
  0xfa   :  { %v2455_v21 = vadd.f32 %v2454_v20, %v2453_v17  ;;  %v2518_v22 = vpop.f32.mrb[3].mxu1 }
  0xfb   :  { %v3754_v23 = vadd.f32 %v2516_v18, %v2452_v15  ;;  %v2519_v24 = vadd.f32 %v2518_v22, %v2517_v19 }
  0xfd   :  { %v3756_v25 = vadd.f32 %v2519_v24, %v2455_v21 }
  0xfe   :  { %v2456_v26 = vpop.f32.mrb[4].mxu0 }
  0xff   :  { %v2520_v27 = vpop.f32.mrb[4].mxu1  ;;  %v2457_v28 = vpop.f32.mrb[5].mxu0 }
 0x100   :  { %v2458_v29 = vadd.f32 %v2457_v28, %v2456_v26  ;;  %v2521_v30 = vpop.f32.mrb[5].mxu1  ;;  %v2459_v31 = vpop.f32.mrb[6].mxu0 }
 0x101   :  { %v2522_v32 = vadd.f32 %v2521_v30, %v2520_v27  ;;  %v2523_v33 = vpop.f32.mrb[6].mxu1  ;;  %v2460_v34 = vpop.f32.mrb[7].mxu0 }
 0x102   :  { %v2461_v35 = vadd.f32 %v2460_v34, %v2459_v31  ;;  %v2524_v36 = vpop.f32.mrb[7].mxu1 }
 0x103   :  { %v3758_v37 = vadd.f32 %v2522_v32, %v2458_v29  ;;  %v2525_v38 = vadd.f32 %v2524_v36, %v2523_v33 }
 0x105   :  { %v3760_v39 = vadd.f32 %v2525_v38, %v2461_v35 }
 0x106   :  { %v2462_v40 = vpop.f32.mrb[8].mxu0 }
 0x107   :  { %v2526_v41 = vpop.f32.mrb[8].mxu1  ;;  %v2463_v42 = vpop.f32.mrb[9].mxu0 }
 0x108   :  { %v2464_v43 = vadd.f32 %v2463_v42, %v2462_v40  ;;  %v2527_v44 = vpop.f32.mrb[9].mxu1  ;;  %v2465_v45 = vpop.f32.mrb[10].mxu0 }
 0x109   :  { %v2528_v46 = vadd.f32 %v2527_v44, %v2526_v41  ;;  %v2529_v47 = vpop.f32.mrb[10].mxu1  ;;  %v2466_v48 = vpop.f32.mrb[11].mxu0 }
 0x10a   :  { %v2467_v49 = vadd.f32 %v2466_v48, %v2465_v45  ;;  %v2530_v50 = vpop.f32.mrb[11].mxu1 }
 0x10b   :  { %v3762_v51 = vadd.f32 %v2528_v46, %v2464_v43  ;;  %v2531_v52 = vadd.f32 %v2530_v50, %v2529_v47 }
 0x10d   :  { %v3764_v53 = vadd.f32 %v2531_v52, %v2467_v49 }
 0x10e   :  { %v2468_v54 = vpop.f32.mrb[12].mxu0 }
 0x10f   :  { %v2532_v55 = vpop.f32.mrb[12].mxu1  ;;  %v2469_v56 = vpop.f32.mrb[13].mxu0 }
 0x110   :  { %v2470_v57 = vadd.f32 %v2469_v56, %v2468_v54  ;;  %v2533_v58 = vpop.f32.mrb[13].mxu1  ;;  %v2471_v59 = vpop.f32.mrb[14].mxu0 }
 0x111   :  { %v2534_v60 = vadd.f32 %v2533_v58, %v2532_v55  ;;  %v2535_v61 = vpop.f32.mrb[14].mxu1  ;;  %v2472_v62 = vpop.f32.mrb[15].mxu0 }
 0x112   :  { %v2473_v63 = vadd.f32 %v2472_v62, %v2471_v59  ;;  %v2536_v0 = vpop.f32.mrb[15].mxu1 }
 0x113   :  { %v3766_v1 = vadd.f32 %v2534_v60, %v2470_v57  ;;  %v2537_v2 = vadd.f32 %v2536_v0, %v2535_v61 }
 0x115   :  { %v3768_v3 = vadd.f32 %v2537_v2, %v2473_v63 }
 0x116   :  { %v2474_v4 = vpop.f32.mrb[16].mxu0 }
 0x117   :  { %v2538_v5 = vpop.f32.mrb[16].mxu1  ;;  %v2475_v6 = vpop.f32.mrb[17].mxu0 }
 0x118   :  { %v2476_v7 = vadd.f32 %v2475_v6, %v2474_v4  ;;  %v2539_v8 = vpop.f32.mrb[17].mxu1  ;;  %v2477_v9 = vpop.f32.mrb[18].mxu0 }
 0x119   :  { %v2540_v10 = vadd.f32 %v2539_v8, %v2538_v5  ;;  %v2541_v11 = vpop.f32.mrb[18].mxu1  ;;  %v2478_v12 = vpop.f32.mrb[19].mxu0 }
 0x11a   :  { %v2479_v13 = vadd.f32 %v2478_v12, %v2477_v9  ;;  %v2542_v14 = vpop.f32.mrb[19].mxu1 }
 0x11b   :  { %v3770_v15 = vadd.f32 %v2540_v10, %v2476_v7  ;;  %v2543_v16 = vadd.f32 %v2542_v14, %v2541_v11 }
 0x11d   :  { %v3772_v17 = vadd.f32 %v2543_v16, %v2479_v13 }
 0x11e   :  { %v2480_v18 = vpop.f32.mrb[20].mxu0 }
 0x11f   :  { %v2544_v19 = vpop.f32.mrb[20].mxu1  ;;  %v2481_v20 = vpop.f32.mrb[21].mxu0 }
 0x120   :  { %v2482_v21 = vadd.f32 %v2481_v20, %v2480_v18  ;;  %v2545_v22 = vpop.f32.mrb[21].mxu1  ;;  %v2483_v24 = vpop.f32.mrb[22].mxu0 }
 0x121   :  { %v2546_v26 = vadd.f32 %v2545_v22, %v2544_v19  ;;  %v2547_v27 = vpop.f32.mrb[22].mxu1  ;;  %v2484_v28 = vpop.f32.mrb[23].mxu0 }
 0x122   :  { %v2485_v29 = vadd.f32 %v2484_v28, %v2483_v24  ;;  %v2548_v30 = vpop.f32.mrb[23].mxu1 }
 0x123   :  { %v3774_v31 = vadd.f32 %v2546_v26, %v2482_v21  ;;  %v2549_v32 = vadd.f32 %v2548_v30, %v2547_v27 }
 0x125   :  { %v3776_v33 = vadd.f32 %v2549_v32, %v2485_v29 }
 0x126   :  { %v2486_v34 = vpop.f32.mrb[24].mxu0 }
 0x127   :  { %v2550_v35 = vpop.f32.mrb[24].mxu1  ;;  %v2487_v36 = vpop.f32.mrb[25].mxu0 }
 0x128   :  { %v2488_v38 = vadd.f32 %v2487_v36, %v2486_v34  ;;  %v2551_v40 = vpop.f32.mrb[25].mxu1  ;;  %v2489_v41 = vpop.f32.mrb[26].mxu0 }
 0x129   :  { %v2552_v42 = vadd.f32 %v2551_v40, %v2550_v35  ;;  %v2553_v43 = vpop.f32.mrb[26].mxu1  ;;  %v2490_v44 = vpop.f32.mrb[27].mxu0 }
 0x12a   :  { %v2491_v45 = vadd.f32 %v2490_v44, %v2489_v41  ;;  %v2554_v46 = vpop.f32.mrb[27].mxu1 }
 0x12b   :  { %v3778_v47 = vadd.f32 %v2552_v42, %v2488_v38  ;;  %v2555_v48 = vadd.f32 %v2554_v46, %v2553_v43 }
 0x12d   :  { %v3780_v49 = vadd.f32 %v2555_v48, %v2491_v45 }
 0x12e   :  { %v2492_v50 = vpop.f32.mrb[28].mxu0 }
 0x12f   :  { %v2556_v52 = vpop.f32.mrb[28].mxu1  ;;  %v2493_v54 = vpop.f32.mrb[29].mxu0 }
 0x130   :  { %v2494_v55 = vadd.f32 %v2493_v54, %v2492_v50  ;;  %v2557_v56 = vpop.f32.mrb[29].mxu1  ;;  %v2495_v57 = vpop.f32.mrb[30].mxu0 }
 0x131   :  { %v2558_v58 = vadd.f32 %v2557_v56, %v2556_v52  ;;  %v2559_v59 = vpop.f32.mrb[30].mxu1  ;;  %v2496_v60 = vpop.f32.mrb[31].mxu0 }
 0x132   :  { %v2497_v61 = vadd.f32 %v2496_v60, %v2495_v57  ;;  %v2560_v62 = vpop.f32.mrb[31].mxu1 }
 0x133   :  { %v3782_v63 = vadd.f32 %v2558_v58, %v2494_v55  ;;  %v2561_v0 = vadd.f32 %v2560_v62, %v2559_v59 }
 0x135   :  { %v3784_v2 = vadd.f32 %v2561_v0, %v2497_v61 }
 0x136   :  { %v2578_v4 = vpop.f32.mrb[32].mxu0 }
 0x137   :  { %v2579_v5 = vpop.f32.mrb[33].mxu0  ;;  %v2642_v6 = vpop.f32.mrb[32].mxu1 }
 0x138   :  { %v2580_v7 = vadd.f32 %v2579_v5, %v2578_v4  ;;  %v2581_v8 = vpop.f32.mrb[34].mxu0  ;;  %v2643_v9 = vpop.f32.mrb[33].mxu1 }
 0x139   :  { %v2582_v10 = vpop.f32.mrb[35].mxu0  ;;  %v2644_v11 = vadd.f32 %v2643_v9, %v2642_v6  ;;  %v2645_v12 = vpop.f32.mrb[34].mxu1 }
 0x13a   :  { %v1701_v13 = vadd.f32 %v2580_v7, %v3754_v23  ;;  %v2583_v14 = vadd.f32 %v2582_v10, %v2581_v8  ;;  %v2646_v16 = vpop.f32.mrb[35].mxu1 }
 0x13b   :  { %v2647_v18 = vadd.f32 %v2646_v16, %v2645_v12 }
 0x13c   :  { %v1704_v19 = vadd.f32 %v2583_v14, %v3756_v25  ;;  %v3788_v20 = vadd.f32 %v2644_v11, %v1701_v13 }
 0x13e   :  { %v3790_v21 = vadd.f32 %v2647_v18, %v1704_v19  ;;  %v2584_v22 = vpop.f32.mrb[36].mxu0 }
 0x13f   :  { %v2585_v24 = vpop.f32.mrb[37].mxu0  ;;  %v2648_v26 = vpop.f32.mrb[36].mxu1 }
 0x140   :  { %v2586_v27 = vadd.f32 %v2585_v24, %v2584_v22  ;;  %v2587_v28 = vpop.f32.mrb[38].mxu0  ;;  %v2649_v29 = vpop.f32.mrb[37].mxu1 }
 0x141   :  { %v2588_v30 = vpop.f32.mrb[39].mxu0  ;;  %v2650_v32 = vadd.f32 %v2649_v29, %v2648_v26  ;;  %v2651_v34 = vpop.f32.mrb[38].mxu1 }
 0x142   :  { %v1709_v23 = vadd.f32 %v2586_v27, %v3758_v37  ;;  %v2589_v35 = vadd.f32 %v2588_v30, %v2587_v28  ;;  %v2652_v36 = vpop.f32.mrb[39].mxu1 }
 0x143   :  { %v2653_v38 = vadd.f32 %v2652_v36, %v2651_v34 }
 0x144   :  { %v1712_v25 = vadd.f32 %v2589_v35, %v3760_v39  ;;  %v3794_v40 = vadd.f32 %v2650_v32, %v1709_v23 }
 0x146   :  { %v3796_v41 = vadd.f32 %v2653_v38, %v1712_v25  ;;  %v2590_v42 = vpop.f32.mrb[40].mxu0 }
 0x147   :  { %v2591_v43 = vpop.f32.mrb[41].mxu0  ;;  %v2654_v44 = vpop.f32.mrb[40].mxu1 }
 0x148   :  { %v2592_v45 = vadd.f32 %v2591_v43, %v2590_v42  ;;  %v2593_v46 = vpop.f32.mrb[42].mxu0  ;;  %v2655_v48 = vpop.f32.mrb[41].mxu1 }
 0x149   :  { %v2594_v50 = vpop.f32.mrb[43].mxu0  ;;  %v2656_v52 = vadd.f32 %v2655_v48, %v2654_v44  ;;  %v2657_v54 = vpop.f32.mrb[42].mxu1 }
 0x14a   :  { %v1717_v37 = vadd.f32 %v2592_v45, %v3762_v51  ;;  %v2595_v55 = vadd.f32 %v2594_v50, %v2593_v46  ;;  %v2658_v56 = vpop.f32.mrb[43].mxu1 }
 0x14b   :  { %v2659_v57 = vadd.f32 %v2658_v56, %v2657_v54 }
 0x14c   :  { %v1720_v39 = vadd.f32 %v2595_v55, %v3764_v53  ;;  %v3800_v58 = vadd.f32 %v2656_v52, %v1717_v37 }
 0x14e   :  { %v3802_v59 = vadd.f32 %v2659_v57, %v1720_v39  ;;  %v2596_v60 = vpop.f32.mrb[44].mxu0 }
 0x14f   :  { %v2597_v61 = vpop.f32.mrb[45].mxu0  ;;  %v2660_v62 = vpop.f32.mrb[44].mxu1 }
 0x150   :  { %v2598_v0 = vadd.f32 %v2597_v61, %v2596_v60  ;;  %v2599_v4 = vpop.f32.mrb[46].mxu0  ;;  %v2661_v5 = vpop.f32.mrb[45].mxu1 }
 0x151   :  { %v2600_v6 = vpop.f32.mrb[47].mxu0  ;;  %v2662_v7 = vadd.f32 %v2661_v5, %v2660_v62  ;;  %v2663_v8 = vpop.f32.mrb[46].mxu1 }
 0x152   :  { %v1725_v51 = vadd.f32 %v2598_v0, %v3766_v1  ;;  %v2601_v9 = vadd.f32 %v2600_v6, %v2599_v4  ;;  %v2664_v10 = vpop.f32.mrb[47].mxu1 }
 0x153   :  { %v2665_v11 = vadd.f32 %v2664_v10, %v2663_v8 }
 0x154   :  { %v1728_v53 = vadd.f32 %v2601_v9, %v3768_v3  ;;  %v3806_v12 = vadd.f32 %v2662_v7, %v1725_v51 }
 0x156   :  { %v3808_v13 = vadd.f32 %v2665_v11, %v1728_v53  ;;  %v2602_v14 = vpop.f32.mrb[48].mxu0 }
 0x157   :  { %v2603_v16 = vpop.f32.mrb[49].mxu0  ;;  %v2666_v18 = vpop.f32.mrb[48].mxu1 }
 0x158   :  { %v2604_v19 = vadd.f32 %v2603_v16, %v2602_v14  ;;  %v2605_v22 = vpop.f32.mrb[50].mxu0  ;;  %v2667_v24 = vpop.f32.mrb[49].mxu1 }
 0x159   :  { %v2606_v26 = vpop.f32.mrb[51].mxu0  ;;  %v2668_v27 = vadd.f32 %v2667_v24, %v2666_v18  ;;  %v2669_v28 = vpop.f32.mrb[50].mxu1 }
 0x15a   :  { %v1733_v1 = vadd.f32 %v2604_v19, %v3770_v15  ;;  %v2607_v29 = vadd.f32 %v2606_v26, %v2605_v22  ;;  %v2670_v30 = vpop.f32.mrb[51].mxu1 }
 0x15b   :  { %v2671_v32 = vadd.f32 %v2670_v30, %v2669_v28 }
 0x15c   :  { %v1736_v3 = vadd.f32 %v2607_v29, %v3772_v17  ;;  %v3812_v34 = vadd.f32 %v2668_v27, %v1733_v1 }
 0x15e   :  { %v3814_v23 = vadd.f32 %v2671_v32, %v1736_v3  ;;  %v2608_v35 = vpop.f32.mrb[52].mxu0 }
 0x15f   :  { %v2609_v36 = vpop.f32.mrb[53].mxu0  ;;  %v2672_v38 = vpop.f32.mrb[52].mxu1 }
 0x160   :  { %v2610_v25 = vadd.f32 %v2609_v36, %v2608_v35  ;;  %v2611_v42 = vpop.f32.mrb[54].mxu0  ;;  %v2673_v43 = vpop.f32.mrb[53].mxu1 }
 0x161   :  { %v2612_v44 = vpop.f32.mrb[55].mxu0  ;;  %v2674_v45 = vadd.f32 %v2673_v43, %v2672_v38  ;;  %v2675_v46 = vpop.f32.mrb[54].mxu1 }
 0x162   :  { %v1741_v15 = vadd.f32 %v2610_v25, %v3774_v31  ;;  %v2613_v48 = vadd.f32 %v2612_v44, %v2611_v42  ;;  %v2676_v50 = vpop.f32.mrb[55].mxu1 }
 0x163   :  { %v2677_v52 = vadd.f32 %v2676_v50, %v2675_v46 }
 0x164   :  { %v1744_v17 = vadd.f32 %v2613_v48, %v3776_v33  ;;  %v3818_v54 = vadd.f32 %v2674_v45, %v1741_v15 }
 0x166   :  { %v3820_v37 = vadd.f32 %v2677_v52, %v1744_v17  ;;  %v2614_v55 = vpop.f32.mrb[56].mxu0 }
 0x167   :  { %v2615_v56 = vpop.f32.mrb[57].mxu0  ;;  %v2678_v57 = vpop.f32.mrb[56].mxu1 }
 0x168   :  { %v2616_v39 = vadd.f32 %v2615_v56, %v2614_v55  ;;  %v2617_v60 = vpop.f32.mrb[58].mxu0  ;;  %v2679_v61 = vpop.f32.mrb[57].mxu1 }
 0x169   :  { %v2618_v62 = vpop.f32.mrb[59].mxu0  ;;  %v2680_v0 = vadd.f32 %v2679_v61, %v2678_v57  ;;  %v2681_v4 = vpop.f32.mrb[58].mxu1 }
 0x16a   :  { %v1749_v31 = vadd.f32 %v2616_v39, %v3778_v47  ;;  %v2619_v5 = vadd.f32 %v2618_v62, %v2617_v60  ;;  %v2682_v6 = vpop.f32.mrb[59].mxu1 }
 0x16b   :  { %v2683_v7 = vadd.f32 %v2682_v6, %v2681_v4 }
 0x16c   :  { %v1752_v33 = vadd.f32 %v2619_v5, %v3780_v49  ;;  %v3824_v8 = vadd.f32 %v2680_v0, %v1749_v31 }
 0x16e   :  { %v3826_v51 = vadd.f32 %v2683_v7, %v1752_v33  ;;  %v2620_v9 = vpop.f32.mrb[60].mxu0 }
 0x16f   :  { %v2621_v10 = vpop.f32.mrb[61].mxu0  ;;  %v2684_v11 = vpop.f32.mrb[60].mxu1 }
 0x170   :  { %v2622_v53 = vadd.f32 %v2621_v10, %v2620_v9  ;;  %v2623_v14 = vpop.f32.mrb[62].mxu0  ;;  %v2685_v16 = vpop.f32.mrb[61].mxu1 }
 0x171   :  { %v2624_v18 = vpop.f32.mrb[63].mxu0  ;;  %v2686_v19 = vadd.f32 %v2685_v16, %v2684_v11  ;;  %v2687_v22 = vpop.f32.mrb[62].mxu1 }
 0x172   :  { %v1757_v47 = vadd.f32 %v2622_v53, %v3782_v63  ;;  %v2625_v24 = vadd.f32 %v2624_v18, %v2623_v14  ;;  %v2688_v26 = vpop.f32.mrb[63].mxu1 }
 0x173   :  { %v2689_v27 = vadd.f32 %v2688_v26, %v2687_v22 }
 0x174   :  { %v1760_v49 = vadd.f32 %v2625_v24, %v3784_v2  ;;  %v3830_v28 = vadd.f32 %v2686_v19, %v1757_v47 }
 0x176   :  { %v3832_v1 = vadd.f32 %v2689_v27, %v1760_v49  ;;  %v2706_v29 = vpop.f32.mrb[64].mxu0 }
 0x177   :  { %v2707_v30 = vpop.f32.mrb[65].mxu0  ;;  %v2770_v32 = vpop.f32.mrb[64].mxu1 }
 0x178   :  { %v2708_v3 = vadd.f32 %v2707_v30, %v2706_v29  ;;  %v2709_v35 = vpop.f32.mrb[66].mxu0  ;;  %v2771_v36 = vpop.f32.mrb[65].mxu1 }
 0x179   :  { %v2710_v38 = vpop.f32.mrb[67].mxu0  ;;  %v2772_v25 = vadd.f32 %v2771_v36, %v2770_v32  ;;  %v2773_v42 = vpop.f32.mrb[66].mxu1 }
 0x17a   :  { %v1895_v63 = vadd.f32 %v2708_v3, %v3788_v20  ;;  %v2711_v43 = vadd.f32 %v2710_v38, %v2709_v35  ;;  %v2774_v44 = vpop.f32.mrb[67].mxu1 }
 0x17b   :  { %v2775_v45 = vadd.f32 %v2774_v44, %v2773_v42 }
 0x17c   :  { %v1898_v2 = vadd.f32 %v2711_v43, %v3790_v21  ;;  %v3836_v46 = vadd.f32 %v2772_v25, %v1895_v63 }
 0x17e   :  { %v2712_v15 = vpop.f32.mrb[68].mxu0  ;;  %v3838_v48 = vadd.f32 %v2775_v45, %v1898_v2 }
 0x17f   :  { %v2713_v50 = vpop.f32.mrb[69].mxu0  ;;  %v2776_v52 = vpop.f32.mrb[68].mxu1 }
 0x180   :  { %v2714_v17 = vadd.f32 %v2713_v50, %v2712_v15  ;;  %v2715_v55 = vpop.f32.mrb[70].mxu0  ;;  %v2777_v56 = vpop.f32.mrb[69].mxu1 }
 0x181   :  { %v2716_v57 = vpop.f32.mrb[71].mxu0  ;;  %v2778_v39 = vadd.f32 %v2777_v56, %v2776_v52  ;;  %v2779_v60 = vpop.f32.mrb[70].mxu1 }
 0x182   :  { %v1903_v20 = vadd.f32 %v2714_v17, %v3794_v40  ;;  %v2717_v61 = vadd.f32 %v2716_v57, %v2715_v55  ;;  %v2780_v62 = vpop.f32.mrb[71].mxu1 }
 0x183   :  { %v2781_v0 = vadd.f32 %v2780_v62, %v2779_v60 }
 0x184   :  { %v1906_v21 = vadd.f32 %v2717_v61, %v3796_v41  ;;  %v3842_v4 = vadd.f32 %v2778_v39, %v1903_v20 }
 0x186   :  { %v2718_v31 = vpop.f32.mrb[72].mxu0  ;;  %v3844_v5 = vadd.f32 %v2781_v0, %v1906_v21 }
 0x187   :  { %v2719_v6 = vpop.f32.mrb[73].mxu0  ;;  %v2782_v7 = vpop.f32.mrb[72].mxu1 }
 0x188   :  { %v2720_v33 = vadd.f32 %v2719_v6, %v2718_v31  ;;  %v2721_v9 = vpop.f32.mrb[74].mxu0  ;;  %v2783_v10 = vpop.f32.mrb[73].mxu1 }
 0x189   :  { %v2722_v11 = vpop.f32.mrb[75].mxu0  ;;  %v2784_v53 = vadd.f32 %v2783_v10, %v2782_v7  ;;  %v2785_v14 = vpop.f32.mrb[74].mxu1 }
 0x18a   :  { %v1911_v40 = vadd.f32 %v2720_v33, %v3800_v58  ;;  %v2723_v16 = vadd.f32 %v2722_v11, %v2721_v9  ;;  %v2786_v18 = vpop.f32.mrb[75].mxu1 }
 0x18b   :  { %v2787_v19 = vadd.f32 %v2786_v18, %v2785_v14 }
 0x18c   :  { %v1914_v41 = vadd.f32 %v2723_v16, %v3802_v59  ;;  %v3848_v22 = vadd.f32 %v2784_v53, %v1911_v40 }
 0x18e   :  { %v2724_v47 = vpop.f32.mrb[76].mxu0  ;;  %v3850_v24 = vadd.f32 %v2787_v19, %v1914_v41 }
 0x18f   :  { %v2725_v26 = vpop.f32.mrb[77].mxu0  ;;  %v2788_v27 = vpop.f32.mrb[76].mxu1 }
 0x190   :  { %v2726_v49 = vadd.f32 %v2725_v26, %v2724_v47  ;;  %v2727_v29 = vpop.f32.mrb[78].mxu0  ;;  %v2789_v30 = vpop.f32.mrb[77].mxu1 }
 0x191   :  { %v2728_v32 = vpop.f32.mrb[79].mxu0  ;;  %v2790_v3 = vadd.f32 %v2789_v30, %v2788_v27  ;;  %v2791_v35 = vpop.f32.mrb[78].mxu1 }
 0x192   :  { %v1919_v58 = vadd.f32 %v2726_v49, %v3806_v12  ;;  %v2729_v36 = vadd.f32 %v2728_v32, %v2727_v29  ;;  %v2792_v38 = vpop.f32.mrb[79].mxu1 }
 0x193   :  { %v2793_v25 = vadd.f32 %v2792_v38, %v2791_v35 }
 0x194   :  { %v1922_v59 = vadd.f32 %v2729_v36, %v3808_v13  ;;  %v3854_v42 = vadd.f32 %v2790_v3, %v1919_v58 }
 0x196   :  { %v2730_v63 = vpop.f32.mrb[80].mxu0  ;;  %v3856_v43 = vadd.f32 %v2793_v25, %v1922_v59 }
 0x197   :  { %v2731_v44 = vpop.f32.mrb[81].mxu0  ;;  %v2794_v45 = vpop.f32.mrb[80].mxu1 }
 0x198   :  { %v2732_v2 = vadd.f32 %v2731_v44, %v2730_v63  ;;  %v2733_v15 = vpop.f32.mrb[82].mxu0  ;;  %v2795_v50 = vpop.f32.mrb[81].mxu1 }
 0x199   :  { %v2734_v52 = vpop.f32.mrb[83].mxu0  ;;  %v2796_v17 = vadd.f32 %v2795_v50, %v2794_v45  ;;  %v2797_v55 = vpop.f32.mrb[82].mxu1 }
 0x19a   :  { %v1927_v12 = vadd.f32 %v2732_v2, %v3812_v34  ;;  %v2735_v56 = vadd.f32 %v2734_v52, %v2733_v15  ;;  %v2798_v57 = vpop.f32.mrb[83].mxu1 }
 0x19b   :  { %v2799_v39 = vadd.f32 %v2798_v57, %v2797_v55 }
 0x19c   :  { %v1930_v13 = vadd.f32 %v2735_v56, %v3814_v23  ;;  %v2024_v60 = vadd.f32 %v2796_v17, %v1927_v12 }
 0x19e   :  { %v2736_v20 = vpop.f32.mrb[84].mxu0  ;;  %v3860_v61 = vadd.f32 %v2799_v39, %v1930_v13 }
 0x19f   :  { %v2737_v62 = vpop.f32.mrb[85].mxu0  ;;  %v2800_v0 = vpop.f32.mrb[84].mxu1 }
 0x1a0   :  { %v2738_v21 = vadd.f32 %v2737_v62, %v2736_v20  ;;  %v2739_v31 = vpop.f32.mrb[86].mxu0  ;;  %v2801_v6 = vpop.f32.mrb[85].mxu1 }
 0x1a1   :  { %v2740_v7 = vpop.f32.mrb[87].mxu0  ;;  %v2802_v33 = vadd.f32 %v2801_v6, %v2800_v0  ;;  %v2803_v9 = vpop.f32.mrb[86].mxu1 }
 0x1a2   :  { %v1935_v10 = vadd.f32 %v2738_v21, %v3818_v54  ;;  %v2741_v34 = vadd.f32 %v2740_v7, %v2739_v31  ;;  %v2804_v11 = vpop.f32.mrb[87].mxu1 }
 0x1a3   :  { %v2805_v53 = vadd.f32 %v2804_v11, %v2803_v9 }
 0x1a4   :  { %v1938_v14 = vadd.f32 %v2741_v34, %v3820_v37  ;;  %v2032_v23 = vadd.f32 %v2802_v33, %v1935_v10 }
 0x1a6   :  { %v2742_v40 = vpop.f32.mrb[88].mxu0  ;;  %v2035_v16 = vadd.f32 %v2805_v53, %v1938_v14 }
 0x1a7   :  { %v2743_v18 = vpop.f32.mrb[89].mxu0  ;;  %v2806_v19 = vpop.f32.mrb[88].mxu1 }
 0x1a8   :  { %v2744_v41 = vadd.f32 %v2743_v18, %v2742_v40  ;;  %v2745_v47 = vpop.f32.mrb[90].mxu0  ;;  %v2807_v26 = vpop.f32.mrb[89].mxu1 }
 0x1a9   :  { %v2746_v27 = vpop.f32.mrb[91].mxu0  ;;  %v2808_v49 = vadd.f32 %v2807_v26, %v2806_v19  ;;  %v2809_v29 = vpop.f32.mrb[90].mxu1 }
 0x1aa   :  { %v1943_v30 = vadd.f32 %v2744_v41, %v3824_v8  ;;  %v2747_v32 = vadd.f32 %v2746_v27, %v2745_v47  ;;  %v2810_v54 = vpop.f32.mrb[91].mxu1 }
 0x1ab   :  { %v2811_v3 = vadd.f32 %v2810_v54, %v2809_v29 }
 0x1ac   :  { %v1946_v35 = vadd.f32 %v2747_v32, %v3826_v51  ;;  %v2040_v58 = vadd.f32 %v2808_v49, %v1943_v30 }
 0x1ae   :  { %v2748_v37 = vpop.f32.mrb[92].mxu0  ;;  %v2043_v36 = vadd.f32 %v2811_v3, %v1946_v35 }
 0x1af   :  { %v2749_v38 = vpop.f32.mrb[93].mxu0  ;;  %v2812_v25 = vpop.f32.mrb[92].mxu1 }
 0x1b0   :  { %v2750_v59 = vadd.f32 %v2749_v38, %v2748_v37  ;;  %v2751_v63 = vpop.f32.mrb[94].mxu0  ;;  %v2813_v44 = vpop.f32.mrb[93].mxu1 }
 0x1b1   :  { %v2752_v45 = vpop.f32.mrb[95].mxu0  ;;  %v2814_v2 = vadd.f32 %v2813_v44, %v2812_v25  ;;  %v2815_v15 = vpop.f32.mrb[94].mxu1 }
 0x1b2   :  { %v1951_v50 = vadd.f32 %v2750_v59, %v3830_v28  ;;  %v2753_v52 = vadd.f32 %v2752_v45, %v2751_v63  ;;  %v2816_v8 = vpop.f32.mrb[95].mxu1 }
 0x1b3   :  { %v2817_v17 = vadd.f32 %v2816_v8, %v2815_v15 }
 0x1b4   :  { %v1954_v55 = vadd.f32 %v2753_v52, %v3832_v1  ;;  %v2048_v12 = vadd.f32 %v2814_v2, %v1951_v50 }
 0x1b6   :  { %v2840_v51 = vpop.f32.mrb[96].mxu0  ;;  %v2051_v56 = vadd.f32 %v2817_v17, %v1954_v55 }
 0x1b7   :  { %v2097_v57 = vadd.f32 %v2840_v51, %v3842_v4  ;;  %v2848_v39 = vpop.f32.mrb[96].mxu1  ;;  %v2088_v13 = vpop.f32.mrb[97].mxu0 }
 0x1b8   :  { %v2129_v20 = vadd.f32 %v2848_v39, %v2032_v23  ;;  %v2089_v62 = vadd.f32 %v2088_v13, %v3836_v46  ;;  %v2120_v0 = vpop.f32.mrb[97].mxu1  ;;  %v2841_v21 = vpop.f32.mrb[98].mxu0 }
 0x1b9   :  { %v2121_v31 = vadd.f32 %v2120_v0, %v2024_v60  ;;  %v2100_v28 = vadd.f32 %v2841_v21, %v3844_v5  ;;  %v2849_v6 = vpop.f32.mrb[98].mxu1  ;;  %v2091_v7 = vpop.f32.mrb[99].mxu0 }
 0x1ba   :  { %v2132_v33 = vadd.f32 %v2849_v6, %v2035_v16  ;;  %v2092_v1 = vadd.f32 %v2091_v7, %v3838_v48  ;;  %v2123_v9 = vpop.f32.mrb[99].mxu1 }
 0x1bb   :  { %v2124_v10 = vadd.f32 %v2123_v9, %v3860_v61 }
 0x1be   :  { %v2844_v34 = vpop.f32.mrb[100].mxu0 }
 0x1bf   :  { %v2113_v4 = vadd.f32 %v2844_v34, %v3854_v42  ;;  %v2852_v11 = vpop.f32.mrb[100].mxu1  ;;  %v2104_v53 = vpop.f32.mrb[101].mxu0 }
 0x1c0   :  { %v2145_v14 = vadd.f32 %v2852_v11, %v2048_v12  ;;  %v2105_v46 = vadd.f32 %v2104_v53, %v3848_v22  ;;  %v2136_v23 = vpop.f32.mrb[101].mxu1  ;;  %v2845_v60 = vpop.f32.mrb[102].mxu0  ;;  %v2414_v22 = vld [vmem:[%s3888_s2] ss:$0 sm:$0xff] }
 0x1c1   :  { %v2157_v40 = vmax.f32 %v2097_v57, %v2113_v4  ;;  %v2137_v5 = vadd.f32 %v2136_v23, %v2040_v58  ;;  %v2116_v18 = vadd.f32 %v2845_v60, %v3856_v43  ;;  %v2853_v16 = vpop.f32.mrb[102].mxu1  ;;  %v2107_v19 = vpop.f32.mrb[103].mxu0 }
 0x1c2   :  { %v2151_v48 = vmax.f32 %v2089_v62, %v2105_v46  ;;  %v2148_v41 = vadd.f32 %v2853_v16, %v2051_v56  ;;  %v2108_v61 = vadd.f32 %v2107_v19, %v3850_v24  ;;  %v2139_v47 = vpop.f32.mrb[103].mxu1 }
 0x1c3   :  { %v2158_v26 = vmax.f32 %v2157_v40, %v2129_v20  ;;  %v2160_v42 = vmax.f32 %v2100_v28, %v2116_v18  ;;  %v2140_v27 = vadd.f32 %v2139_v47, %v2043_v36 }
 0x1c4   :  { %v2152_v49 = vmax.f32 %v2151_v48, %v2121_v31  ;;  %v2154_v29 = vmax.f32 %v2092_v1, %v2108_v61 }
 0x1c5   :  { %v2159_v30 = vmax.f32 %v2158_v26, %v2145_v14  ;;  %v2161_v32 = vmax.f32 %v2160_v42, %v2132_v33 }
 0x1c6   :  { %v2153_v54 = vmax.f32 %v2152_v49, %v2137_v5  ;;  %v2155_v43 = vmax.f32 %v2154_v29, %v2124_v10 }
 0x1c7   :  { %v2172_v3 = vadd.f32 %v2414_v22, %v2159_v30  ;;  %v2162_v35 = vmax.f32 %v2161_v32, %v2148_v41 }
 0x1c8   :  { %v2170_v58 = vadd.f32 %v2414_v22, %v2153_v54  ;;  %v2156_v37 = vmax.f32 %v2155_v43, %v2140_v27 }
 0x1c9   :  { %v2173_v38 = vadd.f32 %v2414_v22, %v2162_v35  ;;  %v2176_v25 = vmax.f32 %v2172_v3, 0.0 }
 0x1ca   :  { %v2171_v24 = vadd.f32 %v2414_v22, %v2156_v37  ;;  %v2174_v63 = vmax.f32 %v2170_v58, 0.0 }
 0x1cb   :  { %v2177_v59 = vmax.f32 %v2173_v38, 0.0 }
 0x1cc   :  { %v2175_v36 = vmax.f32 %v2171_v24, 0.0 }
 0x1cd   :  { %v2431_v44 = vpack.c.bf16 %v2177_v59, %v2176_v25 }
 0x1ce   :  { %v2426_v45 = vpack.c.bf16 %v2175_v36, %v2174_v63 }
 0x1cf   :  { %2433 = vst [vmem:[%s3889_s3 + $0x8] sm:$0xff] %v2431_v44  }
 0x1d0   :  { %2427 = vst [vmem:[%s3889_s3] sm:$0xff] %v2426_v45  }

// kernel: dann_cnn_forward.5
= control target key start
LH: loop header
LB: loop body
LE: loop exit
PB: predicated region body
PF: predicated region fallthrough
CT: control target
= control target key end

     0   :  { %17 = vsyncpa [#allocation3], 0  ;;  %v118_v30 = vlaneseq  ;;  %v2720_v33 = vmov 1966171168   ;;  %v2721_v36 = vmov 0.0   ;;  %vm2722_vm0 = vmmov 0   ;;  %s3564_s0 = inlined_call_operand.vmem [shape: bf16[4,2,576], index: 0, kind: input, shape index: {}]   ;;  %s3565_s1 = inlined_call_operand.vmem [shape: bf16[576,128], index: 1, kind: input, shape index: {}]   ;;  %s3566_s2 = inlined_call_operand.vmem [shape: bf16[4,128,256], index: 2, kind: input, shape index: {}]   ;;  %s3567_s3 = inlined_call_operand.vmem [shape: f32[1,256], index: 3, kind: input, shape index: {}]   ;;  %s3568_s4 = inlined_call_operand.vmem [shape: bf16[128,128], index: 4, kind: input, shape index: {}]   ;;  %s3569_s5 = inlined_call_operand.vmem [shape: f32[1,128], index: 5, kind: input, shape index: {}]   ;;  %s3570_s6 = inlined_call_operand.vmem [shape: bf16[128,10], index: 6, kind: input, shape index: {}]   ;;  %s3571_s7 = inlined_call_operand.vmem [shape: f32[1,10], index: 7, kind: input, shape index: {}]   ;;  %s3572_s8 = inlined_call_operand.vmem [shape: bf16[128,2], index: 8, kind: input, shape index: {}]   ;;  %s3573_s9 = inlined_call_operand.vmem [shape: f32[1,2], index: 9, kind: input, shape index: {}]   ;;  %s3574_s10 = inlined_call_operand.hbm [shape: f32[2,10], index: 10, kind: output, shape index: {0}]   ;;  %s3575_s11 = inlined_call_operand.hbm [shape: f32[2,2], index: 11, kind: output, shape index: {1}]  }
   0x1   :  { %v2789_v0 = vld [vmem:[%s3565_s1 + $0x40] sm:$0xff]   ;;  %v2812_v4 = vld [vmem:[%s3565_s1 + $0x48] sm:$0xff]   ;;  %v2836_v8 = vld [vmem:[%s3565_s1 + $0x50] sm:$0xff]   ;;  %v116_v34 = vunpack.c.l.s4 %v2720_v33  ;;  %vm373_vm1 = vcmask 523264  }
   0x2   :  { %v2794_v1 = vld [vmem:[%s3565_s1 + $0xc0] sm:$0xff]   ;;  %2154 = vmatprep.subr.bf16.mxu0 %v2789_v0  ;;  %v2818_v5 = vld [vmem:[%s3565_s1 + $0xc8] sm:$0xff]   ;;  %v2842_v9 = vld [vmem:[%s3565_s1 + $0xd0] sm:$0xff]   ;;  %v2978_v35 = vshrl.u32 %v118_v30, 7 }
   0x3   :  { %v2800_v2 = vld [vmem:[%s3565_s1] sm:$0xff]   ;;  %2176 = vmatprep.subr.bf16.mxu1 %v2794_v1  ;;  %v2824_v6 = vld [vmem:[%s3565_s1 + $0x8] sm:$0xff]   ;;  %v2848_v10 = vld [vmem:[%s3565_s1 + $0x10] sm:$0xff]   ;;  %v117_v37 = vunpack.c.0.s8 %v116_v34 }
   0x4   :  { %v2806_v3 = vld [vmem:[%s3565_s1 + $0x80] sm:$0xff]   ;;  %2155 = vmatpush3.bf16.msra.mxu0 %v2800_v2  ;;  %v2830_v7 = vld [vmem:[%s3565_s1 + $0x88] sm:$0xff]   ;;  %v2854_v11 = vld [vmem:[%s3565_s1 + $0x90] sm:$0xff]  }
   0x5   :  { %2177 = vmatpush3.bf16.msra.mxu1 %v2806_v3  ;;  %2156 = vmatprep.subr.bf16.mxu0 %v2812_v4  ;;  %v2860_v12 = vld [vmem:[%s3565_s1 + $0x58] sm:$0xff]   ;;  %v2884_v16 = vld [vmem:[%s3565_s1 + $0x60] sm:$0xff]   ;;  %v2908_v20 = vld [vmem:[%s3565_s1 + $0x68] sm:$0xff]   ;;  %v2991_v40 = vsub.s32 %v117_v37, %v2978_v35 }
   0x6   :  { %2178 = vmatprep.subr.bf16.mxu1 %v2818_v5  ;;  %v2866_v13 = vld [vmem:[%s3565_s1 + $0xd8] sm:$0xff]   ;;  %v2890_v17 = vld [vmem:[%s3565_s1 + $0xe0] sm:$0xff]   ;;  %v2914_v21 = vld [vmem:[%s3565_s1 + $0xe8] sm:$0xff]  }
   0x7   :  { %v2872_v14 = vld [vmem:[%s3565_s1 + $0x18] sm:$0xff]   ;;  %v2896_v18 = vld [vmem:[%s3565_s1 + $0x20] sm:$0xff]   ;;  %v2920_v22 = vld [vmem:[%s3565_s1 + $0x28] sm:$0xff]  }
   0x8   :  { %2157 = vmatpush3.bf16.msra.mxu0 %v2824_v6  ;;  %v2878_v15 = vld [vmem:[%s3565_s1 + $0x98] sm:$0xff]   ;;  %v2902_v19 = vld [vmem:[%s3565_s1 + $0xa0] sm:$0xff]   ;;  %v2926_v23 = vld [vmem:[%s3565_s1 + $0xa8] sm:$0xff]  }
   0x9   :  { %2179 = vmatpush3.bf16.msra.mxu1 %v2830_v7  ;;  %2158 = vmatprep.subr.bf16.mxu0 %v2836_v8  ;;  %v2932_v24 = vld [vmem:[%s3565_s1 + $0x70] sm:$0xff]   ;;  %v2956_v28 = vld [vmem:[%s3565_s1 + $0x78] sm:$0xff]   ;;  %v40_v38 = vld [vmem:[%s3564_s0] sm:$0x1f] }
   0xa   :  { %2180 = vmatprep.subr.bf16.mxu1 %v2842_v9  ;;  %v2938_v25 = vld [vmem:[%s3565_s1 + $0xf0] sm:$0xff]   ;;  %v2962_v29 = vld [vmem:[%s3565_s1 + $0xf8] sm:$0xff]   ;;  %v2988_v39 = vld [vmem:[%s3564_s0 + $0x5] sm:$0x1f]  ;;  %v121_v41 = vrot.slane %v40_v38, %v2991_v40  ;;  %v114_v53 = vcombine.high %v40_v38, %v40_v38 }
   0xb   :  { %v2944_v26 = vld [vmem:[%s3565_s1 + $0x30] sm:$0xff]   ;;  %v2968_v31 = vld [vmem:[%s3565_s1 + $0x38] sm:$0xff]   ;;  %v524_v42 = vrot.slane %v2988_v39, %v2991_v40  ;;  %v3000_v45 = vld [vmem:[%s3565_s1 + $0x100] sm:$0xff]  }
   0xc   :  { %2159 = vmatpush3.bf16.msra.mxu0 %v2848_v10  ;;  %v2950_v27 = vld [vmem:[%s3565_s1 + $0xb0] sm:$0xff]   ;;  %v2974_v32 = vld [vmem:[%s3565_s1 + $0xb8] sm:$0xff]   ;;  %v129_v43 = vcombine.high %v121_v41, %v121_v41  ;;  %v136_v44 = vrot.slane %v121_v41, %v2991_v40  ;;  %v3006_v50 = vld [vmem:[%s3565_s1 + $0x108] sm:$0xff]   ;;  %v128_v55 = vrot.slane %v114_v53, %v2991_v40 }
   0xd   :  { %2181 = vmatpush3.bf16.msra.mxu1 %v2854_v11  ;;  %2160 = vmatprep.subr.bf16.mxu0 %v2860_v12  ;;  %v532_v46 = vcombine.high %v524_v42, %v524_v42  ;;  %v3015_v52 = vld [vmem:[%s3565_s1 + $0x110] sm:$0xff]   ;;  %v3026_v54 = vld [vmem:[%s3565_s1 + $0x118] sm:$0xff]   ;;  %v539_v58 = vrot.slane %v524_v42, %v2991_v40 }
   0xe   :  { %2182 = vmatprep.subr.bf16.mxu1 %v2866_v13  ;;  %v150_v47 = vrot.slane %v129_v43, %v2991_v40  ;;  %v151_v48 = vcombine.high %v136_v44, %v136_v44  ;;  %v143_v56 = vrot.slane %v128_v55, %v2991_v40 }
   0xf   :  { %v553_v51 = vrot.slane %v532_v46, %v2991_v40 }
  0x10   :  { %2161 = vmatpush3.bf16.msra.mxu0 %v2872_v14  ;;  %409 = vmatprep.mubr.bf16.mxu0 %v150_v47  ;;  %v152_v49 = vcombine.high %v150_v47, %v150_v47 }
  0x11   :  { %2183 = vmatpush3.bf16.msra.mxu1 %v2878_v15  ;;  %2162 = vmatprep.subr.bf16.mxu0 %v2884_v16  ;;  %v555_v57 = vcombine.high %v553_v51, %v553_v51 }
  0x12   :  { %2184 = vmatprep.subr.bf16.mxu1 %v2890_v17  ;;  %449 = vmatprep.mubr.bf16.mxu1 %v152_v49 }
  0x14   :  { %2163 = vmatpush3.bf16.msra.mxu0 %v2896_v18 }
  0x15   :  { %2185 = vmatpush3.bf16.msra.mxu1 %v2902_v19  ;;  %2164 = vmatprep.subr.bf16.mxu0 %v2908_v20 }
  0x16   :  { %2186 = vmatprep.subr.bf16.mxu1 %v2914_v21 }
  0x18   :  { %2165 = vmatpush3.bf16.msra.mxu0 %v2920_v22 }
  0x19   :  { %2187 = vmatpush3.bf16.msra.mxu1 %v2926_v23  ;;  %2166 = vmatprep.subr.bf16.mxu0 %v2932_v24 }
  0x1a   :  { %2188 = vmatprep.subr.bf16.mxu1 %v2938_v25 }
  0x1c   :  { %2167 = vmatpush3.bf16.msra.mxu0 %v2944_v26 }
  0x1d   :  { %2189 = vmatpush3.bf16.msra.mxu1 %v2950_v27  ;;  %2168 = vmatprep.subr.bf16.mxu0 %v2956_v28 }
  0x1e   :  { %2190 = vmatprep.subr.bf16.mxu1 %v2962_v29 }
  0x20   :  { %2169 = vmatpush3.bf16.msra.mxu0 %v2968_v31 }
  0x21   :  { %2191 = vmatpush3.bf16.msra.mxu1 %v2974_v32  ;;  %2377 = vmatprep.subr.bf16.mxu0 %v2721_v36 }
  0x22   :  { %2203 = vmatprep.subr.bf16.mxu1 %v2789_v0 }
  0x23   :  { %410 = vmatmul.mubr.bf16.vlgmr.msra.gmra.mrb[0].mxu0 %v136_v44 }
  0x24   :  { %2378 = vmatpush3.bf16.msra.mxu0 %v3000_v45  ;;  %450 = vmatmul.mubr.bf16.vlgmr.msra.gmra.mrb[0].mxu1 %v151_v48 }
  0x25   :  { %2379 = vmatprep.subr.bf16.mxu0 %v2721_v36  ;;  %2204 = vmatpush3.bf16.msra.mxu1 %v2800_v2 }
  0x26   :  { %2385 = vmatprep.mubr.msk.bf16.mxu0 %vm2722_vm0, %v2721_v36  ;;  %2205 = vmatprep.subr.bf16.mxu1 %v2812_v4 }
  0x27   :  { %595 = vmatprep.mubr.bf16.mxu1 %v553_v51 }
  0x28   :  { %2380 = vmatpush3.bf16.msra.mxu0 %v3006_v50 }
  0x29   :  { %2381 = vmatprep.subr.bf16.mxu0 %v2721_v36  ;;  %2206 = vmatpush3.bf16.msra.mxu1 %v2824_v6 }
  0x2a   :  { %2207 = vmatprep.subr.bf16.mxu1 %v2836_v8 }
  0x2c   :  { %2382 = vmatpush3.bf16.msra.mxu0 %v3015_v52 }
  0x2d   :  { %2383 = vmatprep.subr.bf16.mxu0 %v2721_v36  ;;  %2208 = vmatpush3.bf16.msra.mxu1 %v2848_v10 }
  0x2e   :  { %2209 = vmatprep.subr.bf16.mxu1 %v2860_v12 }
  0x30   :  { %2384 = vmatpush3.bf16.msra.mxu0 %v3026_v54 }
  0x31   :  { %2225 = vmatprep.subr.bf16.mxu0 %v2794_v1  ;;  %2210 = vmatpush3.bf16.msra.mxu1 %v2872_v14 }
  0x32   :  { %2211 = vmatprep.subr.bf16.mxu1 %v2884_v16 }
  0x33   :  { %2386 = vmatmul.mubr.msk.bf16.vlgmr.msra.gmra.mrb[4].mxu0 %vm373_vm1, %v143_v56 }
  0x34   :  { %2226 = vmatpush3.bf16.msra.mxu0 %v2806_v3  ;;  %635 = vmatprep.mubr.bf16.mxu0 %v555_v57 }
  0x35   :  { %2227 = vmatprep.subr.bf16.mxu0 %v2818_v5  ;;  %2212 = vmatpush3.bf16.msra.mxu1 %v2896_v18 }
  0x36   :  { %2213 = vmatprep.subr.bf16.mxu1 %v2908_v20 }
  0x38   :  { %2228 = vmatpush3.bf16.msra.mxu0 %v2830_v7 }
  0x39   :  { %2229 = vmatprep.subr.bf16.mxu0 %v2842_v9  ;;  %2214 = vmatpush3.bf16.msra.mxu1 %v2920_v22 }
  0x3a   :  { %2215 = vmatprep.subr.bf16.mxu1 %v2932_v24 }
  0x3c   :  { %2230 = vmatpush3.bf16.msra.mxu0 %v2854_v11 }
  0x3d   :  { %2231 = vmatprep.subr.bf16.mxu0 %v2866_v13  ;;  %2216 = vmatpush3.bf16.msra.mxu1 %v2944_v26 }
  0x3e   :  { %2217 = vmatprep.subr.bf16.mxu1 %v2956_v28 }
  0x40   :  { %2232 = vmatpush3.bf16.msra.mxu0 %v2878_v15 }
  0x41   :  { %2233 = vmatprep.subr.bf16.mxu0 %v2890_v17 }
  0x42   :  { %18 = vsyncpa [#allocation5], 0  ;;  %2218 = vmatpush3.bf16.msra.mxu1 %v2968_v31  ;;  %v517_v59 = vcombine.high %v2988_v39, %v2988_v39  ;;  %v554_v61 = vcombine.high %v539_v58, %v539_v58  ;;  %v2531_v62 = vld [vmem:[%s3566_s2 + $0x4] ss:$8 sps:$4 sm:$0xff]   ;;  %v2529_v30 = vld [vmem:[%s3566_s2] ss:$8 sps:$4 sm:$0xff]  }
  0x43   :  { %2389 = vmatprep.subr.bf16.mxu1 %v2721_v36  ;;  %v2534_v33 = vld [vmem:[%s3566_s2 + $0x14] ss:$8 sps:$4 sm:$0xff]   ;;  %v2532_v34 = vld [vmem:[%s3566_s2 + $0x10] ss:$8 sps:$4 sm:$0xff]   ;;  %v2537_v37 = vld [vmem:[%s3566_s2 + $0x24] ss:$8 sps:$4 sm:$0xff]  }
  0x44   :  { %2234 = vmatpush3.bf16.msra.mxu0 %v2902_v19  ;;  %v531_v60 = vrot.slane %v517_v59, %v2991_v40  ;;  %v2535_v38 = vld [vmem:[%s3566_s2 + $0x20] ss:$8 sps:$4 sm:$0xff]   ;;  %v2540_v39 = vld [vmem:[%s3566_s2 + $0x34] ss:$8 sps:$4 sm:$0xff]   ;;  %v2538_v41 = vld [vmem:[%s3566_s2 + $0x30] ss:$8 sps:$4 sm:$0xff]  }
  0x45   :  { %596 = vmatmul.mubr.bf16.vlgmr.msra.gmra.mrb[4].mxu1 %v539_v58  ;;  %2235 = vmatprep.subr.bf16.mxu0 %v2914_v21  ;;  %v2541_v42 = vld [vmem:[%s3566_s2 + $0x40] ss:$8 sps:$4 sm:$0xff]   ;;  %v2543_v43 = vld [vmem:[%s3566_s2 + $0x44] ss:$8 sps:$4 sm:$0xff]   ;;  %v2546_v44 = vld [vmem:[%s3566_s2 + $0x54] ss:$8 sps:$4 sm:$0xff]  }
  0x46   :  { %2390 = vmatpush3.bf16.msra.mxu1 %v3000_v45  ;;  %2397 = vmatprep.mubr.msk.bf16.mxu1 %vm2722_vm0, %v2721_v36  ;;  %v546_v63 = vrot.slane %v531_v60, %v2991_v40  ;;  %v2544_v46 = vld [vmem:[%s3566_s2 + $0x50] ss:$8 sps:$4 sm:$0xff]   ;;  %v2549_v47 = vld [vmem:[%s3566_s2 + $0x64] ss:$8 sps:$4 sm:$0xff]   ;;  %v2547_v48 = vld [vmem:[%s3566_s2 + $0x60] ss:$8 sps:$4 sm:$0xff]  }
  0x47   :  { %2391 = vmatprep.subr.bf16.mxu1 %v2721_v36  ;;  %v2552_v49 = vld [vmem:[%s3566_s2 + $0x74] ss:$8 sps:$4 sm:$0xff]   ;;  %v2550_v51 = vld [vmem:[%s3566_s2 + $0x70] ss:$8 sps:$4 sm:$0xff]   ;;  %v2723_v53 = vmov 0   ;;  %vm1916_vm2 = vcmask 74752  }
  0x48   :  { %2236 = vmatpush3.bf16.msra.mxu0 %v2926_v23  ;;  %v2553_v55 = vld [vmem:[%s3566_s2 + $0x80] ss:$8 sps:$4 sm:$0xff]   ;;  %v2555_v56 = vld [vmem:[%s3566_s2 + $0x84] ss:$8 sps:$4 sm:$0xff]   ;;  %v2558_v57 = vld [vmem:[%s3566_s2 + $0x94] ss:$8 sps:$4 sm:$0xff]  }
  0x49   :  { %2237 = vmatprep.subr.bf16.mxu0 %v2938_v25  ;;  %v2556_v58 = vld [vmem:[%s3566_s2 + $0x90] ss:$8 sps:$4 sm:$0xff]   ;;  %v2561_v59 = vld [vmem:[%s3566_s2 + $0xa4] ss:$8 sps:$4 sm:$0xff]   ;;  %vm1930_vm3 = vcmask 9216  }
  0x4a   :  { %2392 = vmatpush3.bf16.msra.mxu1 %v3006_v50  ;;  %v2562_v60 = vld [vmem:[%s3566_s2 + $0xb0] ss:$8 sps:$4 sm:$0xff]  }
  0x4b   :  { %2393 = vmatprep.subr.bf16.mxu1 %v2721_v36 }
  0x4c   :  { %2238 = vmatpush3.bf16.msra.mxu0 %v2950_v27 }
  0x4d   :  { %2239 = vmatprep.subr.bf16.mxu0 %v2962_v29 }
  0x4e   :  { %2394 = vmatpush3.bf16.msra.mxu1 %v3015_v52 }
  0x4f   :  { %2395 = vmatprep.subr.bf16.mxu1 %v2721_v36 }
  0x50   :  { %2240 = vmatpush3.bf16.msra.mxu0 %v2974_v32 }
  0x51   :  { %781 = vmatprep.subr.bf16.mxu0 %v2555_v56 }
  0x52   :  { %2396 = vmatpush3.bf16.msra.mxu1 %v3026_v54 }
  0x53   :  { %636 = vmatmul.mubr.bf16.vlgmr.msra.gmra.mrb[8].mxu0 %v554_v61  ;;  %902 = vmatprep.subr.bf16.mxu1 %v2531_v62  ;;  %v2564_v61 = vld [vmem:[%s3566_s2 + $0xb4] ss:$8 sps:$4 sm:$0xff]   ;;  %v2567_v62 = vld [vmem:[%s3566_s2 + $0xc4] ss:$8 sps:$4 sm:$0xff]  }
  0x54   :  { %813 = vmatprep.mubr.bf16.mxu0 %v2723_v53  ;;  %782 = vmatpush1.bf16.msra.mxu0 %v2553_v55 }
  0x55   :  { %2398 = vmatmul.mubr.msk.bf16.vlgmr.msra.gmra.mrb[8].mxu1 %vm373_vm1, %v546_v63  ;;  %783 = vmatprep.subr.bf16.mxu0 %v2558_v57  ;;  %v2565_v63 = vld [vmem:[%s3566_s2 + $0xc0] ss:$8 sps:$4 sm:$0xff]  }
  0x56   :  { %903 = vmatpush1.bf16.msra.mxu1 %v2529_v30  ;;  %934 = vmatprep.mubr.bf16.mxu1 %v2723_v53  ;;  %v2570_v30 = vld [vmem:[%s3566_s2 + $0xd4] ss:$8 sps:$4 sm:$0xff]  }
  0x57   :  { %904 = vmatprep.subr.bf16.mxu1 %v2534_v33  ;;  %v2568_v33 = vld [vmem:[%s3566_s2 + $0xd0] ss:$8 sps:$4 sm:$0xff]  }
  0x58   :  { %784 = vmatpush1.bf16.msra.mxu0 %v2556_v58 }
  0x59   :  { %785 = vmatprep.subr.bf16.mxu0 %v2561_v59 }
  0x5a   :  { %905 = vmatpush1.bf16.msra.mxu1 %v2532_v34  ;;  %v2573_v34 = vld [vmem:[%s3566_s2 + $0xe4] ss:$8 sps:$4 sm:$0xff]  }
  0x5b   :  { %906 = vmatprep.subr.bf16.mxu1 %v2537_v37  ;;  %v2571_v37 = vld [vmem:[%s3566_s2 + $0xe0] ss:$8 sps:$4 sm:$0xff]  }
  0x5e   :  { %907 = vmatpush1.bf16.msra.mxu1 %v2535_v38  ;;  %v2576_v38 = vld [vmem:[%s3566_s2 + $0xf4] ss:$8 sps:$4 sm:$0xff]  }
  0x5f   :  { %908 = vmatprep.subr.bf16.mxu1 %v2540_v39  ;;  %v2574_v39 = vld [vmem:[%s3566_s2 + $0xf0] ss:$8 sps:$4 sm:$0xff]  }
  0x62   :  { %909 = vmatpush1.bf16.msra.mxu1 %v2538_v41 }
  0x63   :  { %910 = vmatprep.subr.bf16.mxu1 %v2543_v43 }
  0x66   :  { %911 = vmatpush1.bf16.msra.mxu1 %v2541_v42 }
  0x67   :  { %912 = vmatprep.subr.bf16.mxu1 %v2546_v44 }
  0x6a   :  { %913 = vmatpush1.bf16.msra.mxu1 %v2544_v46 }
  0x6b   :  { %914 = vmatprep.subr.bf16.mxu1 %v2549_v47 }
  0x6e   :  { %915 = vmatpush1.bf16.msra.mxu1 %v2547_v48 }
  0x6f   :  { %916 = vmatprep.subr.bf16.mxu1 %v2552_v49  ;;  %v3181_v49 = vld [vmem:[%s3564_s0 + $0xa] sm:$0x1f] }
  0x70   :  { %v953_v58 = vrot.slane %v3181_v49, %v2991_v40 }
  0x72   :  { %917 = vmatpush1.bf16.msra.mxu1 %v2550_v51  ;;  %v961_v59 = vcombine.high %v953_v58, %v953_v58 }
  0x73   :  { %2274 = vmatprep.subr.bf16.mxu1 %v2794_v1  ;;  %v2559_v1 = vld [vmem:[%s3566_s2 + $0xa0] ss:$8 sps:$4 sm:$0xff]  }
  0x74   :  { %786 = vmatpush1.bf16.msra.mxu0 %v2559_v1  ;;  %v982_v1 = vrot.slane %v961_v59, %v2991_v40 }
  0x75   :  { %787 = vmatprep.subr.bf16.mxu0 %v2564_v61 }
  0x78   :  { %788 = vmatpush1.bf16.msra.mxu0 %v2562_v60 }
  0x79   :  { %789 = vmatprep.subr.bf16.mxu0 %v2567_v62 }
  0x7c   :  { %790 = vmatpush1.bf16.msra.mxu0 %v2565_v63 }
  0x7d   :  { %791 = vmatprep.subr.bf16.mxu0 %v2570_v30  ;;  %v984_v30 = vcombine.high %v982_v1, %v982_v1 }
  0x80   :  { %792 = vmatpush1.bf16.msra.mxu0 %v2568_v33 }
  0x81   :  { %793 = vmatprep.subr.bf16.mxu0 %v2573_v34 }
  0x84   :  { %794 = vmatpush1.bf16.msra.mxu0 %v2571_v37 }
  0x85   :  { %795 = vmatprep.subr.bf16.mxu0 %v2576_v38 }
  0x88   :  { %796 = vmatpush1.bf16.msra.mxu0 %v2574_v39 }
  0x89   :  { %2252 = vmatprep.subr.bf16.mxu0 %v2789_v0 }
  0xf6   :  { %v2170_v41 = vpop.f32.mrb[0].mxu0 }
  0xf7   :  { %v2171_v42 = vpop.f32.mrb[1].mxu0  ;;  %v2192_v43 = vpop.f32.mrb[0].mxu1 }
  0xf8   :  { %v2172_v44 = vadd.f32 %v2171_v42, %v2170_v41  ;;  %v2173_v46 = vpop.f32.mrb[2].mxu0  ;;  %v2193_v47 = vpop.f32.mrb[1].mxu1 }
  0xf9   :  { %v2174_v48 = vpop.f32.mrb[3].mxu0  ;;  %v2194_v51 = vadd.f32 %v2193_v47, %v2192_v43  ;;  %v2195_v55 = vpop.f32.mrb[2].mxu1  ;;  %v946_v46 = vcombine.high %v3181_v49, %v3181_v49  ;;  %v2659_v49 = vld [vmem:[%s3565_s1 + $0xc0] sm:$0xff]  }
  0xfa   :  { %v2196_v56 = vpop.f32.mrb[3].mxu1 }
  0xfb   :  { %v452_v57 = vadd.f32 %v2194_v51, %v2172_v44  ;;  %v960_v47 = vrot.slane %v946_v46, %v2991_v40  ;;  %v2093_v51 = vld [vmem:[%s3564_s0 + $0xf] sm:$0x1f] }
  0xfc   :  { %v1263_v55 = vrot.slane %v2093_v51, %v2991_v40  ;;  %v1256_v59 = vcombine.high %v2093_v51, %v2093_v51  ;;  %v2663_v46 = vld [vmem:[%s3565_s1 + $0xd0] sm:$0xff]  }
  0xfd   :  { %v975_v48 = vrot.slane %v960_v47, %v2991_v40  ;;  %v2664_v47 = vld [vmem:[%s3565_s1 + $0x90] sm:$0xff]  }
  0xfe   :  { %v1271_v56 = vcombine.high %v1263_v55, %v1263_v55 }
 0x106   :  { %v491_v60 = vpop.f32.mrb[4].mxu0 }
 0x107   :  { %v492_v61 = vadd.f32 %v491_v60, %v452_v57  ;;  %v2387_v62 = vpop.f32.mrb[5].mxu0  ;;  %v1292_v57 = vrot.slane %v1271_v56, %v2991_v40 }
 0x108   :  { %v494_v63 = vpop.f32.mrb[6].mxu0 }
 0x109   :  { %v497_v33 = vpack.c.bf16 %v492_v61, %v492_v61  ;;  %v2388_v34 = vpop.f32.mrb[7].mxu0 }
 0x10b   :  { %935 = vmatmul.mubr.bf16.vlgmr.msra.gmra.mrb[12].mxu1 %v497_v33 }
 0x10c   :  { %2275 = vmatpush3.bf16.msra.mxu1 %v2806_v3  ;;  %1064 = vmatprep.mubr.bf16.mxu1 %v984_v30 }
 0x10d   :  { %2276 = vmatprep.subr.bf16.mxu1 %v2818_v5  ;;  %v968_v5 = vrot.slane %v953_v58, %v2991_v40  ;;  %v3307_v58 = vrot.slane %v1263_v55, %v2991_v40 }
 0x110   :  { %2277 = vmatpush3.bf16.msra.mxu1 %v2830_v7 }
 0x111   :  { %2278 = vmatprep.subr.bf16.mxu1 %v2842_v9 }
 0x114   :  { %2279 = vmatpush3.bf16.msra.mxu1 %v2854_v11  ;;  %v983_v11 = vcombine.high %v968_v5, %v968_v5 }
 0x115   :  { %2280 = vmatprep.subr.bf16.mxu1 %v2866_v13 }
 0x118   :  { %v2219_v37 = vpop.f32.mrb[4].mxu1  ;;  %2281 = vmatpush3.bf16.msra.mxu1 %v2878_v15 }
 0x119   :  { %v2220_v38 = vpop.f32.mrb[5].mxu1  ;;  %2282 = vmatprep.subr.bf16.mxu1 %v2890_v17 }
 0x11a   :  { %v2221_v39 = vadd.f32 %v2220_v38, %v2219_v37  ;;  %v2222_v41 = vpop.f32.mrb[6].mxu1 }
 0x11b   :  { %v2223_v3 = vpop.f32.mrb[7].mxu1 }
 0x11c   :  { %2283 = vmatpush3.bf16.msra.mxu1 %v2902_v19 }
 0x11d   :  { %2284 = vmatprep.subr.bf16.mxu1 %v2914_v21 }
 0x120   :  { %2285 = vmatpush3.bf16.msra.mxu1 %v2926_v23 }
 0x121   :  { %2286 = vmatprep.subr.bf16.mxu1 %v2938_v25 }
 0x124   :  { %2287 = vmatpush3.bf16.msra.mxu1 %v2950_v27 }
 0x125   :  { %2288 = vmatprep.subr.bf16.mxu1 %v2962_v29 }
 0x126   :  { %v2241_v7 = vpop.f32.mrb[8].mxu0 }
 0x127   :  { %v2242_v9 = vpop.f32.mrb[9].mxu0 }
 0x128   :  { %v2243_v13 = vadd.f32 %v2242_v9, %v2241_v7  ;;  %v2244_v15 = vpop.f32.mrb[10].mxu0  ;;  %v677_v17 = vpop.f32.mrb[8].mxu1  ;;  %2289 = vmatpush3.bf16.msra.mxu1 %v2974_v32 }
 0x129   :  { %v2245_v19 = vpop.f32.mrb[11].mxu0  ;;  %v2399_v21 = vpop.f32.mrb[9].mxu1 }
 0x12a   :  { %v638_v42 = vadd.f32 %v2243_v13, %v2221_v39  ;;  %v680_v23 = vpop.f32.mrb[10].mxu1  ;;  %v1294_v21 = vcombine.high %v1292_v57, %v1292_v57 }
 0x12b   :  { %v2400_v43 = vpop.f32.mrb[11].mxu1  ;;  %1065 = vmatmul.mubr.bf16.vlgmr.msra.gmra.mrb[16].mxu1 %v983_v11 }
 0x12c   :  { %v678_v25 = vadd.f32 %v677_v17, %v638_v42  ;;  %1242 = vmatprep.mubr.bf16.mxu1 %v2723_v53  ;;  %v2660_v43 = vld [vmem:[%s3565_s1 + $0x80] sm:$0xff]  }
 0x12e   :  { %v683_v44 = vpack.c.bf16 %v678_v25, %v678_v25  ;;  %v2661_v25 = vld [vmem:[%s3565_s1 + $0xc8] sm:$0xff]  }
 0x130   :  { %814 = vmatmul.mubr.bf16.vlgmr.msra.gmra.mrb[12].mxu0 %v683_v44  ;;  %v2662_v44 = vld [vmem:[%s3565_s1 + $0x88] sm:$0xff]  }
 0x131   :  { %2253 = vmatpush3.bf16.msra.mxu0 %v2800_v2  ;;  %1024 = vmatprep.mubr.bf16.mxu0 %v982_v1  ;;  %v1270_v1 = vrot.slane %v1256_v59, %v2991_v40  ;;  %v2621_v59 = vld [vmem:[%s3566_s2 + $0x1e0] ss:$8 sps:$4 sm:$0xff]  }
 0x132   :  { %2254 = vmatprep.subr.bf16.mxu0 %v2812_v4 }
 0x135   :  { %2255 = vmatpush3.bf16.msra.mxu0 %v2824_v6 }
 0x136   :  { %2256 = vmatprep.subr.bf16.mxu0 %v2836_v8 }
 0x139   :  { %2257 = vmatpush3.bf16.msra.mxu0 %v2848_v10 }
 0x13a   :  { %2258 = vmatprep.subr.bf16.mxu0 %v2860_v12 }
 0x13d   :  { %2259 = vmatpush3.bf16.msra.mxu0 %v2872_v14 }
 0x13e   :  { %2260 = vmatprep.subr.bf16.mxu0 %v2884_v16 }
 0x141   :  { %2261 = vmatpush3.bf16.msra.mxu0 %v2896_v18 }
 0x142   :  { %2262 = vmatprep.subr.bf16.mxu0 %v2908_v20 }
 0x145   :  { %2263 = vmatpush3.bf16.msra.mxu0 %v2920_v22 }
 0x146   :  { %2264 = vmatprep.subr.bf16.mxu0 %v2932_v24 }
 0x149   :  { %2265 = vmatpush3.bf16.msra.mxu0 %v2944_v26 }
 0x14a   :  { %2266 = vmatprep.subr.bf16.mxu0 %v2956_v28 }
 0x14d   :  { %2267 = vmatpush3.bf16.msra.mxu0 %v2968_v31 }
 0x14e   :  { %2401 = vmatprep.subr.bf16.mxu0 %v2721_v36 }
 0x150   :  { %1025 = vmatmul.mubr.bf16.vlgmr.msra.gmra.mrb[16].mxu0 %v968_v5 }
 0x151   :  { %2402 = vmatpush3.bf16.msra.mxu0 %v3000_v45  ;;  %2409 = vmatprep.mubr.msk.bf16.mxu0 %vm2722_vm0, %v2721_v36 }
 0x152   :  { %2403 = vmatprep.subr.bf16.mxu0 %v2721_v36 }
 0x155   :  { %2404 = vmatpush3.bf16.msra.mxu0 %v3006_v50 }
 0x156   :  { %2405 = vmatprep.subr.bf16.mxu0 %v2721_v36 }
 0x159   :  { %2406 = vmatpush3.bf16.msra.mxu0 %v3015_v52 }
 0x15a   :  { %2407 = vmatprep.subr.bf16.mxu0 %v2721_v36 }
 0x15d   :  { %2408 = vmatpush3.bf16.msra.mxu0 %v3026_v54 }
 0x15e   :  { %2301 = vmatprep.subr.bf16.mxu0 %v2789_v0  ;;  %v2578_v0 = vld [vmem:[%s3566_s2 + $0x100] ss:$8 sps:$4 sm:$0xff]  }
 0x160   :  { %2410 = vmatmul.mubr.msk.bf16.vlgmr.msra.gmra.mrb[20].mxu0 %vm373_vm1, %v975_v48  ;;  %v2665_v48 = vld [vmem:[%s3565_s1 + $0xd8] sm:$0xff]  }
 0x161   :  { %2302 = vmatpush3.bf16.msra.mxu0 %v2800_v2  ;;  %v2580_v2 = vld [vmem:[%s3566_s2 + $0x104] ss:$8 sps:$4 sm:$0xff]   ;;  %1334 = vmatprep.mubr.bf16.mxu0 %v1292_v57  ;;  %v2618_v57 = vld [vmem:[%s3566_s2 + $0x1d0] ss:$8 sps:$4 sm:$0xff]  }
 0x162   :  { %2303 = vmatprep.subr.bf16.mxu0 %v2812_v4  ;;  %v2583_v4 = vld [vmem:[%s3566_s2 + $0x114] ss:$8 sps:$4 sm:$0xff]   ;;  %1210 = vmatprep.subr.bf16.mxu1 %v2580_v2  ;;  %v2667_v2 = vld [vmem:[%s3565_s1 + $0xe0] sm:$0xff]  }
 0x163   :  { %1211 = vmatpush1.bf16.msra.mxu1 %v2578_v0  ;;  %v2666_v0 = vld [vmem:[%s3565_s1 + $0x98] sm:$0xff]  }
 0x164   :  { %1212 = vmatprep.subr.bf16.mxu1 %v2583_v4  ;;  %v2668_v4 = vld [vmem:[%s3565_s1 + $0xa0] sm:$0xff]  }
 0x165   :  { %2304 = vmatpush3.bf16.msra.mxu0 %v2824_v6  ;;  %v2581_v6 = vld [vmem:[%s3566_s2 + $0x110] ss:$8 sps:$4 sm:$0xff]  }
 0x166   :  { %2305 = vmatprep.subr.bf16.mxu0 %v2836_v8  ;;  %v2586_v8 = vld [vmem:[%s3566_s2 + $0x124] ss:$8 sps:$4 sm:$0xff]  }
 0x167   :  { %1213 = vmatpush1.bf16.msra.mxu1 %v2581_v6  ;;  %v2669_v6 = vld [vmem:[%s3565_s1 + $0xe8] sm:$0xff]  }
 0x168   :  { %1214 = vmatprep.subr.bf16.mxu1 %v2586_v8  ;;  %v2670_v8 = vld [vmem:[%s3565_s1 + $0xa8] sm:$0xff]  }
 0x169   :  { %2306 = vmatpush3.bf16.msra.mxu0 %v2848_v10  ;;  %v2584_v10 = vld [vmem:[%s3566_s2 + $0x120] ss:$8 sps:$4 sm:$0xff]  }
 0x16a   :  { %2307 = vmatprep.subr.bf16.mxu0 %v2860_v12  ;;  %v2589_v12 = vld [vmem:[%s3566_s2 + $0x134] ss:$8 sps:$4 sm:$0xff]  }
 0x16b   :  { %1215 = vmatpush1.bf16.msra.mxu1 %v2584_v10  ;;  %v2671_v10 = vld [vmem:[%s3565_s1 + $0xf0] sm:$0xff]  }
 0x16c   :  { %1216 = vmatprep.subr.bf16.mxu1 %v2589_v12  ;;  %v1293_v12 = vcombine.high %v3307_v58, %v3307_v58 }
 0x16d   :  { %2308 = vmatpush3.bf16.msra.mxu0 %v2872_v14  ;;  %v2587_v14 = vld [vmem:[%s3566_s2 + $0x130] ss:$8 sps:$4 sm:$0xff]  }
 0x16e   :  { %2309 = vmatprep.subr.bf16.mxu0 %v2884_v16  ;;  %v2590_v16 = vld [vmem:[%s3566_s2 + $0x140] ss:$8 sps:$4 sm:$0xff]  }
 0x16f   :  { %1217 = vmatpush1.bf16.msra.mxu1 %v2587_v14  ;;  %v2603_v14 = vld [vmem:[%s3566_s2 + $0x180] ss:$8 sps:$4 sm:$0xff]  }
 0x171   :  { %2310 = vmatpush3.bf16.msra.mxu0 %v2896_v18  ;;  %v2592_v18 = vld [vmem:[%s3566_s2 + $0x144] ss:$8 sps:$4 sm:$0xff]  }
 0x172   :  { %2311 = vmatprep.subr.bf16.mxu0 %v2908_v20  ;;  %v2595_v20 = vld [vmem:[%s3566_s2 + $0x154] ss:$8 sps:$4 sm:$0xff]   ;;  %1218 = vmatprep.subr.bf16.mxu1 %v2592_v18  ;;  %v2609_v18 = vld [vmem:[%s3566_s2 + $0x1a0] ss:$8 sps:$4 sm:$0xff]  }
 0x173   :  { %1219 = vmatpush1.bf16.msra.mxu1 %v2590_v16  ;;  %v2611_v16 = vld [vmem:[%s3566_s2 + $0x1a4] ss:$8 sps:$4 sm:$0xff]  }
 0x174   :  { %1220 = vmatprep.subr.bf16.mxu1 %v2595_v20  ;;  %v2614_v20 = vld [vmem:[%s3566_s2 + $0x1b4] ss:$8 sps:$4 sm:$0xff]  }
 0x175   :  { %2312 = vmatpush3.bf16.msra.mxu0 %v2920_v22  ;;  %v2593_v22 = vld [vmem:[%s3566_s2 + $0x150] ss:$8 sps:$4 sm:$0xff]  }
 0x176   :  { %2313 = vmatprep.subr.bf16.mxu0 %v2932_v24  ;;  %v2598_v24 = vld [vmem:[%s3566_s2 + $0x164] ss:$8 sps:$4 sm:$0xff]  }
 0x177   :  { %1221 = vmatpush1.bf16.msra.mxu1 %v2593_v22  ;;  %v2612_v22 = vld [vmem:[%s3566_s2 + $0x1b0] ss:$8 sps:$4 sm:$0xff]  }
 0x178   :  { %1222 = vmatprep.subr.bf16.mxu1 %v2598_v24  ;;  %v2617_v24 = vld [vmem:[%s3566_s2 + $0x1c4] ss:$8 sps:$4 sm:$0xff]  }
 0x179   :  { %2314 = vmatpush3.bf16.msra.mxu0 %v2944_v26  ;;  %v2596_v26 = vld [vmem:[%s3566_s2 + $0x160] ss:$8 sps:$4 sm:$0xff]  }
 0x17a   :  { %2315 = vmatprep.subr.bf16.mxu0 %v2956_v28  ;;  %v2601_v28 = vld [vmem:[%s3566_s2 + $0x174] ss:$8 sps:$4 sm:$0xff]  }
 0x17b   :  { %1223 = vmatpush1.bf16.msra.mxu1 %v2596_v26  ;;  %v2615_v26 = vld [vmem:[%s3566_s2 + $0x1c0] ss:$8 sps:$4 sm:$0xff]  }
 0x17c   :  { %1224 = vmatprep.subr.bf16.mxu1 %v2601_v28 }
 0x17d   :  { %2316 = vmatpush3.bf16.msra.mxu0 %v2968_v31  ;;  %v2599_v31 = vld [vmem:[%s3566_s2 + $0x170] ss:$8 sps:$4 sm:$0xff]  }
 0x17e   :  { %2413 = vmatprep.subr.bf16.mxu0 %v2721_v36 }
 0x17f   :  { %1225 = vmatpush1.bf16.msra.mxu1 %v2599_v31  ;;  %v2620_v31 = vld [vmem:[%s3566_s2 + $0x1d4] ss:$8 sps:$4 sm:$0xff]  }
 0x180   :  { %2323 = vmatprep.subr.bf16.mxu1 %v2659_v49  ;;  %1335 = vmatmul.mubr.bf16.vlgmr.msra.gmra.mrb[24].mxu0 %v3307_v58  ;;  %v2623_v58 = vld [vmem:[%s3566_s2 + $0x1e4] ss:$8 sps:$4 sm:$0xff]  }
 0x181   :  { %2414 = vmatpush3.bf16.msra.mxu0 %v3000_v45  ;;  %2421 = vmatprep.mubr.msk.bf16.mxu0 %vm2722_vm0, %v2721_v36  ;;  %v1285_v45 = vrot.slane %v1270_v1, %v2991_v40 }
 0x182   :  { %2415 = vmatprep.subr.bf16.mxu0 %v2721_v36 }
 0x185   :  { %2416 = vmatpush3.bf16.msra.mxu0 %v3006_v50 }
 0x186   :  { %2417 = vmatprep.subr.bf16.mxu0 %v2721_v36 }
 0x189   :  { %2418 = vmatpush3.bf16.msra.mxu0 %v3015_v52 }
 0x18a   :  { %2419 = vmatprep.subr.bf16.mxu0 %v2721_v36 }
 0x18d   :  { %2420 = vmatpush3.bf16.msra.mxu0 %v3026_v54 }
 0x190   :  { %2422 = vmatmul.mubr.msk.bf16.vlgmr.msra.gmra.mrb[28].mxu0 %vm373_vm1, %v1285_v45 }
 0x191   :  { %1552 = vmatprep.mubr.bf16.mxu0 %v2723_v53 }
 0x1de   :  { %v936_v60 = vpop.f32.mrb[12].mxu1 }
 0x1df   :  { %v938_v61 = vpop.f32.mrb[13].mxu1 }
 0x1e0   :  { %v940_v62 = vpop.f32.mrb[14].mxu1 }
 0x1e1   :  { %v941_v50 = vpop.f32.mrb[15].mxu1  ;;  %v2624_v62 = vld [vmem:[%s3566_s2 + $0x1f0] ss:$8 sps:$4 sm:$0xff]  }
 0x1fe   :  { %v2290_v63 = vpop.f32.mrb[16].mxu1 }
 0x1ff   :  { %v2291_v30 = vpop.f32.mrb[17].mxu1 }
 0x200   :  { %v2292_v33 = vadd.f32 %v2291_v30, %v2290_v63  ;;  %v2293_v34 = vpop.f32.mrb[18].mxu1  ;;  %v2627_v63 = vld [vmem:[%s3568_s4] sm:$0xff]   ;;  %v2628_v30 = vld [vmem:[%s3568_s4 + $0x8] sm:$0xff]  }
 0x201   :  { %v2294_v37 = vpop.f32.mrb[19].mxu1  ;;  %v2630_v34 = vld [vmem:[%s3568_s4 + $0x18] sm:$0xff]  }
 0x202   :  { %v2631_v37 = vld [vmem:[%s3568_s4 + $0x20] sm:$0xff]  }
 0x203   :  { %v815_v52 = vpop.f32.mrb[12].mxu0 }
 0x204   :  { %v3323_v38 = vadd.f32 %v936_v60, %v815_v52  ;;  %v817_v39 = vpop.f32.mrb[13].mxu0  ;;  %v2626_v60 = vld [vmem:[%s3566_s2 + $0x1f4] ss:$8 sps:$4 sm:$0xff]   ;;  %v2632_v52 = vld [vmem:[%s3568_s4 + $0x28] sm:$0xff]  }
 0x205   :  { %v3325_v54 = vadd.f32 %v938_v61, %v817_v39  ;;  %v819_v40 = vpop.f32.mrb[14].mxu0 }
 0x206   :  { %v820_v41 = vpop.f32.mrb[15].mxu0 }
 0x223   :  { %v2268_v3 = vpop.f32.mrb[16].mxu0 }
 0x224   :  { %v2269_v5 = vpop.f32.mrb[17].mxu0 }
 0x225   :  { %v2270_v53 = vadd.f32 %v2269_v5, %v2268_v3  ;;  %v2271_v7 = vpop.f32.mrb[18].mxu0 }
 0x226   :  { %v2272_v9 = vpop.f32.mrb[19].mxu0 }
 0x227   :  { %v1067_v11 = vadd.f32 %v2292_v33, %v2270_v53  ;;  %v2629_v33 = vld [vmem:[%s3568_s4 + $0x10] sm:$0xff]  }
 0x233   :  { %v1106_v13 = vpop.f32.mrb[20].mxu0 }
 0x234   :  { %v1107_v15 = vadd.f32 %v1106_v13, %v1067_v11  ;;  %v2411_v17 = vpop.f32.mrb[21].mxu0 }
 0x235   :  { %v1109_v19 = vpop.f32.mrb[22].mxu0 }
 0x236   :  { %v1112_v42 = vpack.c.bf16 %v1107_v15, %v1107_v15  ;;  %v2412_v23 = vpop.f32.mrb[23].mxu0 }
 0x237   :  { %v2644_v23 = vld [vmem:[%s3570_s6 + $0x8] sm:$0xff]  }
 0x238   :  { %1243 = vmatmul.mubr.bf16.vlgmr.msra.gmra.mrb[20].mxu1 %v1112_v42  ;;  %v2643_v42 = vld [vmem:[%s3570_s6] sm:$0xff]  }
 0x239   :  { %2324 = vmatpush3.bf16.msra.mxu1 %v2660_v43  ;;  %1374 = vmatprep.mubr.bf16.mxu1 %v1294_v21  ;;  %v2645_v43 = vld [vmem:[%s3570_s6 + $0x10] sm:$0xff]  }
 0x23a   :  { %2325 = vmatprep.subr.bf16.mxu1 %v2661_v25  ;;  %v2646_v25 = vld [vmem:[%s3570_s6 + $0x18] sm:$0xff]  }
 0x23d   :  { %2326 = vmatpush3.bf16.msra.mxu1 %v2662_v44  ;;  %v2647_v44 = vld [vmem:[%s3570_s6 + $0x20] sm:$0xff]  }
 0x23e   :  { %2327 = vmatprep.subr.bf16.mxu1 %v2663_v46  ;;  %v2648_v46 = vld [vmem:[%s3570_s6 + $0x28] sm:$0xff]  }
 0x241   :  { %2328 = vmatpush3.bf16.msra.mxu1 %v2664_v47  ;;  %v1567_v47 = vsub.s32 0, %v2978_v35 }
 0x242   :  { %2329 = vmatprep.subr.bf16.mxu1 %v2665_v48  ;;  %v1563_v48 = vld [vmem:[%s3567_s3] sm:$0x3] }
 0x245   :  { %2330 = vmatpush3.bf16.msra.mxu1 %v2666_v0  ;;  %v1568_v0 = vrot.slane %v1563_v48, %v1567_v47 }
 0x246   :  { %2331 = vmatprep.subr.bf16.mxu1 %v2667_v2 }
 0x249   :  { %2332 = vmatpush3.bf16.msra.mxu1 %v2668_v4 }
 0x24a   :  { %2333 = vmatprep.subr.bf16.mxu1 %v2669_v6 }
 0x24d   :  { %2334 = vmatpush3.bf16.msra.mxu1 %v2670_v8 }
 0x24e   :  { %2335 = vmatprep.subr.bf16.mxu1 %v2671_v10 }
 0x251   :  { %2336 = vmatpush3.bf16.msra.mxu1 %v2950_v27  ;;  %v2605_v27 = vld [vmem:[%s3566_s2 + $0x184] ss:$8 sps:$4 sm:$0xff]  }
 0x252   :  { %2337 = vmatprep.subr.bf16.mxu1 %v2962_v29  ;;  %v2608_v29 = vld [vmem:[%s3566_s2 + $0x194] ss:$8 sps:$4 sm:$0xff]   ;;  %1520 = vmatprep.subr.bf16.mxu0 %v2605_v27 }
 0x253   :  { %1521 = vmatpush1.bf16.msra.mxu0 %v2603_v14  ;;  %v2317_v28 = vpop.f32.mrb[24].mxu0 }
 0x254   :  { %1522 = vmatprep.subr.bf16.mxu0 %v2608_v29  ;;  %v2318_v49 = vpop.f32.mrb[25].mxu0  ;;  %v2635_v29 = vld [vmem:[%s3572_s8] sm:$0xff]  }
 0x255   :  { %2338 = vmatpush3.bf16.msra.mxu1 %v2974_v32  ;;  %v2606_v32 = vld [vmem:[%s3566_s2 + $0x190] ss:$8 sps:$4 sm:$0xff]   ;;  %v2319_v51 = vadd.f32 %v2318_v49, %v2317_v28  ;;  %v2320_v55 = vpop.f32.mrb[26].mxu0 }
 0x256   :  { %2425 = vmatprep.subr.bf16.mxu1 %v2721_v36  ;;  %v2321_v56 = vpop.f32.mrb[27].mxu0 }
 0x257   :  { %1523 = vmatpush1.bf16.msra.mxu0 %v2606_v32  ;;  %v2649_v56 = vld [vmem:[%s3570_s6 + $0x30] sm:$0xff]  }
 0x258   :  { %1375 = vmatmul.mubr.bf16.vlgmr.msra.gmra.mrb[24].mxu1 %v1293_v12  ;;  %1524 = vmatprep.subr.bf16.mxu0 %v2611_v16  ;;  %v2636_v16 = vld [vmem:[%s3572_s8 + $0x8] sm:$0xff]  }
 0x259   :  { %2441 = vmatprep.mubr.msk.bf16.mxu1 %vm2722_vm0, %v2721_v36  ;;  %2426 = vmatpush3.bf16.msra.mxu1 %v2627_v63 }
 0x25a   :  { %2427 = vmatprep.subr.bf16.mxu1 %v2721_v36 }
 0x25b   :  { %1525 = vmatpush1.bf16.msra.mxu0 %v2609_v18  ;;  %v2637_v18 = vld [vmem:[%s3572_s8 + $0x10] sm:$0xff]  }
 0x25c   :  { %1526 = vmatprep.subr.bf16.mxu0 %v2614_v20  ;;  %v2638_v20 = vld [vmem:[%s3572_s8 + $0x18] sm:$0xff]  }
 0x25d   :  { %2428 = vmatpush3.bf16.msra.mxu1 %v2628_v30 }
 0x25e   :  { %2429 = vmatprep.subr.bf16.mxu1 %v2721_v36 }
 0x25f   :  { %1527 = vmatpush1.bf16.msra.mxu0 %v2612_v22  ;;  %v2639_v22 = vld [vmem:[%s3572_s8 + $0x20] sm:$0xff]  }
 0x260   :  { %1528 = vmatprep.subr.bf16.mxu0 %v2617_v24  ;;  %v1571_v24 = vsub.s32 1, %v2978_v35  ;;  %v2642_v35 = vld [vmem:[%s3572_s8 + $0x38] sm:$0xff]  }
 0x261   :  { %2430 = vmatpush3.bf16.msra.mxu1 %v2629_v33 }
 0x262   :  { %2431 = vmatprep.subr.bf16.mxu1 %v2721_v36  ;;  %v1572_v28 = vrot.slane %v1563_v48, %v1571_v24 }
 0x263   :  { %1529 = vmatpush1.bf16.msra.mxu0 %v2615_v26  ;;  %v1416_v1 = vpop.f32.mrb[28].mxu0  ;;  %v2640_v26 = vld [vmem:[%s3572_s8 + $0x28] sm:$0xff]  }
 0x264   :  { %1530 = vmatprep.subr.bf16.mxu0 %v2620_v31  ;;  %v2423_v45 = vpop.f32.mrb[29].mxu0  ;;  %v2641_v31 = vld [vmem:[%s3572_s8 + $0x30] sm:$0xff]  }
 0x265   :  { %v1419_v61 = vpop.f32.mrb[30].mxu0  ;;  %2432 = vmatpush3.bf16.msra.mxu1 %v2630_v34  ;;  %v2136_v34 = vld [vmem:[%s3571_s7] ss:$0 sm:$0xff] }
 0x266   :  { %v2424_v50 = vpop.f32.mrb[31].mxu0  ;;  %2433 = vmatprep.subr.bf16.mxu1 %v2721_v36 }
 0x267   :  { %1531 = vmatpush1.bf16.msra.mxu0 %v2618_v57  ;;  %v2650_v57 = vld [vmem:[%s3570_s6 + $0x38] sm:$0xff]  }
 0x268   :  { %1532 = vmatprep.subr.bf16.mxu0 %v2623_v58  ;;  %v2127_v58 = vld [vmem:[%s3569_s5] ss:$0 sm:$0xff]  ;;  %s2724_s5 = smov [#allocation2]  }
 0x269   :  { %2434 = vmatpush3.bf16.msra.mxu1 %v2631_v37  ;;  %v2145_v37 = vld [vmem:[%s3573_s9] ss:$0 sm:$0xff]  ;;  %s1950_s7 = sshll.u32 %s2724_s5, 4  ;;  %s2725_s9 = smov [#allocation4]   ;;  %s1951_s7 = int_to_ptr.vmem [resolvable:$true] %s1950_s7 }
 0x26a   :  { %2435 = vmatprep.subr.bf16.mxu1 %v2721_v36  ;;  %s1960_s0 = sshll.u32 %s2725_s9, 4  ;;  %s2672_s24 = scalar_lea.vmem %s1951_s7, 32  ;;  %s1961_s0 = int_to_ptr.vmem [resolvable:$true] %s1960_s0 }
 0x26b   :  { %1533 = vmatpush1.bf16.msra.mxu0 %v2621_v59  ;;  %p2673_p0 = scmp.ne.s32.totalorder %s1951_s7, %s2672_s24  ;;  %p2677_p1 = scmp.lt.s32.totalorder %s1951_s7, %s1951_s7 }
 0x26c   :  { %1534 = vmatprep.subr.bf16.mxu0 %v2626_v60  ;;  %p2678_p2 = scmp.lt.s32.totalorder %s2672_s24, %s2672_s24 }
 0x26d   :  { %2436 = vmatpush3.bf16.msra.mxu1 %v2632_v52 }
 0x26e   :  { %2437 = vmatprep.subr.bf16.mxu1 %v2721_v36  ;;  %p2679_p3 = por %p2678_p2, %p2677_p1 }
 0x26f   :  { %1535 = vmatpush1.bf16.msra.mxu0 %v2624_v62 }
 0x270   :  { %2445 = vmatprep.subr.bf16.mxu0 %v2721_v36  ;;  %p2680_p4 = pnand %p2679_p3, %p2673_p0 }
 0x30b   :  { %v1244_v39 = vpop.f32.mrb[20].mxu1 }
 0x30c   :  { %v1251_v40 = vadd.f32 %v1244_v39, %v3323_v38  ;;  %v1246_v41 = vpop.f32.mrb[21].mxu1  ;;  %v2633_v38 = vld [vmem:[%s3568_s4 + $0x30] sm:$0xff]  }
 0x30d   :  { %v1252_v3 = vadd.f32 %v1246_v41, %v3325_v54  ;;  %v1248_v5 = vpop.f32.mrb[22].mxu1  ;;  %2438 = vmatpush3.bf16.msra.mxu1 %v2633_v38  ;;  %v2634_v54 = vld [vmem:[%s3568_s4 + $0x38] sm:$0xff]  }
 0x30e   :  { %v1249_v53 = vpop.f32.mrb[23].mxu1  ;;  %2439 = vmatprep.subr.bf16.mxu1 %v2721_v36 }
 0x311   :  { %2440 = vmatpush3.bf16.msra.mxu1 %v2634_v54 }
 0x312   :  { %2465 = vmatprep.subr.bf16.mxu1 %v2721_v36 }
 0x32b   :  { %v2339_v7 = vpop.f32.mrb[24].mxu1 }
 0x32c   :  { %v2340_v9 = vpop.f32.mrb[25].mxu1 }
 0x32d   :  { %v2341_v11 = vadd.f32 %v2340_v9, %v2339_v7  ;;  %v2342_v13 = vpop.f32.mrb[26].mxu1 }
 0x32e   :  { %v2343_v15 = vpop.f32.mrb[27].mxu1 }
 0x32f   :  { %v1377_v17 = vadd.f32 %v2341_v11, %v2319_v51 }
 0x331   :  { %v1417_v19 = vadd.f32 %v1416_v1, %v1377_v17 }
 0x333   :  { %v1422_v21 = vpack.c.bf16 %v1417_v19, %v1417_v19 }
 0x335   :  { %1553 = vmatmul.mubr.bf16.vlgmr.msra.gmra.mrb[32].mxu0 %v1422_v21 }
 0x336   :  { %2461 = vmatprep.mubr.msk.bf16.mxu0 %vm2722_vm0, %v2721_v36  ;;  %2446 = vmatpush3.bf16.msra.mxu0 %v2643_v42 }
 0x337   :  { %2447 = vmatprep.subr.bf16.mxu0 %v2721_v36 }
 0x33a   :  { %2448 = vmatpush3.bf16.msra.mxu0 %v2644_v23 }
 0x33b   :  { %2449 = vmatprep.subr.bf16.mxu0 %v2721_v36 }
 0x33e   :  { %2450 = vmatpush3.bf16.msra.mxu0 %v2645_v43 }
 0x33f   :  { %2451 = vmatprep.subr.bf16.mxu0 %v2721_v36 }
 0x342   :  { %2452 = vmatpush3.bf16.msra.mxu0 %v2646_v25 }
 0x343   :  { %2453 = vmatprep.subr.bf16.mxu0 %v2721_v36 }
 0x346   :  { %2454 = vmatpush3.bf16.msra.mxu0 %v2647_v44 }
 0x347   :  { %2455 = vmatprep.subr.bf16.mxu0 %v2721_v36 }
 0x34a   :  { %2456 = vmatpush3.bf16.msra.mxu0 %v2648_v46 }
 0x34b   :  { %2457 = vmatprep.subr.bf16.mxu0 %v2721_v36 }
 0x34e   :  { %2458 = vmatpush3.bf16.msra.mxu0 %v2649_v56 }
 0x34f   :  { %2459 = vmatprep.subr.bf16.mxu0 %v2721_v36 }
 0x352   :  { %2460 = vmatpush3.bf16.msra.mxu0 %v2650_v57 }
 0x408   :  { %v1554_v2 = vpop.f32.mrb[32].mxu0 }
 0x409   :  { %v1561_v4 = vadd.f32 %v1554_v2, %v1251_v40  ;;  %v1556_v6 = vpop.f32.mrb[33].mxu0 }
 0x40a   :  { %v1562_v8 = vadd.f32 %v1556_v6, %v1252_v3  ;;  %v1558_v10 = vpop.f32.mrb[34].mxu0 }
 0x40b   :  { %v1575_v12 = vadd.f32 %v1568_v0, %v1561_v4  ;;  %v1559_v14 = vpop.f32.mrb[35].mxu0 }
 0x40c   :  { %v1576_v49 = vadd.f32 %v1572_v28, %v1562_v8 }
 0x40d   :  { %v1577_v27 = vmax.f32 %v1575_v12, 0.0 }
 0x40e   :  { %v1578_v51 = vmax.f32 %v1576_v49, 0.0 }
 0x40f   :  { %v1579_v32 = vpack.c.bf16 %v1577_v27, %v1577_v27 }
 0x410   :  { %v1580_v55 = vpack.c.bf16 %v1578_v51, %v1578_v51 }
 0x411   :  { %2442 = vmatmul.mubr.bf16.vlgmr.msra.gmra.mrb[28].mxu1 %v1579_v32 }
 0x412   :  { %2466 = vmatpush3.bf16.msra.mxu1 %v2635_v29  ;;  %2481 = vmatprep.mubr.msk.bf16.mxu1 %vm2722_vm0, %v2721_v36 }
 0x413   :  { %2467 = vmatprep.subr.bf16.mxu1 %v2721_v36 }
 0x416   :  { %2468 = vmatpush3.bf16.msra.mxu1 %v2636_v16 }
 0x417   :  { %2469 = vmatprep.subr.bf16.mxu1 %v2721_v36 }
 0x41a   :  { %2470 = vmatpush3.bf16.msra.mxu1 %v2637_v18 }
 0x41b   :  { %2471 = vmatprep.subr.bf16.mxu1 %v2721_v36 }
 0x41e   :  { %2472 = vmatpush3.bf16.msra.mxu1 %v2638_v20 }
 0x41f   :  { %2473 = vmatprep.subr.bf16.mxu1 %v2721_v36 }
 0x422   :  { %2474 = vmatpush3.bf16.msra.mxu1 %v2639_v22 }
 0x423   :  { %2475 = vmatprep.subr.bf16.mxu1 %v2721_v36 }
 0x426   :  { %2476 = vmatpush3.bf16.msra.mxu1 %v2640_v26 }
 0x427   :  { %2477 = vmatprep.subr.bf16.mxu1 %v2721_v36 }
 0x42a   :  { %2478 = vmatpush3.bf16.msra.mxu1 %v2641_v31 }
 0x42b   :  { %2479 = vmatprep.subr.bf16.mxu1 %v2721_v36 }
 0x42e   :  { %2480 = vmatpush3.bf16.msra.mxu1 %v2642_v35 }
 0x431   :  { %2482 = vmatmul.mubr.bf16.vlgmr.msra.gmra.mrb[32].mxu1 %v1580_v55 }
 0x4e4   :  { %v1686_v59 = vpop.f32.mrb[28].mxu1 }
 0x4e5   :  { %v1687_v1 = vadd.f32 %v2127_v58, %v1686_v59  ;;  %v2443_v45 = vpop.f32.mrb[29].mxu1 }
 0x4e6   :  { %v1689_v60 = vpop.f32.mrb[30].mxu1 }
 0x4e7   :  { %v1692_v61 = vmax.f32 %v1687_v1, 0.0  ;;  %v2444_v62 = vpop.f32.mrb[31].mxu1 }
 0x4e9   :  { %v1693_v50 = vpack.c.bf16 %v1692_v61, %v1692_v61 }
 0x4eb   :  { %2462 = vmatmul.mubr.bf16.vlgmr.msra.gmra.mrb[36].mxu0 %v1693_v50 }
 0x504   :  { %v1910_v63 = vpop.f32.mrb[32].mxu1 }
 0x505   :  { %v2483_v30 = vpop.f32.mrb[33].mxu1  ;;  %v1911_v3 = vadd.f32 %v2145_v37, %v1910_v63 }
 0x506   :  { %v1913_v36 = vpop.f32.mrb[34].mxu1 }
 0x507   :  { %v2484_v33 = vpop.f32.mrb[35].mxu1  ;;  %v1931_v7 = vsel %vm1930_vm3, %v1911_v3, -inf }
 0x5be   :  { %v1799_v52 = vpop.f32.mrb[36].mxu0 }
 0x5bf   :  { %v1800_v39 = vadd.f32 %v2136_v34, %v1799_v52  ;;  %v2463_v40 = vpop.f32.mrb[37].mxu0 }
 0x5c0   :  { %v1802_v41 = vpop.f32.mrb[38].mxu0 }
 0x5c1   :  { %v2464_v5 = vpop.f32.mrb[39].mxu0  ;;  %v1917_v53 = vsel %vm1916_vm2, %v1800_v39, -inf }
 0x5c2   :  { %1918 = vmax.xlane.f32.xlu0 %v1917_v53 }
 0x5c6   :  { %1932 = vmax.xlane.f32.xlu0 %v1931_v7 }
 0x64f   :  { %v1919_v9 = vpop.xlane.xlu0 %1918 }
 0x650   :  { %v1920_v11 = vsub.f32 %v1800_v39, %v1919_v9 }
 0x652   :  { %v1921_v13 = vmul.f32 1.442695, %v1920_v11 }
 0x653   :  { %v1933_v15 = vpop.xlane.xlu0 %1932 }
 0x654   :  { %2651 = vpow2.f32 %v1921_v13  ;;  %v1934_v17 = vsub.f32 %v1911_v3, %v1933_v15 }
 0x656   :  { %v1935_v19 = vmul.f32 1.442695, %v1934_v17 }
 0x658   :  { %2653 = vpow2.f32 %v1935_v19 }
 0x65e   :  { %v2652_v21 = vpop.eup %2651 }
 0x65f   :  { %v1923_v38 = vsel %vm1916_vm2, %v2652_v21, 0.0 }
 0x660   :  { %1924 = vadd.xlane.f32.xlu1 %v1923_v38 }
 0x662   :  { %v2654_v54 = vpop.eup %2653 }
 0x663   :  { %v1937_v42 = vsel %vm1930_vm3, %v2654_v54, 0.0 }
 0x664   :  { %1938 = vadd.xlane.f32.xlu1 %v1937_v42 }
 0x6ed   :  { %v1925_v23 = vpop.xlane.xlu1 %1924 }
 0x6ee   :  { %2655 = vlog2.f32 %v1925_v23 }
 0x6f1   :  { %v1939_v43 = vpop.xlane.xlu1 %1938 }
 0x6f2   :  { %2657 = vlog2.f32 %v1939_v43 }
 0x6f8   :  { %v2656_v25 = vpop.eup %2655 }
 0x6f9   :  { %v1927_v44 = vmul.f32 0.6931472, %v2656_v25 }
 0x6fb   :  { %v1928_v46 = vsub.f32 %v1920_v11, %v1927_v44 }
 0x6fc   :  { %v2658_v47 = vpop.eup %2657 }
 0x6fd   :  { %v1941_v48 = vmul.f32 0.6931472, %v2658_v47  ;;  %1929 = vst.msk [vmem:[#allocation2] sm:$0x3] %vm1916_vm2, %v1928_v46 }
 0x6fe   :  { %2683 = shalt.err (!%p2680_p4)
}
 0x6ff   :  { %s2684_s3 = scalar_lea.hbm %s3574_s10, 32 }
 0x700   :  { %p2685_p5 = scmp.ne.s32.totalorder %s3574_s10, %s2684_s3  ;;  %p2688_p6 = scmp.lt.u32.totalorder %s2684_s3, %s3574_s10 }
 0x702   :  { %p2690_p7 = pnand %p2688_p6, %p2685_p5 }
 0x704   :  { %2693 = shalt.err (!%p2690_p7)
}
 0x705   :  { %1953 = dma.vmem_to_hbm [thread:$0]  %s1951_s7, 32, %s3574_s10, [#allocation3]   ;;  %v1942_v0 = vsub.f32 %v1934_v17, %v1941_v48 }
 0x706   :  { %s2694_s13 = scalar_lea.vmem %s1961_s0, 32  ;;  %p2699_p9 = scmp.lt.s32.totalorder %s1961_s0, %s1961_s0 }
 0x707   :  { %1943 = vst.msk [vmem:[#allocation4] sm:$0x3] %vm1930_vm3, %v1942_v0  ;;  %p2695_p8 = scmp.ne.s32.totalorder %s1961_s0, %s2694_s13  ;;  %p2700_p10 = scmp.lt.s32.totalorder %s2694_s13, %s2694_s13 }
 0x709   :  { %p2701_p11 = por %p2700_p10, %p2699_p9 }
 0x70b   :  { %p2702_p12 = pnand %p2701_p11, %p2695_p8 }
 0x70d   :  { %2705 = shalt.err (!%p2702_p12)
}
 0x70e   :  { %s2706_s16 = scalar_lea.hbm %s3575_s11, 32 }
 0x70f   :  { %p2707_p13 = scmp.ne.s32.totalorder %s3575_s11, %s2706_s16  ;;  %p2710_p0 = scmp.lt.u32.totalorder %s2706_s16, %s3575_s11 }
 0x711   :  { %p2712_p1 = pnand %p2710_p0, %p2707_p13 }
 0x713   :  { %2715 = shalt.err (!%p2712_p1)
}
 0x714   :  { %1963 = dma.vmem_to_hbm [thread:$0]  %s1961_s0, 32, %s3575_s11, [#allocation5]  }
 0x715   :  { %2716 = dma.done.wait [#allocation3], 32  }
 0x716   :  { %2717 = vsyncadd [#allocation3], 4294967264 }
 0x717   :  { %2718 = dma.done.wait [#allocation5], 32  }
 0x718   :  { %2719 = vsyncadd [#allocation5], 4294967264 }
 0x719   :  { %1970 = vsyncpa [#allocation3], 1 }
 0x71a   :  { %1971 = vsyncpa [#allocation5], 1 }

</bundles_post_ra>
